<compile_context>
chip_gen: v6e
topology: v6e:2x2x1
jax: 0.10.0
libtpu: 0.0.40
codegen_flags: <defaults>
</compile_context>

<pallas_src>
import jax
import jax.numpy as jnp
from jax import lax
from jax.experimental import pallas as pl
from jax.experimental.pallas import tpu as pltpu

# ---------------------------------------------------------------- constants --
TILE_M = 256        # node row tile (fills the 256-wide MXU on v6e/v7x)
H1 = 128            # conv1 output width
H2 = 256            # conv2 output width
N_CLASSES = 10      # Linear(256, 10)
CP = 128            # class dim padded to a full lane width
BP = 8              # batch dim padded to a full sublane width
MAX_RESIDENT_NODES = 2048   # resident-Â path VMEM cap (fits v7x 64 MiB easily)


def _round_up(v, m):
    return (v + m - 1) // m * m


def _fused_vmem_bytes(np_, fp):
    """Estimate VMEM needed (double-buffered inputs/outputs + scratch)."""
    bf, f32 = 2, 4
    inputs = (np_ * np_ * bf            # Â (resident, constant block)
              + np_ * fp * bf           # X (resident, constant block)
              + fp * H1 * bf + H1 * H2 * bf
              + H1 * f32 + H2 * f32
              + H2 * CP * f32 + CP * f32)
    outputs = BP * CP * f32
    scratch = np_ * H1 * bf + np_ * H2 * bf + BP * H2 * f32
    return 2 * (inputs + outputs) + scratch + (8 << 20)   # + compiler headroom


# ------------------------------------------------------------------ kernel ---

def fused_gcn_kernel(lo_ref, hi_ref,                       # SMEM scalar prefetch
                     adj_ref, x_ref, w1_ref, w2_ref,
                     b1_ref, b2_ref, w3_ref, b3_ref,
                     out_ref,
                     xw1_ref, xw2_ref, hg_ref):            # VMEM scratch
    # grid = (layer L in {0,1}, row tile i). Both axes are sequential
    # ("arbitrary"): L==1 consumes xw2 written during L==0, and hg is a shared
    # accumulator across row tiles.
    L = pl.program_id(0)
    i = pl.program_id(1)
    ni = pl.num_programs(1)

    # ---- prologue (once): pooled accumulator init + XW1 resident in VMEM ----
    @pl.when((L == 0) & (i == 0))
    def _():
        hg_ref[...] = jnp.zeros_like(hg_ref)
        xw1_ref[...] = jnp.dot(
            x_ref[...], w1_ref[...],
            preferred_element_type=jnp.float32).astype(jnp.bfloat16)

    row0 = pl.multiple_of(i * TILE_M, TILE_M)
    adj_rows = adj_ref[pl.ds(row0, TILE_M), :]             # (TILE_M, Np) bf16

    # ---- layer 0: h1 = relu(Â X W1 + b1); keep (h1 @ W2) resident ----------
    @pl.when(L == 0)
    def _():
        h1 = jnp.dot(adj_rows, xw1_ref[...],
                     preferred_element_type=jnp.float32)   # K = Np in one dot
        h1 = jnp.maximum(h1 + b1_ref[...], 0.0)
        # TODO(synk): F.dropout treated as inference-mode identity (skipped).
        xw2_ref[pl.ds(row0, TILE_M), :] = jnp.dot(
            h1.astype(jnp.bfloat16), w2_ref[...],
            preferred_element_type=jnp.float32).astype(jnp.bfloat16)

    # ---- layer 1: h2 = relu(Â (h1 W2) + b2); ptr-driven segment pooling -----
    @pl.when(L == 1)
    def _():
        h2 = jnp.dot(adj_rows, xw2_ref[...],
                     preferred_element_type=jnp.float32)   # K = Np in one dot
        h2 = jnp.maximum(h2 + b2_ref[...], 0.0)            # (TILE_M, H2) f32

        node = row0 + lax.broadcasted_iota(jnp.int32, (BP, TILE_M), 1)
        gidx = lax.broadcasted_iota(jnp.int32, (BP, TILE_M), 0)
        mask = jnp.zeros((BP, TILE_M), jnp.float32)
        for b in range(BP):                                # BP=8, fully unrolled
            in_b = (gidx == b) & (node >= lo_ref[b]) & (node < hi_ref[b])
            mask = jnp.where(in_b, 1.0, mask)
        # bf16 mask matmul (fast MXU mode); accumulation stays f32.
        hg_ref[...] += jnp.dot(mask.astype(jnp.bfloat16),
                               h2.astype(jnp.bfloat16),
                               preferred_element_type=jnp.float32)

    # ---- epilogue (once): Linear(256,10) + masked log_softmax ---------------
    @pl.when((L == 1) & (i == ni - 1))
    def _():
        logits = jnp.dot(hg_ref[...], w3_ref[...],
                         preferred_element_type=jnp.float32) + b3_ref[...]
        col = lax.broadcasted_iota(jnp.int32, logits.shape, 1)
        logits = jnp.where(col < N_CLASSES, logits, jnp.float32(-1e30))
        m = jnp.max(logits, axis=-1, keepdims=True)
        z = logits - m
        lse = jnp.log(jnp.sum(jnp.exp(z), axis=-1, keepdims=True))
        out_ref[...] = z - lse


# ----------------------------------------------------------------- wrapper ---

def fused_gcn(lo, hi, adj_pad, x_pad, w1_pad, w2, b1, b2, w3, b3):
    np_, fp = x_pad.shape
    rt = np_ // TILE_M
    vmem_need = _fused_vmem_bytes(np_, fp)
    vmem_limit = min(max(vmem_need, 32 << 20), 64 << 20)   # per-call budget

    return pl.pallas_call(
        fused_gcn_kernel,
        out_shape=jax.ShapeDtypeStruct((BP, CP), jnp.float32),
        grid_spec=pltpu.PrefetchScalarGridSpec(
            num_scalar_prefetch=2,                          # lo, hi in SMEM
            grid=(2, rt),
            in_specs=[
                # Â: full-array block, constant index -> single DMA, then read
                # row slabs straight from VMEM for both layers.
                pl.BlockSpec((np_, np_), lambda L, i, lo, hi: (0, 0)),
                pl.BlockSpec((np_, fp),  lambda L, i, lo, hi: (0, 0)),   # X
                pl.BlockSpec((fp, H1),   lambda L, i, lo, hi: (0, 0)),   # W1
                pl.BlockSpec((H1, H2),   lambda L, i, lo, hi: (0, 0)),   # W2
                pl.BlockSpec((1, H1),    lambda L, i, lo, hi: (0, 0)),   # b1
                pl.BlockSpec((1, H2),    lambda L, i, lo, hi: (0, 0)),   # b2
                pl.BlockSpec((H2, CP),   lambda L, i, lo, hi: (0, 0)),   # W3 (padded)
                pl.BlockSpec((1, CP),    lambda L, i, lo, hi: (0, 0)),   # b3 (padded)
            ],
            out_specs=pl.BlockSpec((BP, CP), lambda L, i, lo, hi: (0, 0)),
            scratch_shapes=[
                pltpu.VMEM((np_, H1), jnp.bfloat16),   # X @ W1 (resident)
                pltpu.VMEM((np_, H2), jnp.bfloat16),   # relu(conv1) @ W2 (resident)
                pltpu.VMEM((BP, H2), jnp.float32),     # pooled per-graph sums
            ]),
        compiler_params=pltpu.CompilerParams(
            # Both axes are true sequential dependencies (see kernel comment).
            dimension_semantics=("arbitrary", "arbitrary"),
            vmem_limit_bytes=vmem_limit),
    )(lo, hi, adj_pad, x_pad, w1_pad, w2, b1, b2, w3, b3)


# ------------------------------------------------------------ graph "glue" ---

def normalized_adjacency_padded(edge_index, num_nodes, np_pad):
    """Â = D̂^{-1/2}(A+I)D̂^{-1/2} (GCNConv norm), built padded & cast once."""
    src, dst = edge_index[0], edge_index[1]
    # degrees via segment sum (self loop contributes 1; duplicates accumulate)
    deg = jnp.ones((num_nodes,), jnp.float32).at[dst].add(
        jnp.ones(dst.shape, jnp.float32))
    dinv = lax.rsqrt(deg)                                  # deg >= 1, safe
    w_edge = dinv[dst] * dinv[src]
    a = jnp.zeros((np_pad, np_pad), jnp.float32)
    a = a.at[dst, src].add(w_edge)                         # duplicates accumulate
    diag = jnp.arange(num_nodes)
    a = a.at[diag, diag].add(dinv * dinv)                  # self loops: 1/deg
    return a.astype(jnp.bfloat16)
    # TODO(synk): replace dense Â with block-sparse tiles for large graphs.


def gcn_forward(params, x, edge_index, ptr):
    n, f_in = x.shape
    np_nodes = _round_up(n, TILE_M)
    assert np_nodes <= MAX_RESIDENT_NODES, (
        "resident-Â kernel caps at 2048 padded nodes; see block-sparse TODO")
    fp = _round_up(f_in, 128)                              # 33 -> 128 (lane-dense K)

    adj_pad = normalized_adjacency_padded(edge_index, n, np_nodes)

    x_pad = jnp.zeros((np_nodes, fp), jnp.bfloat16).at[:n, :f_in].set(
        x.astype(jnp.bfloat16))
    w1_pad = jnp.zeros((fp, H1), jnp.bfloat16).at[:f_in, :].set(
        params["w1"].astype(jnp.bfloat16))
    w2 = params["w2"].astype(jnp.bfloat16)                 # [128, 256]
    b1 = params["b1"].reshape(1, H1).astype(jnp.float32)
    b2 = params["b2"].reshape(1, H2).astype(jnp.float32)
    w3 = jnp.zeros((H2, CP), jnp.float32).at[:, :N_CLASSES].set(params["w3"])
    b3 = jnp.zeros((1, CP), jnp.float32).at[0, :N_CLASSES].set(params["b3"])

    bsz = ptr.shape[0] - 1
    assert bsz <= BP, "batch dim padded to 8 graphs in this kernel"
    lo = jnp.zeros((BP,), jnp.int32).at[:bsz].set(ptr[:-1])
    hi = jnp.zeros((BP,), jnp.int32).at[:bsz].set(ptr[1:])

    out_pad = fused_gcn(lo, hi, adj_pad, x_pad, w1_pad, w2, b1, b2, w3, b3)
    return out_pad[:bsz, :N_CLASSES]


# -------------------------------------------------------------------- main ---

if __name__ == "__main__":
    key = jax.random.PRNGKey(0)
    k_x, k_e, k1, k2, k3, k4 = jax.random.split(key, 6)

    # small synthetic batch: 2 graphs (140 + 160 nodes), 33 input features.
    # N=300 pads to 512 -> grid (2 layers, 2 row tiles), exercising the tiling.
    num_nodes, in_dim = 300, 33
    ptr = jnp.array([0, 140, 300], dtype=jnp.int32)

    x = jax.random.normal(k_x, (num_nodes, in_dim), jnp.float32)
    edge_index = jax.random.randint(k_e, (2, 900), 0, num_nodes, dtype=jnp.int32)

    def glorot(k, shape):
        fan_in, fan_out = shape
        s = jnp.sqrt(6.0 / (fan_in + fan_out))
        return jax.random.uniform(k, shape, jnp.float32, -s, s)

    params = {
        "w1": glorot(k1, (in_dim, H1)), "b1": jnp.zeros((H1,), jnp.float32),
        "w2": glorot(k2, (H1, H2)),     "b2": jnp.zeros((H2,), jnp.float32),
        "w3": glorot(k3, (H2, N_CLASSES)),
        "b3": jax.random.uniform(k4, (N_CLASSES,), jnp.float32, -0.0625, 0.0625),
    }

    out = gcn_forward(params, x, edge_index, ptr)
    out = jax.block_until_ready(out)

    assert out.shape == (2, N_CLASSES), out.shape
    assert bool(jnp.all(jnp.isfinite(out)))
    # log_softmax rows should exp-sum to ~1
    assert bool(jnp.allclose(jnp.sum(jnp.exp(out), axis=-1), 1.0, atol=1e-4))
    print("KERNEL_OK")
</pallas_src>

<mosaic_0001>
module attributes {stable_mosaic.version = 11 : i64} {
  func.func @fused_gcn_kernel(%arg0: i32, %arg1: i32, %arg2: memref<8xi32, #tpu.memory_space<smem>>, %arg3: memref<8xi32, #tpu.memory_space<smem>>, %arg4: memref<512x512xbf16, #tpu.memory_space<vmem>>, %arg5: memref<512x128xbf16, #tpu.memory_space<vmem>>, %arg6: memref<128x128xbf16, #tpu.memory_space<vmem>>, %arg7: memref<128x256xbf16, #tpu.memory_space<vmem>>, %arg8: memref<1x128xf32, #tpu.memory_space<vmem>>, %arg9: memref<1x256xf32, #tpu.memory_space<vmem>>, %arg10: memref<256x128xf32, #tpu.memory_space<vmem>>, %arg11: memref<1x128xf32, #tpu.memory_space<vmem>>, %arg12: memref<8x128xf32, #tpu.memory_space<vmem>>, %arg13: memref<512x128xbf16, #tpu.memory_space<vmem>>, %arg14: memref<512x256xbf16, #tpu.memory_space<vmem>>, %arg15: memref<8x256xf32, #tpu.memory_space<vmem>>) attributes {dimension_semantics = [#tpu.dimension_semantics<arbitrary>, #tpu.dimension_semantics<arbitrary>], iteration_bounds = array<i64: 2, 2>, scalar_prefetch = 2 : i64, scratch_operands = 3 : i64, tpu.core_type = #tpu.core_type<tc>, window_params = [{pipeline_mode = #tpu.pipeline_mode<synchronous>, transform_indices = @transform_0, window_bounds = array<i64: 512, 512>}, {pipeline_mode = #tpu.pipeline_mode<synchronous>, transform_indices = @transform_1, window_bounds = array<i64: 512, 128>}, {pipeline_mode = #tpu.pipeline_mode<synchronous>, transform_indices = @transform_2, window_bounds = array<i64: 128, 128>}, {pipeline_mode = #tpu.pipeline_mode<synchronous>, transform_indices = @transform_3, window_bounds = array<i64: 128, 256>}, {pipeline_mode = #tpu.pipeline_mode<synchronous>, transform_indices = @transform_4, window_bounds = array<i64: 1, 128>}, {pipeline_mode = #tpu.pipeline_mode<synchronous>, transform_indices = @transform_5, window_bounds = array<i64: 1, 256>}, {pipeline_mode = #tpu.pipeline_mode<synchronous>, transform_indices = @transform_6, window_bounds = array<i64: 256, 128>}, {pipeline_mode = #tpu.pipeline_mode<synchronous>, transform_indices = @transform_7, window_bounds = array<i64: 1, 128>}, {pipeline_mode = #tpu.pipeline_mode<synchronous>, transform_indices = @transform_8, window_bounds = array<i64: 8, 128>}]} {
    %c0_i32 = arith.constant 0 : i32
    %0 = arith.cmpi eq, %arg0, %c0_i32 : i32
    %c0_i32_0 = arith.constant 0 : i32
    %1 = arith.cmpi eq, %arg1, %c0_i32_0 : i32
    %2 = arith.andi %0, %1 : i1
    %3 = arith.extui %2 : i1 to i32
    %c0_i32_1 = arith.constant 0 : i32
    %4 = arith.cmpi ne, %3, %c0_i32_1 : i32
    scf.if %4 {
      %cst = arith.constant 0.000000e+00 : f32
      %20 = vector.broadcast %cst : f32 to vector<8x256xf32>
      %c0_8 = arith.constant 0 : index
      %c0_9 = arith.constant 0 : index
      %21 = vector.load %arg15[%c0_8, %c0_9] : memref<8x256xf32, #tpu.memory_space<vmem>>, vector<8x256xf32>
      tpu.vector_store %arg15[%c0_8, %c0_9], %20 {strides = array<i32>} : memref<8x256xf32, #tpu.memory_space<vmem>>, vector<8x256xf32>,
      %c0_10 = arith.constant 0 : index
      %c0_11 = arith.constant 0 : index
      %22 = vector.load %arg5[%c0_10, %c0_11] : memref<512x128xbf16, #tpu.memory_space<vmem>>, vector<512x128xbf16>
      %c0_12 = arith.constant 0 : index
      %c0_13 = arith.constant 0 : index
      %23 = vector.load %arg6[%c0_12, %c0_13] : memref<128x128xbf16, #tpu.memory_space<vmem>>, vector<128x128xbf16>
      %cst_14 = arith.constant dense<0.000000e+00> : vector<512x128xf32>
      %24 = tpu.matmul %22, %23, %cst_14 {dimension_numbers = #tpu.dot_dimension_numbers<[1], [0], [0], [1], [0, 0, 1, 1], [], []>} : vector<512x128xbf16>, vector<128x128xbf16>, vector<512x128xf32> -> vector<512x128xf32>
      %25 = arith.truncf %24 : vector<512x128xf32> to vector<512x128xbf16>
      %c0_15 = arith.constant 0 : index
      %c0_16 = arith.constant 0 : index
      %26 = vector.load %arg13[%c0_15, %c0_16] : memref<512x128xbf16, #tpu.memory_space<vmem>>, vector<512x128xbf16>
      tpu.vector_store %arg13[%c0_15, %c0_16], %25 {strides = array<i32>} : memref<512x128xbf16, #tpu.memory_space<vmem>>, vector<512x128xbf16>,
    } else {
    }
    %c256_i32 = arith.constant 256 : i32
    %5 = arith.muli %arg1, %c256_i32 : i32
    %6 = tpu.assume_multiple %5, 256 : i32
    %7 = arith.index_cast %6 : i32 to index
    %c0 = arith.constant 0 : index
    %8 = vector.load %arg4[%7, %c0] : memref<512x512xbf16, #tpu.memory_space<vmem>>, vector<256x512xbf16>
    %c0_i32_2 = arith.constant 0 : i32
    %9 = arith.cmpi eq, %arg0, %c0_i32_2 : i32
    %10 = arith.extui %9 : i1 to i32
    %c0_i32_3 = arith.constant 0 : i32
    %11 = arith.cmpi ne, %10, %c0_i32_3 : i32
    scf.if %11 {
      %c0_8 = arith.constant 0 : index
      %c0_9 = arith.constant 0 : index
      %20 = vector.load %arg13[%c0_8, %c0_9] : memref<512x128xbf16, #tpu.memory_space<vmem>>, vector<512x128xbf16>
      %cst = arith.constant dense<0.000000e+00> : vector<256x128xf32>
      %21 = tpu.matmul %8, %20, %cst {dimension_numbers = #tpu.dot_dimension_numbers<[1], [0], [0], [1], [0, 0, 1, 1], [], []>} : vector<256x512xbf16>, vector<512x128xbf16>, vector<256x128xf32> -> vector<256x128xf32>
      %c0_10 = arith.constant 0 : index
      %c0_11 = arith.constant 0 : index
      %22 = vector.load %arg8[%c0_10, %c0_11] : memref<1x128xf32, #tpu.memory_space<vmem>>, vector<1x128xf32>
      %23 = vector.broadcast %22 : vector<1x128xf32> to vector<256x128xf32>
      %24 = arith.addf %21, %23 : vector<256x128xf32>
      %cst_12 = arith.constant 0.000000e+00 : f32
      %25 = vector.broadcast %cst_12 : f32 to vector<256x128xf32>
      %26 = arith.maximumf %24, %25 : vector<256x128xf32>
      %27 = arith.truncf %26 : vector<256x128xf32> to vector<256x128xbf16>
      %c0_13 = arith.constant 0 : index
      %c0_14 = arith.constant 0 : index
      %28 = vector.load %arg7[%c0_13, %c0_14] : memref<128x256xbf16, #tpu.memory_space<vmem>>, vector<128x256xbf16>
      %cst_15 = arith.constant dense<0.000000e+00> : vector<256x256xf32>
      %29 = tpu.matmul %27, %28, %cst_15 {dimension_numbers = #tpu.dot_dimension_numbers<[1], [0], [0], [1], [0, 0, 1, 1], [], []>} : vector<256x128xbf16>, vector<128x256xbf16>, vector<256x256xf32> -> vector<256x256xf32>
      %30 = arith.truncf %29 : vector<256x256xf32> to vector<256x256xbf16>
      %31 = arith.index_cast %6 : i32 to index
      %c0_16 = arith.constant 0 : index
      %32 = vector.load %arg14[%31, %c0_16] : memref<512x256xbf16, #tpu.memory_space<vmem>>, vector<256x256xbf16>
      tpu.vector_store %arg14[%31, %c0_16], %30 {strides = array<i32>} : memref<512x256xbf16, #tpu.memory_space<vmem>>, vector<256x256xbf16>,
    } else {
    }
    %c1_i32 = arith.constant 1 : i32
    %12 = arith.cmpi eq, %arg0, %c1_i32 : i32
    %13 = arith.extui %12 : i1 to i32
    %c0_i32_4 = arith.constant 0 : i32
    %14 = arith.cmpi ne, %13, %c0_i32_4 : i32
    scf.if %14 {
      %c0_8 = arith.constant 0 : index
      %c0_9 = arith.constant 0 : index
      %20 = vector.load %arg14[%c0_8, %c0_9] : memref<512x256xbf16, #tpu.memory_space<vmem>>, vector<512x256xbf16>
      %cst = arith.constant dense<0.000000e+00> : vector<256x256xf32>
      %21 = tpu.matmul %8, %20, %cst {dimension_numbers = #tpu.dot_dimension_numbers<[1], [0], [0], [1], [0, 0, 1, 1], [], []>} : vector<256x512xbf16>, vector<512x256xbf16>, vector<256x256xf32> -> vector<256x256xf32>
      %c0_10 = arith.constant 0 : index
      %c0_11 = arith.constant 0 : index
      %22 = vector.load %arg9[%c0_10, %c0_11] : memref<1x256xf32, #tpu.memory_space<vmem>>, vector<1x256xf32>
      %23 = vector.broadcast %22 : vector<1x256xf32> to vector<256x256xf32>
      %24 = arith.addf %21, %23 : vector<256x256xf32>
      %cst_12 = arith.constant 0.000000e+00 : f32
      %25 = vector.broadcast %cst_12 : f32 to vector<256x256xf32>
      %26 = arith.maximumf %24, %25 : vector<256x256xf32>
      %27 = tpu.iota {dimensions = array<i32: 1>} : vector<8x256xi32>
      %28 = vector.broadcast %6 : i32 to vector<8x256xi32>
      %29 = arith.addi %28, %27 : vector<8x256xi32>
      %30 = tpu.iota {dimensions = array<i32: 0>} : vector<8x256xi32>
      %cst_13 = arith.constant 0.000000e+00 : f32
      %31 = vector.broadcast %cst_13 : f32 to vector<8x256xf32>
      %c0_i32_14 = arith.constant 0 : i32
      %32 = vector.broadcast %c0_i32_14 : i32 to vector<8x256xi32>
      %33 = arith.cmpi eq, %30, %32 : vector<8x256xi32>
      %c0_15 = arith.constant 0 : index
      %34 = memref.load %arg2[%c0_15] : memref<8xi32, #tpu.memory_space<smem>>
      %35 = vector.broadcast %34 : i32 to vector<8x256xi32>
      %36 = arith.cmpi sge, %29, %35 : vector<8x256xi32>
      %37 = arith.andi %33, %36 : vector<8x256xi1>
      %c0_16 = arith.constant 0 : index
      %38 = memref.load %arg3[%c0_16] : memref<8xi32, #tpu.memory_space<smem>>
      %39 = vector.broadcast %38 : i32 to vector<8x256xi32>
      %40 = arith.cmpi slt, %29, %39 : vector<8x256xi32>
      %41 = arith.andi %37, %40 : vector<8x256xi1>
      %cst_17 = arith.constant 1.000000e+00 : f32
      %42 = vector.broadcast %cst_17 : f32 to vector<8x256xf32>
      %43 = arith.select %41, %42, %31 : vector<8x256xi1>, vector<8x256xf32>
      %c1_i32_18 = arith.constant 1 : i32
      %44 = vector.broadcast %c1_i32_18 : i32 to vector<8x256xi32>
      %45 = arith.cmpi eq, %30, %44 : vector<8x256xi32>
      %c1 = arith.constant 1 : index
      %46 = memref.load %arg2[%c1] : memref<8xi32, #tpu.memory_space<smem>>
      %47 = vector.broadcast %46 : i32 to vector<8x256xi32>
      %48 = arith.cmpi sge, %29, %47 : vector<8x256xi32>
      %49 = arith.andi %45, %48 : vector<8x256xi1>
      %c1_19 = arith.constant 1 : index
      %50 = memref.load %arg3[%c1_19] : memref<8xi32, #tpu.memory_space<smem>>
      %51 = vector.broadcast %50 : i32 to vector<8x256xi32>
      %52 = arith.cmpi slt, %29, %51 : vector<8x256xi32>
      %53 = arith.andi %49, %52 : vector<8x256xi1>
      %cst_20 = arith.constant 1.000000e+00 : f32
      %54 = vector.broadcast %cst_20 : f32 to vector<8x256xf32>
      %55 = arith.select %53, %54, %43 : vector<8x256xi1>, vector<8x256xf32>
      %c2_i32 = arith.constant 2 : i32
      %56 = vector.broadcast %c2_i32 : i32 to vector<8x256xi32>
      %57 = arith.cmpi eq, %30, %56 : vector<8x256xi32>
      %c2 = arith.constant 2 : index
      %58 = memref.load %arg2[%c2] : memref<8xi32, #tpu.memory_space<smem>>
      %59 = vector.broadcast %58 : i32 to vector<8x256xi32>
      %60 = arith.cmpi sge, %29, %59 : vector<8x256xi32>
      %61 = arith.andi %57, %60 : vector<8x256xi1>
      %c2_21 = arith.constant 2 : index
      %62 = memref.load %arg3[%c2_21] : memref<8xi32, #tpu.memory_space<smem>>
      %63 = vector.broadcast %62 : i32 to vector<8x256xi32>
      %64 = arith.cmpi slt, %29, %63 : vector<8x256xi32>
      %65 = arith.andi %61, %64 : vector<8x256xi1>
      %cst_22 = arith.constant 1.000000e+00 : f32
      %66 = vector.broadcast %cst_22 : f32 to vector<8x256xf32>
      %67 = arith.select %65, %66, %55 : vector<8x256xi1>, vector<8x256xf32>
      %c3_i32 = arith.constant 3 : i32
      %68 = vector.broadcast %c3_i32 : i32 to vector<8x256xi32>
      %69 = arith.cmpi eq, %30, %68 : vector<8x256xi32>
      %c3 = arith.constant 3 : index
      %70 = memref.load %arg2[%c3] : memref<8xi32, #tpu.memory_space<smem>>
      %71 = vector.broadcast %70 : i32 to vector<8x256xi32>
      %72 = arith.cmpi sge, %29, %71 : vector<8x256xi32>
      %73 = arith.andi %69, %72 : vector<8x256xi1>
      %c3_23 = arith.constant 3 : index
      %74 = memref.load %arg3[%c3_23] : memref<8xi32, #tpu.memory_space<smem>>
      %75 = vector.broadcast %74 : i32 to vector<8x256xi32>
      %76 = arith.cmpi slt, %29, %75 : vector<8x256xi32>
      %77 = arith.andi %73, %76 : vector<8x256xi1>
      %cst_24 = arith.constant 1.000000e+00 : f32
      %78 = vector.broadcast %cst_24 : f32 to vector<8x256xf32>
      %79 = arith.select %77, %78, %67 : vector<8x256xi1>, vector<8x256xf32>
      %c4_i32 = arith.constant 4 : i32
      %80 = vector.broadcast %c4_i32 : i32 to vector<8x256xi32>
      %81 = arith.cmpi eq, %30, %80 : vector<8x256xi32>
      %c4 = arith.constant 4 : index
      %82 = memref.load %arg2[%c4] : memref<8xi32, #tpu.memory_space<smem>>
      %83 = vector.broadcast %82 : i32 to vector<8x256xi32>
      %84 = arith.cmpi sge, %29, %83 : vector<8x256xi32>
      %85 = arith.andi %81, %84 : vector<8x256xi1>
      %c4_25 = arith.constant 4 : index
      %86 = memref.load %arg3[%c4_25] : memref<8xi32, #tpu.memory_space<smem>>
      %87 = vector.broadcast %86 : i32 to vector<8x256xi32>
      %88 = arith.cmpi slt, %29, %87 : vector<8x256xi32>
      %89 = arith.andi %85, %88 : vector<8x256xi1>
      %cst_26 = arith.constant 1.000000e+00 : f32
      %90 = vector.broadcast %cst_26 : f32 to vector<8x256xf32>
      %91 = arith.select %89, %90, %79 : vector<8x256xi1>, vector<8x256xf32>
      %c5_i32 = arith.constant 5 : i32
      %92 = vector.broadcast %c5_i32 : i32 to vector<8x256xi32>
      %93 = arith.cmpi eq, %30, %92 : vector<8x256xi32>
      %c5 = arith.constant 5 : index
      %94 = memref.load %arg2[%c5] : memref<8xi32, #tpu.memory_space<smem>>
      %95 = vector.broadcast %94 : i32 to vector<8x256xi32>
      %96 = arith.cmpi sge, %29, %95 : vector<8x256xi32>
      %97 = arith.andi %93, %96 : vector<8x256xi1>
      %c5_27 = arith.constant 5 : index
      %98 = memref.load %arg3[%c5_27] : memref<8xi32, #tpu.memory_space<smem>>
      %99 = vector.broadcast %98 : i32 to vector<8x256xi32>
      %100 = arith.cmpi slt, %29, %99 : vector<8x256xi32>
      %101 = arith.andi %97, %100 : vector<8x256xi1>
      %cst_28 = arith.constant 1.000000e+00 : f32
      %102 = vector.broadcast %cst_28 : f32 to vector<8x256xf32>
      %103 = arith.select %101, %102, %91 : vector<8x256xi1>, vector<8x256xf32>
      %c6_i32 = arith.constant 6 : i32
      %104 = vector.broadcast %c6_i32 : i32 to vector<8x256xi32>
      %105 = arith.cmpi eq, %30, %104 : vector<8x256xi32>
      %c6 = arith.constant 6 : index
      %106 = memref.load %arg2[%c6] : memref<8xi32, #tpu.memory_space<smem>>
      %107 = vector.broadcast %106 : i32 to vector<8x256xi32>
      %108 = arith.cmpi sge, %29, %107 : vector<8x256xi32>
      %109 = arith.andi %105, %108 : vector<8x256xi1>
      %c6_29 = arith.constant 6 : index
      %110 = memref.load %arg3[%c6_29] : memref<8xi32, #tpu.memory_space<smem>>
      %111 = vector.broadcast %110 : i32 to vector<8x256xi32>
      %112 = arith.cmpi slt, %29, %111 : vector<8x256xi32>
      %113 = arith.andi %109, %112 : vector<8x256xi1>
      %cst_30 = arith.constant 1.000000e+00 : f32
      %114 = vector.broadcast %cst_30 : f32 to vector<8x256xf32>
      %115 = arith.select %113, %114, %103 : vector<8x256xi1>, vector<8x256xf32>
      %c7_i32 = arith.constant 7 : i32
      %116 = vector.broadcast %c7_i32 : i32 to vector<8x256xi32>
      %117 = arith.cmpi eq, %30, %116 : vector<8x256xi32>
      %c7 = arith.constant 7 : index
      %118 = memref.load %arg2[%c7] : memref<8xi32, #tpu.memory_space<smem>>
      %119 = vector.broadcast %118 : i32 to vector<8x256xi32>
      %120 = arith.cmpi sge, %29, %119 : vector<8x256xi32>
      %121 = arith.andi %117, %120 : vector<8x256xi1>
      %c7_31 = arith.constant 7 : index
      %122 = memref.load %arg3[%c7_31] : memref<8xi32, #tpu.memory_space<smem>>
      %123 = vector.broadcast %122 : i32 to vector<8x256xi32>
      %124 = arith.cmpi slt, %29, %123 : vector<8x256xi32>
      %125 = arith.andi %121, %124 : vector<8x256xi1>
      %cst_32 = arith.constant 1.000000e+00 : f32
      %126 = vector.broadcast %cst_32 : f32 to vector<8x256xf32>
      %127 = arith.select %125, %126, %115 : vector<8x256xi1>, vector<8x256xf32>
      %c0_33 = arith.constant 0 : index
      %c0_34 = arith.constant 0 : index
      %128 = vector.load %arg15[%c0_33, %c0_34] : memref<8x256xf32, #tpu.memory_space<vmem>>, vector<8x256xf32>
      %129 = arith.truncf %127 : vector<8x256xf32> to vector<8x256xbf16>
      %130 = arith.truncf %26 : vector<256x256xf32> to vector<256x256xbf16>
      %cst_35 = arith.constant dense<0.000000e+00> : vector<8x256xf32>
      %131 = tpu.matmul %129, %130, %cst_35 {dimension_numbers = #tpu.dot_dimension_numbers<[1], [0], [0], [1], [0, 0, 1, 1], [], []>} : vector<8x256xbf16>, vector<256x256xbf16>, vector<8x256xf32> -> vector<8x256xf32>
      %132 = arith.addf %128, %131 : vector<8x256xf32>
      %c0_36 = arith.constant 0 : index
      %c0_37 = arith.constant 0 : index
      %133 = vector.load %arg15[%c0_36, %c0_37] : memref<8x256xf32, #tpu.memory_space<vmem>>, vector<8x256xf32>
      tpu.vector_store %arg15[%c0_36, %c0_37], %132 {strides = array<i32>} : memref<8x256xf32, #tpu.memory_space<vmem>>, vector<8x256xf32>,
    } else {
    }
    %c1_i32_5 = arith.constant 1 : i32
    %15 = arith.cmpi eq, %arg0, %c1_i32_5 : i32
    %c1_i32_6 = arith.constant 1 : i32
    %16 = arith.cmpi eq, %arg1, %c1_i32_6 : i32
    %17 = arith.andi %15, %16 : i1
    %18 = arith.extui %17 : i1 to i32
    %c0_i32_7 = arith.constant 0 : i32
    %19 = arith.cmpi ne, %18, %c0_i32_7 : i32
    scf.if %19 {
      %c0_8 = arith.constant 0 : index
      %c0_9 = arith.constant 0 : index
      %20 = vector.load %arg15[%c0_8, %c0_9] : memref<8x256xf32, #tpu.memory_space<vmem>>, vector<8x256xf32>
      %c0_10 = arith.constant 0 : index
      %c0_11 = arith.constant 0 : index
      %21 = vector.load %arg10[%c0_10, %c0_11] : memref<256x128xf32, #tpu.memory_space<vmem>>, vector<256x128xf32>
      %cst = arith.constant dense<0.000000e+00> : vector<8x128xf32>
      %22 = tpu.matmul %20, %21, %cst {dimension_numbers = #tpu.dot_dimension_numbers<[1], [0], [0], [1], [0, 0, 1, 1], [], []>} : vector<8x256xf32>, vector<256x128xf32>, vector<8x128xf32> -> vector<8x128xf32>
      %c0_12 = arith.constant 0 : index
      %c0_13 = arith.constant 0 : index
      %23 = vector.load %arg11[%c0_12, %c0_13] : memref<1x128xf32, #tpu.memory_space<vmem>>, vector<1x128xf32>
      %24 = vector.broadcast %23 : vector<1x128xf32> to vector<8x128xf32>
      %25 = arith.addf %22, %24 : vector<8x128xf32>
      %26 = tpu.iota {dimensions = array<i32: 1>} : vector<8x128xi32>
      %c10_i32 = arith.constant 10 : i32
      %27 = vector.broadcast %c10_i32 : i32 to vector<8x128xi32>
      %28 = arith.cmpi slt, %26, %27 : vector<8x128xi32>
      %cst_14 = arith.constant -1.000000e+30 : f32
      %29 = vector.broadcast %cst_14 : f32 to vector<8x128xf32>
      %30 = arith.select %28, %25, %29 : vector<8x128xi1>, vector<8x128xf32>
      %cst_15 = arith.constant dense<0xFF800000> : vector<8xf32>
      %31 = vector.multi_reduction <maximumf>, %30, %cst_15 [1] : vector<8x128xf32> to vector<8xf32>
      %32 = vector.shape_cast %31 : vector<8xf32> to vector<8x1xf32>
      %33 = vector.broadcast %32 : vector<8x1xf32> to vector<8x128xf32>
      %34 = arith.subf %30, %33 : vector<8x128xf32>
      %35 = math.exp %34 : vector<8x128xf32>
      %cst_16 = arith.constant dense<0.000000e+00> : vector<8xf32>
      %36 = vector.multi_reduction <add>, %35, %cst_16 [1] : vector<8x128xf32> to vector<8xf32>
      %37 = vector.shape_cast %36 : vector<8xf32> to vector<8x1xf32>
      %38 = math.log %37 : vector<8x1xf32>
      %39 = vector.broadcast %38 : vector<8x1xf32> to vector<8x128xf32>
      %40 = arith.subf %34, %39 : vector<8x128xf32>
      %c0_17 = arith.constant 0 : index
      %c0_18 = arith.constant 0 : index
      %41 = vector.load %arg12[%c0_17, %c0_18] : memref<8x128xf32, #tpu.memory_space<vmem>>, vector<8x128xf32>
      tpu.vector_store %arg12[%c0_17, %c0_18], %40 {strides = array<i32>} : memref<8x128xf32, #tpu.memory_space<vmem>>, vector<8x128xf32>,
    } else {
    }
    return
  }
  func.func @transform_0(%arg0: i32, %arg1: i32, %arg2: memref<8xi32, #tpu.memory_space<smem>>, %arg3: memref<8xi32, #tpu.memory_space<smem>>) -> (i32, i32) {
    %c0_i32 = arith.constant 0 : i32
    %c0_i32_0 = arith.constant 0 : i32
    %c0_i32_1 = arith.constant 0 : i32
    return %c0_i32, %c0_i32_0 : i32, i32
  }
  func.func @transform_1(%arg0: i32, %arg1: i32, %arg2: memref<8xi32, #tpu.memory_space<smem>>, %arg3: memref<8xi32, #tpu.memory_space<smem>>) -> (i32, i32) {
    %c0_i32 = arith.constant 0 : i32
    %c0_i32_0 = arith.constant 0 : i32
    %c0_i32_1 = arith.constant 0 : i32
    return %c0_i32, %c0_i32_0 : i32, i32
  }
  func.func @transform_2(%arg0: i32, %arg1: i32, %arg2: memref<8xi32, #tpu.memory_space<smem>>, %arg3: memref<8xi32, #tpu.memory_space<smem>>) -> (i32, i32) {
    %c0_i32 = arith.constant 0 : i32
    %c0_i32_0 = arith.constant 0 : i32
    %c0_i32_1 = arith.constant 0 : i32
    return %c0_i32, %c0_i32_0 : i32, i32
  }
  func.func @transform_3(%arg0: i32, %arg1: i32, %arg2: memref<8xi32, #tpu.memory_space<smem>>, %arg3: memref<8xi32, #tpu.memory_space<smem>>) -> (i32, i32) {
    %c0_i32 = arith.constant 0 : i32
    %c0_i32_0 = arith.constant 0 : i32
    %c0_i32_1 = arith.constant 0 : i32
    return %c0_i32, %c0_i32_0 : i32, i32
  }
  func.func @transform_4(%arg0: i32, %arg1: i32, %arg2: memref<8xi32, #tpu.memory_space<smem>>, %arg3: memref<8xi32, #tpu.memory_space<smem>>) -> (i32, i32) {
    %c0_i32 = arith.constant 0 : i32
    %c0_i32_0 = arith.constant 0 : i32
    %c0_i32_1 = arith.constant 0 : i32
    return %c0_i32, %c0_i32_0 : i32, i32
  }
  func.func @transform_5(%arg0: i32, %arg1: i32, %arg2: memref<8xi32, #tpu.memory_space<smem>>, %arg3: memref<8xi32, #tpu.memory_space<smem>>) -> (i32, i32) {
    %c0_i32 = arith.constant 0 : i32
    %c0_i32_0 = arith.constant 0 : i32
    %c0_i32_1 = arith.constant 0 : i32
    return %c0_i32, %c0_i32_0 : i32, i32
  }
  func.func @transform_6(%arg0: i32, %arg1: i32, %arg2: memref<8xi32, #tpu.memory_space<smem>>, %arg3: memref<8xi32, #tpu.memory_space<smem>>) -> (i32, i32) {
    %c0_i32 = arith.constant 0 : i32
    %c0_i32_0 = arith.constant 0 : i32
    %c0_i32_1 = arith.constant 0 : i32
    return %c0_i32, %c0_i32_0 : i32, i32
  }
  func.func @transform_7(%arg0: i32, %arg1: i32, %arg2: memref<8xi32, #tpu.memory_space<smem>>, %arg3: memref<8xi32, #tpu.memory_space<smem>>) -> (i32, i32) {
    %c0_i32 = arith.constant 0 : i32
    %c0_i32_0 = arith.constant 0 : i32
    %c0_i32_1 = arith.constant 0 : i32
    return %c0_i32, %c0_i32_0 : i32, i32
  }
  func.func @transform_8(%arg0: i32, %arg1: i32, %arg2: memref<8xi32, #tpu.memory_space<smem>>, %arg3: memref<8xi32, #tpu.memory_space<smem>>) -> (i32, i32) {
    %c0_i32 = arith.constant 0 : i32
    %c0_i32_0 = arith.constant 0 : i32
    %c0_i32_1 = arith.constant 0 : i32
    return %c0_i32, %c0_i32_0 : i32, i32
  }
}

</mosaic_0001>

<bundles_post_ra>
// kernel: tpu_custom_call.1
= control target key start
LH: loop header
LB: loop body
LE: loop exit
PB: predicated region body
PF: predicated region fallthrough
CT: control target
= control target key end

     0   :  { %s6110_s13 = smov [#allocation6]   ;;  %s7548_s0 = inlined_call_operand.hbm [shape: s32[8], index: 0, kind: input, shape index: {}]   ;;  %s7549_s2 = inlined_call_operand.hbm [shape: bf16[512,512], index: 2, kind: input, shape index: {}]   ;;  %s7550_s3 = inlined_call_operand.hbm [shape: bf16[512,128], index: 3, kind: input, shape index: {}]   ;;  %s7551_s4 = inlined_call_operand.hbm [shape: bf16[128,128], index: 4, kind: input, shape index: {}]   ;;  %s7552_s5 = inlined_call_operand.hbm [shape: bf16[128,256], index: 5, kind: input, shape index: {}]   ;;  %s7553_s6 = inlined_call_operand.vmem [shape: f32[1,128], index: 6, kind: input, shape index: {}]   ;;  %s7554_s7 = inlined_call_operand.vmem [shape: f32[1,256], index: 7, kind: input, shape index: {}]   ;;  %s7555_s8 = inlined_call_operand.hbm [shape: f32[256,128], index: 8, kind: input, shape index: {}]   ;;  %s7556_s9 = inlined_call_operand.vmem [shape: f32[1,128], index: 9, kind: input, shape index: {}]   ;;  %s7557_s10 = inlined_call_operand.hbm [shape: f32[8,128], index: 10, kind: output, shape index: {}]   ;;  %s7558_s1 = inlined_call_operand.vmem [shape: s32[8], index: 1, kind: input, shape index: {}]  }
   0x1   :  { %16 = dma.hbm_to_smem %s7548_s0, 16, %s6110_s13, [#allocation5] }
   0x2   :  { %s17_s18 = sshll.u32 %s7558_s1, 4  ;;  %s18_s18 = int_to_ptr.vmem [resolvable:$true] %s17_s18 }
   0x3   :  { %s5886_s19 = scalar_lea.vmem %s18_s18, 16  ;;  %p5891_p1 = scmp.lt.s32.totalorder %s18_s18, %s18_s18 }
   0x4   :  { %p5887_p0 = scmp.ne.s32.totalorder %s18_s18, %s5886_s19  ;;  %p5892_p2 = scmp.lt.s32.totalorder %s5886_s19, %s5886_s19 }
   0x6   :  { %p5893_p3 = por %p5892_p2, %p5891_p1 }
   0x8   :  { %p5894_p4 = pnand %p5893_p3, %p5887_p0 }
   0xa   :  { %5897 = shalt.err (!%p5894_p4)  }
   0xb   :  { %s6111_s20 = smov [#allocation7]  }
   0xc   :  { %20 = dma.vmem_to_smem %s18_s18, 16, %s6111_s20, [#allocation5] }
   0xd   :  { %6072 = dma.done.wait [#allocation5], 32 }
   0xe   :  { %6073 = vsyncadd [#allocation5], 4294967264 }
   0xf   :  { %22 = sfence }
  0x10   :  { %23 = vsyncpa [#allocation9], 0 }
  0x11   :  { %24 = vsyncpa [#allocation12], 0 }
  0x12   :  { %25 = vsyncpa [#allocation15], 0 }
  0x13   :  { %26 = vsyncpa [#allocation10], 0  ;;  %s6188_s0 = smov 0   ;;  %s6190_s1 = smov 0  }
  0x14   :  { %s6192_s21 = smov 0   ;;  %s6194_s22 = smov 0  }
  0x15   :  { %s6196_s23 = smov 0  }
  0x16 LB: > { %s6112_s24 = smov [#allocation11]   ;;  %s7559_s26 = sadd.s32 4294967295, %s6108_s23   ;;  %s6108_s23 = sphi %s6196_s23, %s32_s23   ;;  %s6104_s22 = sphi %s6194_s22, %s7839_s22   ;;  %s6100_s21 = sphi %s6192_s21, %s7838_s21   ;;  %s6096_s1 = sphi %s6190_s1, %s7837_s1   ;;  %s6092_s0 = sphi %s6188_s0, %s7836_s0  }
  0x17   : > { %s263_s25 = sshll.u32 %s6112_s24, 4  ;;  %p4458_p5 = scmp.ge.s32.totalorder %s6108_s23, 1  ;;  %s264_s25 = int_to_ptr.vmem [resolvable:$true] %s263_s25 }
  0x18   : > { %p238_p6 = scmp.lt.s32.totalorder %s6108_s23, 5  ;;  %p6218_p7 = scmp.eq.s32.totalorder %s7559_s26, 0 }
  0x19   : > { %s6113_s29 = smov [#allocation14]   ;;  %s5909_s13 = scalar_lea.vmem %s264_s25, 4096 }
  0x1a   : > { %p6222_p8 = pnand %p4458_p5, %p238_p6  ;;  %s289_s30 = sshll.u32 %s6113_s29, 4  ;;  %s6228_s30 = int_to_ptr.vmem [resolvable:$true] %s289_s30 }
  0x1b   : > { %p5910_p12 = scmp.ne.s32.totalorder %s264_s25, %s5909_s13  ;;  %p5917_p1 = scmp.lt.s32.totalorder %s264_s25, %s264_s25 }
  0x1c   : > { %p5597_p9 = pneg %p6222_p8  ;;  %p5918_p2 = scmp.lt.s32.totalorder %s5909_s13, %s5909_s13 }
  0x1e   : > { %p6232_p10 = pnand %p6218_p7, %p5597_p9  ;;  %p5919_p3 = por %p5918_p2, %p5917_p1 }
  0x20   : > { %p6238_p11 = pneg %p6232_p10 }
  0x22   : > { %p5912_p13 = pnand %p5910_p12, %p6238_p11 }
  0x24   : > { %p5913_p0 = pneg %p5912_p13 }
  0x26   : > { %p5920_p4 = pnand %p5919_p3, %p5913_p0 }
  0x28   : > { %5923 = shalt.err (!%p5920_p4)
}
  0x29   : > { %s7562_s14 = smov 64   ;;  %s6115_s15 = smov 4  }
  0x2a   : > { %5603 = dma.hbm_to_vmem [thread:$0]  (!%p6232_p10), %s7550_s3, 4096, %s264_s25, [#allocation12], %s7562_s14, %s7562_s14, %s6115_s15  }
  0x2b   : > { %s5935_s18 = scalar_lea.vmem %s6228_s30, 2048  ;;  %p5943_p12 = scmp.lt.s32.totalorder %s6228_s30, %s6228_s30 }
  0x2c   : > { %p5936_p5 = scmp.ne.s32.totalorder %s6228_s30, %s5935_s18  ;;  %p5944_p13 = scmp.lt.s32.totalorder %s5935_s18, %s5935_s18 }
  0x2e   : > { %p5938_p6 = pnand %p5936_p5, %p6238_p11  ;;  %p5945_p0 = por %p5944_p13, %p5943_p12 }
  0x30   : > { %p5939_p9 = pneg %p5938_p6 }
  0x32   : > { %p5946_p1 = pnand %p5945_p0, %p5939_p9 }
  0x34   : > { %5949 = shalt.err (!%p5946_p1)
}
  0x35   : > { %s7560_s19 = smov 128   ;;  %s7561_s20 = smov 8  }
  0x36   : > { %5609 = dma.hbm_to_vmem [thread:$0]  (!%p6232_p10), %s7552_s5, 2048, %s6228_s30, [#allocation15], %s7560_s19, %s7560_s19, %s7561_s20  }
  0x37   : > { %s41_s29 = sadd.s32 1, %s6100_s21  ;;  %s44_s13 = sadd.s32 1, %s6104_s22 }
  0x38   : > { %p42_p2 = scmp.ge.s32.totalorder %s41_s29, 2  ;;  %s6118_s16 = smov [#allocation8]  }
  0x39   : > { %s250_s17 = sshll.u32 %s6118_s16, 4  ;;  %s251_s17 = int_to_ptr.vmem [resolvable:$true] %s250_s17 }
  0x3a   : > { %s7841_s29 = smov (%p42_p2, %s41_s29), 0  ;;  %s7843_s13 = smov (!%p42_p2, %s44_s13), %s6104_s22 }
  0x3b   : > { %p46_p3 = scmp.ge.s32.totalorder %s7843_s13, 2  ;;  %s5961_s18 = scalar_lea.vmem %s251_s17, 16384 }
  0x3c   : > { %p5962_p4 = scmp.ne.s32.totalorder %s251_s17, %s5961_s18  ;;  %p5969_p9 = scmp.lt.s32.totalorder %s251_s17, %s251_s17 }
  0x3d   : > { %p5970_p12 = scmp.lt.s32.totalorder %s5961_s18, %s5961_s18 }
  0x3e   : > { %p5964_p5 = pnand %p5962_p4, %p6238_p11 }
  0x3f   : > { %p5971_p13 = por %p5970_p12, %p5969_p9 }
  0x40   : > { %p5965_p6 = pneg %p5964_p5 }
  0x42   : > { %p5972_p0 = pnand %p5971_p13, %p5965_p6 }
  0x44   : > { %5975 = shalt.err (!%p5972_p0)
}
  0x45   : > { %s6119_s30 = smov 256   ;;  %s6120_s24 = smov 16  }
  0x46   : > { %5600 = dma.hbm_to_vmem [thread:$0]  (!%p6232_p10), %s7549_s2, 16384, %s251_s17, [#allocation9], %s6119_s30, %s6119_s30, %s6120_s24  }
  0x47   : > { %s7845_s13 = smov (%p46_p3, %s7843_s13), 0  ;;  %s6121_s16 = smov [#allocation13]  }
  0x48   : > { %s276_s19 = sshll.u32 %s6121_s16, 4  ;;  %s6122_s20 = smov [#allocation16]   ;;  %s277_s19 = int_to_ptr.vmem [resolvable:$true] %s276_s19 }
  0x49   : > { %s308_s14 = sshll.u32 %s6122_s20, 4  ;;  %s5987_s18 = scalar_lea.vmem %s277_s19, 1024  ;;  %s309_s14 = int_to_ptr.vmem [resolvable:$true] %s308_s14 }
  0x4a   : > { %p5988_p1 = scmp.ne.s32.totalorder %s277_s19, %s5987_s18  ;;  %p5995_p5 = scmp.lt.s32.totalorder %s277_s19, %s277_s19 }
  0x4b   : > { %p5996_p6 = scmp.lt.s32.totalorder %s5987_s18, %s5987_s18 }
  0x4c   : > { %p5990_p2 = pnand %p5988_p1, %p6238_p11 }
  0x4d   : > { %p5997_p9 = por %p5996_p6, %p5995_p5 }
  0x4e   : > { %p5991_p4 = pneg %p5990_p2 }
  0x50   : > { %p5998_p12 = pnand %p5997_p9, %p5991_p4 }
  0x52   : > { %6001 = shalt.err (!%p5998_p12)
}
  0x53   : > { %s7673_s26 = smov 64   ;;  %s6013_s20 = scalar_lea.vmem %s309_s14, 4096 }
  0x54   : > { %5606 = dma.hbm_to_vmem [thread:$0]  (!%p6232_p10), %s7551_s4, 1024, %s277_s19, [#allocation12], %s7673_s26, %s7673_s26, %s6115_s15  }
  0x55   : > { %p6014_p3 = scmp.ne.s32.totalorder %s309_s14, %s6013_s20  ;;  %p6021_p1 = scmp.lt.s32.totalorder %s309_s14, %s309_s14 }
  0x56   : > { %p6022_p2 = scmp.lt.s32.totalorder %s6013_s20, %s6013_s20 }
  0x57   : > { %p6016_p13 = pnand %p6014_p3, %p6238_p11 }
  0x58   : > { %p6023_p5 = por %p6022_p2, %p6021_p1 }
  0x59   : > { %p6017_p0 = pneg %p6016_p13 }
  0x5b   : > { %p6024_p4 = pnand %p6023_p5, %p6017_p0 }
  0x5d   : > { %6027 = shalt.err (!%p6024_p4)
}
  0x5e   : > { %s7674_s24 = smov 8   ;;  %s7675_s25 = smov 128  }
  0x5f   : > { %5612 = dma.hbm_to_vmem [thread:$0]  (!%p6232_p10), %s7555_s8, 4096, %s309_s14, [#allocation15], %s7675_s25, %s7675_s25, %s7674_s24  }
  0x60   : > { %327 = sbr.rel (%p6222_p8) target bundleno = 2268 (0x8dc), region = 52 }
  0x65   : > { %6075 = dma.done.wait (%p6218_p7), [#allocation9], 16384  }
  0x66   : > { %6077 = vsyncadd (%p6218_p7), [#allocation9], 4294950912 }
  0x67   : > { %6079 = dma.done.wait (%p6218_p7), [#allocation12], 5120  }
  0x68   : > { %6081 = vsyncadd (%p6218_p7), [#allocation12], 4294962176 }
  0x69   : > { %6083 = dma.done.wait (%p6218_p7), [#allocation15], 6144  }
  0x6a   : > { %6085 = vsyncadd (%p6218_p7), [#allocation15], 4294961152  ;;  %p368_p8 = scmp.eq.s32.totalorder %s6096_s1, 0  ;;  %p369_p10 = scmp.eq.s32.totalorder %s6092_s0, 0 }
  0x6c   : > { %p370_p11 = pnand %p369_p10, %p368_p8 }
  0x6e   : > { %373 = sbr.rel (%p370_p11) target bundleno = 406 (0x196), region = 76 }
  0x73   : > { %v5682_v0 = vld [vmem:[#allocation13 + $0x38] sm:$0xff]   ;;  %v6123_v1 = vmov 0.0   ;;  %v5683_v2 = vld [vmem:[#allocation13 + $0x30] sm:$0xff]   ;;  %v5684_v3 = vld [vmem:[#allocation13 + $0x28] sm:$0xff]  }
  0x74   : > { %374 = vst [vmem:[#allocation4] sm:$0xff] %v6123_v1  ;;  %375 = vst [vmem:[#allocation4 + $0x8] sm:$0xff] %v6123_v1  ;;  %5461 = vmatprep.subr.bf16.mxu0 %v5682_v0  ;;  %5541 = vmatprep.subr.bf16.mxu1 %v5682_v0  ;;  %v5685_v4 = vld [vmem:[#allocation13 + $0x20] sm:$0xff]   ;;  %v5686_v7 = vld [vmem:[#allocation13 + $0x18] sm:$0xff]  }
  0x75   : > { %5462 = vmatpush3.bf16.msra.mxu0 %v5682_v0  ;;  %5549 = vmatpush3.bf16.msra.mxu1 %v5682_v0  ;;  %v5690_v5 = vld [vmem:[#allocation11] sm:$0xff]   ;;  %v5687_v8 = vld [vmem:[#allocation13 + $0x10] sm:$0xff]   ;;  %v5688_v9 = vld [vmem:[#allocation13 + $0x8] sm:$0xff]  }
  0x76   : > { %5463 = vmatprep.subr.bf16.mxu0 %v5683_v2  ;;  %5542 = vmatprep.subr.bf16.mxu1 %v5683_v2  ;;  %v5691_v6 = vld [vmem:[#allocation11 + $0x80] sm:$0xff]   ;;  %v5692_v11 = vld [vmem:[#allocation11 + $0x8] sm:$0xff]   ;;  %v5694_v13 = vld [vmem:[#allocation11 + $0x10] sm:$0xff]  }
  0x77   : > { %5477 = vmatprep.mubr.bf16.mxu0 %v5690_v5  ;;  %5509 = vmatprep.mubr.bf16.mxu1 %v5691_v6  ;;  %v5689_v10 = vld [vmem:[#allocation13] sm:$0xff]   ;;  %v5693_v12 = vld [vmem:[#allocation11 + $0x88] sm:$0xff]   ;;  %v5695_v14 = vld [vmem:[#allocation11 + $0x90] sm:$0xff]  }
  0x78   : > { %v5696_v15 = vld [vmem:[#allocation11 + $0x18] sm:$0xff]   ;;  %v5698_v17 = vld [vmem:[#allocation11 + $0x20] sm:$0xff]   ;;  %v5700_v19 = vld [vmem:[#allocation11 + $0x28] sm:$0xff]  }
  0x79   : > { %5464 = vmatpush3.bf16.msra.mxu0 %v5683_v2  ;;  %5550 = vmatpush3.bf16.msra.mxu1 %v5683_v2  ;;  %v5697_v16 = vld [vmem:[#allocation11 + $0x98] sm:$0xff]   ;;  %v5699_v18 = vld [vmem:[#allocation11 + $0xa0] sm:$0xff]   ;;  %v5701_v20 = vld [vmem:[#allocation11 + $0xa8] sm:$0xff]  }
  0x7a   : > { %5465 = vmatprep.subr.bf16.mxu0 %v5684_v3  ;;  %5543 = vmatprep.subr.bf16.mxu1 %v5684_v3  ;;  %v5702_v21 = vld [vmem:[#allocation11 + $0x30] sm:$0xff]   ;;  %v5704_v23 = vld [vmem:[#allocation11 + $0x38] sm:$0xff]   ;;  %v5706_v25 = vld [vmem:[#allocation11 + $0x40] sm:$0xff]  }
  0x7b   : > { %v5703_v22 = vld [vmem:[#allocation11 + $0xb0] sm:$0xff]   ;;  %v5705_v24 = vld [vmem:[#allocation11 + $0xb8] sm:$0xff]   ;;  %v5707_v26 = vld [vmem:[#allocation11 + $0xc0] sm:$0xff]  }
  0x7c   : > { %v5708_v27 = vld [vmem:[#allocation11 + $0x48] sm:$0xff]   ;;  %v5710_v29 = vld [vmem:[#allocation11 + $0x50] sm:$0xff]   ;;  %v5712_v31 = vld [vmem:[#allocation11 + $0x58] sm:$0xff]  }
  0x7d   : > { %5466 = vmatpush3.bf16.msra.mxu0 %v5684_v3  ;;  %5551 = vmatpush3.bf16.msra.mxu1 %v5684_v3  ;;  %v5709_v28 = vld [vmem:[#allocation11 + $0xc8] sm:$0xff]   ;;  %v5711_v30 = vld [vmem:[#allocation11 + $0xd0] sm:$0xff]   ;;  %v5713_v32 = vld [vmem:[#allocation11 + $0xd8] sm:$0xff]  }
  0x7e   : > { %5467 = vmatprep.subr.bf16.mxu0 %v5685_v4  ;;  %5544 = vmatprep.subr.bf16.mxu1 %v5685_v4  ;;  %v5714_v33 = vld [vmem:[#allocation11 + $0x60] sm:$0xff]   ;;  %v5716_v35 = vld [vmem:[#allocation11 + $0x68] sm:$0xff]   ;;  %v5718_v37 = vld [vmem:[#allocation11 + $0x70] sm:$0xff]  }
  0x7f   : > { %v5715_v34 = vld [vmem:[#allocation11 + $0xe0] sm:$0xff]   ;;  %v5717_v36 = vld [vmem:[#allocation11 + $0xe8] sm:$0xff]   ;;  %v5719_v38 = vld [vmem:[#allocation11 + $0xf0] sm:$0xff]  }
  0x80   : > { %v5720_v39 = vld [vmem:[#allocation11 + $0x78] sm:$0xff]  }
  0x81   : > { %5468 = vmatpush3.bf16.msra.mxu0 %v5685_v4  ;;  %5552 = vmatpush3.bf16.msra.mxu1 %v5685_v4  ;;  %v5721_v40 = vld [vmem:[#allocation11 + $0xf8] sm:$0xff]  }
  0x82   : > { %5469 = vmatprep.subr.bf16.mxu0 %v5686_v7  ;;  %5545 = vmatprep.subr.bf16.mxu1 %v5686_v7 }
  0x85   : > { %5470 = vmatpush3.bf16.msra.mxu0 %v5686_v7  ;;  %5553 = vmatpush3.bf16.msra.mxu1 %v5686_v7 }
  0x86   : > { %5471 = vmatprep.subr.bf16.mxu0 %v5687_v8  ;;  %5546 = vmatprep.subr.bf16.mxu1 %v5687_v8 }
  0x89   : > { %5472 = vmatpush3.bf16.msra.mxu0 %v5687_v8  ;;  %5554 = vmatpush3.bf16.msra.mxu1 %v5687_v8 }
  0x8a   : > { %5473 = vmatprep.subr.bf16.mxu0 %v5688_v9  ;;  %5547 = vmatprep.subr.bf16.mxu1 %v5688_v9 }
  0x8d   : > { %5474 = vmatpush3.bf16.msra.mxu0 %v5688_v9  ;;  %5555 = vmatpush3.bf16.msra.mxu1 %v5688_v9 }
  0x8e   : > { %5475 = vmatprep.subr.bf16.mxu0 %v5689_v10  ;;  %5548 = vmatprep.subr.bf16.mxu1 %v5689_v10 }
  0x91   : > { %5476 = vmatpush3.bf16.msra.mxu0 %v5689_v10  ;;  %5556 = vmatpush3.bf16.msra.mxu1 %v5689_v10 }
  0x94   : > { %5478 = vmatmul.mubr.bf16.vlgmr.msra.gmra.mxu0 %v5692_v11  ;;  %5510 = vmatmul.mubr.bf16.vlgmr.msra.gmra.mxu1 %v5693_v12 }
  0x95   : > { %5481 = vmatprep.mubr.bf16.mxu0 %v5694_v13  ;;  %5513 = vmatprep.mubr.bf16.mxu1 %v5695_v14 }
  0x9c   : > { %5482 = vmatmul.mubr.bf16.gmra.mxu0 %v5696_v15  ;;  %5514 = vmatmul.mubr.bf16.gmra.mxu1 %v5697_v16 }
  0x9d   : > { %5485 = vmatprep.mubr.bf16.mxu0 %v5698_v17  ;;  %5517 = vmatprep.mubr.bf16.mxu1 %v5699_v18 }
  0xa4   : > { %5486 = vmatmul.mubr.bf16.gmra.mxu0 %v5700_v19  ;;  %5518 = vmatmul.mubr.bf16.gmra.mxu1 %v5701_v20 }
  0xa5   : > { %5489 = vmatprep.mubr.bf16.mxu0 %v5702_v21  ;;  %5521 = vmatprep.mubr.bf16.mxu1 %v5703_v22 }
  0xac   : > { %5490 = vmatmul.mubr.bf16.gmra.mxu0 %v5704_v23  ;;  %5522 = vmatmul.mubr.bf16.gmra.mxu1 %v5705_v24 }
  0xad   : > { %5493 = vmatprep.mubr.bf16.mxu0 %v5706_v25  ;;  %5525 = vmatprep.mubr.bf16.mxu1 %v5707_v26 }
  0xb4   : > { %5494 = vmatmul.mubr.bf16.gmra.mxu0 %v5708_v27  ;;  %5526 = vmatmul.mubr.bf16.gmra.mxu1 %v5709_v28 }
  0xb5   : > { %5497 = vmatprep.mubr.bf16.mxu0 %v5710_v29  ;;  %5529 = vmatprep.mubr.bf16.mxu1 %v5711_v30 }
  0xbc   : > { %5498 = vmatmul.mubr.bf16.gmra.mxu0 %v5712_v31  ;;  %5530 = vmatmul.mubr.bf16.gmra.mxu1 %v5713_v32 }
  0xbd   : > { %5501 = vmatprep.mubr.bf16.mxu0 %v5714_v33  ;;  %5533 = vmatprep.mubr.bf16.mxu1 %v5715_v34 }
  0xc4   : > { %5502 = vmatmul.mubr.bf16.gmra.mxu0 %v5716_v35  ;;  %5534 = vmatmul.mubr.bf16.gmra.mxu1 %v5717_v36 }
  0xc5   : > { %5505 = vmatprep.mubr.bf16.mxu0 %v5718_v37  ;;  %5537 = vmatprep.mubr.bf16.mxu1 %v5719_v38 }
  0xcc   : > { %5506 = vmatmul.mubr.bf16.gmra.mxu0 %v5720_v39  ;;  %5538 = vmatmul.mubr.bf16.gmra.mxu1 %v5721_v40 }
 0x154   : > { %v5479_v41 = vpop.f32.mrf.mxu0  ;;  %v5511_v42 = vpop.f32.mrf.mxu1 }
 0x156   : > { %v730_v43 = vpop.f32.mrf.mxu0  ;;  %v858_v44 = vpop.f32.mrf.mxu1 }
 0x158   : > { %v5480_v45 = vpop.f32.mrf.mxu0  ;;  %v5512_v46 = vpop.f32.mrf.mxu1 }
 0x159   : > { %v4979_v47 = vpack.c.bf16 %v5480_v45, %v5479_v41  ;;  %v5059_v48 = vpack.c.bf16 %v5512_v46, %v5511_v42 }
 0x15a   : > { %v733_v49 = vpop.f32.mrf.mxu0  ;;  %v861_v50 = vpop.f32.mrf.mxu1 }
 0x15b   : > { %5131 = vst [vmem:[#allocation2 + $0x8] sm:$0xff] %v4979_v47   ;;  %5147 = vst [vmem:[#allocation2 + $0x88] sm:$0xff] %v5059_v48   ;;  %v4974_v51 = vpack.c.bf16 %v733_v49, %v730_v43  ;;  %v5054_v52 = vpack.c.bf16 %v861_v50, %v858_v44 }
 0x15c   : > { %v5483_v53 = vpop.f32.mrf.mxu0  ;;  %v5515_v54 = vpop.f32.mrf.mxu1 }
 0x15d   : > { %4975 = vst [vmem:[#allocation2] sm:$0xff] %v4974_v51   ;;  %5146 = vst [vmem:[#allocation2 + $0x80] sm:$0xff] %v5054_v52  }
 0x15e   : > { %v746_v55 = vpop.f32.mrf.mxu0  ;;  %v874_v56 = vpop.f32.mrf.mxu1 }
 0x160   : > { %v5484_v57 = vpop.f32.mrf.mxu0  ;;  %v5516_v58 = vpop.f32.mrf.mxu1 }
 0x161   : > { %v4989_v59 = vpack.c.bf16 %v5484_v57, %v5483_v53  ;;  %v5069_v60 = vpack.c.bf16 %v5516_v58, %v5515_v54 }
 0x162   : > { %v749_v61 = vpop.f32.mrf.mxu0  ;;  %v877_v62 = vpop.f32.mrf.mxu1 }
 0x163   : > { %5133 = vst [vmem:[#allocation2 + $0x18] sm:$0xff] %v4989_v59   ;;  %5149 = vst [vmem:[#allocation2 + $0x98] sm:$0xff] %v5069_v60   ;;  %v4984_v63 = vpack.c.bf16 %v749_v61, %v746_v55  ;;  %v5064_v0 = vpack.c.bf16 %v877_v62, %v874_v56 }
 0x164   : > { %v5487_v1 = vpop.f32.mrf.mxu0  ;;  %v5519_v2 = vpop.f32.mrf.mxu1 }
 0x165   : > { %5132 = vst [vmem:[#allocation2 + $0x10] sm:$0xff] %v4984_v63   ;;  %5148 = vst [vmem:[#allocation2 + $0x90] sm:$0xff] %v5064_v0  }
 0x166   : > { %v762_v3 = vpop.f32.mrf.mxu0  ;;  %v890_v4 = vpop.f32.mrf.mxu1 }
 0x168   : > { %v5488_v5 = vpop.f32.mrf.mxu0  ;;  %v5520_v6 = vpop.f32.mrf.mxu1 }
 0x169   : > { %v4999_v7 = vpack.c.bf16 %v5488_v5, %v5487_v1  ;;  %v5079_v8 = vpack.c.bf16 %v5520_v6, %v5519_v2 }
 0x16a   : > { %v765_v9 = vpop.f32.mrf.mxu0  ;;  %v893_v10 = vpop.f32.mrf.mxu1 }
 0x16b   : > { %5135 = vst [vmem:[#allocation2 + $0x28] sm:$0xff] %v4999_v7   ;;  %5151 = vst [vmem:[#allocation2 + $0xa8] sm:$0xff] %v5079_v8   ;;  %v4994_v11 = vpack.c.bf16 %v765_v9, %v762_v3  ;;  %v5074_v12 = vpack.c.bf16 %v893_v10, %v890_v4 }
 0x16c   : > { %v5491_v13 = vpop.f32.mrf.mxu0  ;;  %v5523_v14 = vpop.f32.mrf.mxu1 }
 0x16d   : > { %5134 = vst [vmem:[#allocation2 + $0x20] sm:$0xff] %v4994_v11   ;;  %5150 = vst [vmem:[#allocation2 + $0xa0] sm:$0xff] %v5074_v12  }
 0x16e   : > { %v778_v15 = vpop.f32.mrf.mxu0  ;;  %v906_v16 = vpop.f32.mrf.mxu1 }
 0x170   : > { %v5492_v17 = vpop.f32.mrf.mxu0  ;;  %v5524_v18 = vpop.f32.mrf.mxu1 }
 0x171   : > { %v5009_v19 = vpack.c.bf16 %v5492_v17, %v5491_v13  ;;  %v5089_v20 = vpack.c.bf16 %v5524_v18, %v5523_v14 }
 0x172   : > { %v781_v21 = vpop.f32.mrf.mxu0  ;;  %v909_v22 = vpop.f32.mrf.mxu1 }
 0x173   : > { %5137 = vst [vmem:[#allocation2 + $0x38] sm:$0xff] %v5009_v19   ;;  %5153 = vst [vmem:[#allocation2 + $0xb8] sm:$0xff] %v5089_v20   ;;  %v5004_v23 = vpack.c.bf16 %v781_v21, %v778_v15  ;;  %v5084_v24 = vpack.c.bf16 %v909_v22, %v906_v16 }
 0x174   : > { %v5495_v25 = vpop.f32.mrf.mxu0  ;;  %v5527_v26 = vpop.f32.mrf.mxu1 }
 0x175   : > { %5136 = vst [vmem:[#allocation2 + $0x30] sm:$0xff] %v5004_v23   ;;  %5152 = vst [vmem:[#allocation2 + $0xb0] sm:$0xff] %v5084_v24  }
 0x176   : > { %v794_v27 = vpop.f32.mrf.mxu0  ;;  %v922_v28 = vpop.f32.mrf.mxu1 }
 0x178   : > { %v5496_v29 = vpop.f32.mrf.mxu0  ;;  %v5528_v30 = vpop.f32.mrf.mxu1 }
 0x179   : > { %v5019_v31 = vpack.c.bf16 %v5496_v29, %v5495_v25  ;;  %v5099_v32 = vpack.c.bf16 %v5528_v30, %v5527_v26 }
 0x17a   : > { %v797_v33 = vpop.f32.mrf.mxu0  ;;  %v925_v34 = vpop.f32.mrf.mxu1 }
 0x17b   : > { %5139 = vst [vmem:[#allocation2 + $0x48] sm:$0xff] %v5019_v31   ;;  %5155 = vst [vmem:[#allocation2 + $0xc8] sm:$0xff] %v5099_v32   ;;  %v5014_v35 = vpack.c.bf16 %v797_v33, %v794_v27  ;;  %v5094_v36 = vpack.c.bf16 %v925_v34, %v922_v28 }
 0x17c   : > { %v5499_v37 = vpop.f32.mrf.mxu0  ;;  %v5531_v38 = vpop.f32.mrf.mxu1 }
 0x17d   : > { %5138 = vst [vmem:[#allocation2 + $0x40] sm:$0xff] %v5014_v35   ;;  %5154 = vst [vmem:[#allocation2 + $0xc0] sm:$0xff] %v5094_v36  }
 0x17e   : > { %v810_v39 = vpop.f32.mrf.mxu0  ;;  %v938_v40 = vpop.f32.mrf.mxu1 }
 0x180   : > { %v5500_v41 = vpop.f32.mrf.mxu0  ;;  %v5532_v42 = vpop.f32.mrf.mxu1 }
 0x181   : > { %v5029_v43 = vpack.c.bf16 %v5500_v41, %v5499_v37  ;;  %v5109_v44 = vpack.c.bf16 %v5532_v42, %v5531_v38 }
 0x182   : > { %v813_v45 = vpop.f32.mrf.mxu0  ;;  %v941_v46 = vpop.f32.mrf.mxu1 }
 0x183   : > { %5141 = vst [vmem:[#allocation2 + $0x58] sm:$0xff] %v5029_v43   ;;  %5157 = vst [vmem:[#allocation2 + $0xd8] sm:$0xff] %v5109_v44   ;;  %v5024_v47 = vpack.c.bf16 %v813_v45, %v810_v39  ;;  %v5104_v48 = vpack.c.bf16 %v941_v46, %v938_v40 }
 0x184   : > { %v5503_v49 = vpop.f32.mrf.mxu0  ;;  %v5535_v50 = vpop.f32.mrf.mxu1 }
 0x185   : > { %5140 = vst [vmem:[#allocation2 + $0x50] sm:$0xff] %v5024_v47   ;;  %5156 = vst [vmem:[#allocation2 + $0xd0] sm:$0xff] %v5104_v48  }
 0x186   : > { %v826_v51 = vpop.f32.mrf.mxu0  ;;  %v954_v52 = vpop.f32.mrf.mxu1 }
 0x188   : > { %v5504_v53 = vpop.f32.mrf.mxu0  ;;  %v5536_v54 = vpop.f32.mrf.mxu1 }
 0x189   : > { %v5039_v55 = vpack.c.bf16 %v5504_v53, %v5503_v49  ;;  %v5119_v56 = vpack.c.bf16 %v5536_v54, %v5535_v50 }
 0x18a   : > { %v829_v57 = vpop.f32.mrf.mxu0  ;;  %v957_v58 = vpop.f32.mrf.mxu1 }
 0x18b   : > { %5143 = vst [vmem:[#allocation2 + $0x68] sm:$0xff] %v5039_v55   ;;  %5159 = vst [vmem:[#allocation2 + $0xe8] sm:$0xff] %v5119_v56   ;;  %v5034_v59 = vpack.c.bf16 %v829_v57, %v826_v51  ;;  %v5114_v60 = vpack.c.bf16 %v957_v58, %v954_v52 }
 0x18c   : > { %v5507_v61 = vpop.f32.mrf.mxu0  ;;  %v5539_v62 = vpop.f32.mrf.mxu1 }
 0x18d   : > { %5142 = vst [vmem:[#allocation2 + $0x60] sm:$0xff] %v5034_v59   ;;  %5158 = vst [vmem:[#allocation2 + $0xe0] sm:$0xff] %v5114_v60  }
 0x18e   : > { %v842_v63 = vpop.f32.mrf.mxu0  ;;  %v970_v0 = vpop.f32.mrf.mxu1 }
 0x190   : > { %v5508_v1 = vpop.f32.mrf.mxu0  ;;  %v5540_v2 = vpop.f32.mrf.mxu1 }
 0x191   : > { %v5049_v3 = vpack.c.bf16 %v5508_v1, %v5507_v61  ;;  %v5129_v4 = vpack.c.bf16 %v5540_v2, %v5539_v62 }
 0x192   : > { %v845_v5 = vpop.f32.mrf.mxu0  ;;  %v973_v6 = vpop.f32.mrf.mxu1 }
 0x193   : > { %5145 = vst [vmem:[#allocation2 + $0x78] sm:$0xff] %v5049_v3   ;;  %5161 = vst [vmem:[#allocation2 + $0xf8] sm:$0xff] %v5129_v4   ;;  %v5044_v7 = vpack.c.bf16 %v845_v5, %v842_v63  ;;  %v5124_v8 = vpack.c.bf16 %v973_v6, %v970_v0 }
 0x195   : > { %5144 = vst [vmem:[#allocation2 + $0x70] sm:$0xff] %v5044_v7   ;;  %5160 = vst [vmem:[#allocation2 + $0xf0] sm:$0xff] %v5124_v8  }
 0x196 PF: > { %s6319_s27 = sshll.u32 %s6092_s0, 8  ;;  %p4577_p7 = scmp.ne.s32.totalorder %s6096_s1, 0 }
 0x197   : > { %s1306_s28 = sshra.s32 %s6319_s27, 3  ;;  %s6810_s19 = scalar_lea.vmem (!%p4577_p7), [#allocation3], %s6319_s27 }
 0x198   : > { %s4937_s11 = sshll.u32 %s1306_s28, 4 }
 0x199   : > { %s6322_s12 = scalar_lea.vmem [#allocation8], %s4937_s11 }
 0x19a   : > { %v6325_v9 = vld [vmem:[%s6322_s12] sm:$0xff]  ;;  %v6328_v10 = vld [vmem:[%s6322_s12 + $0x8] sm:$0xff]  ;;  %v6331_v11 = vld [vmem:[%s6322_s12 + $0x10] sm:$0xff] }
 0x19b   : > { %v6334_v12 = vld [vmem:[%s6322_s12 + $0x18] sm:$0xff]  ;;  %v6337_v13 = vld [vmem:[%s6322_s12 + $0x20] sm:$0xff]  ;;  %v6340_v14 = vld [vmem:[%s6322_s12 + $0x28] sm:$0xff] }
 0x19c   : > { %v6343_v15 = vld [vmem:[%s6322_s12 + $0x30] sm:$0xff]  ;;  %v6346_v16 = vld [vmem:[%s6322_s12 + $0x38] sm:$0xff]  ;;  %v6349_v17 = vld [vmem:[%s6322_s12 + $0x40] sm:$0xff] }
 0x19d   : > { %v6352_v18 = vld [vmem:[%s6322_s12 + $0x48] sm:$0xff]  ;;  %v6355_v19 = vld [vmem:[%s6322_s12 + $0x50] sm:$0xff]  ;;  %v6358_v20 = vld [vmem:[%s6322_s12 + $0x58] sm:$0xff] }
 0x19e   : > { %v6361_v21 = vld [vmem:[%s6322_s12 + $0x60] sm:$0xff]  ;;  %v6364_v22 = vld [vmem:[%s6322_s12 + $0x68] sm:$0xff]  ;;  %v6367_v23 = vld [vmem:[%s6322_s12 + $0x70] sm:$0xff] }
 0x19f   : > { %7676 = vst [vmem:[#allocation23_spill] sm:$0xff] %v6361_v21  ;;  %7677 = vst [vmem:[#allocation24_spill] sm:$0xff] %v6364_v22  ;;  %v6370_v24 = vld [vmem:[%s6322_s12 + $0x78] sm:$0xff]  ;;  %v6373_v25 = vld [vmem:[%s6322_s12 + $0x80] sm:$0xff] }
 0x1a0   : > { %7678 = vst [vmem:[#allocation25_spill] sm:$0xff] %v6367_v23  ;;  %7679 = vst [vmem:[#allocation26_spill] sm:$0xff] %v6370_v24  ;;  %v6376_v26 = vld [vmem:[%s6322_s12 + $0x88] sm:$0xff]  ;;  %v6379_v27 = vld [vmem:[%s6322_s12 + $0x90] sm:$0xff] }
 0x1a1   : > { %7680 = vst [vmem:[#allocation27_spill] sm:$0xff] %v6373_v25  ;;  %7681 = vst [vmem:[#allocation28_spill] sm:$0xff] %v6376_v26  ;;  %v6382_v28 = vld [vmem:[%s6322_s12 + $0x98] sm:$0xff]  ;;  %v6385_v29 = vld [vmem:[%s6322_s12 + $0xa0] sm:$0xff] }
 0x1a2   : > { %7682 = vst [vmem:[#allocation29_spill] sm:$0xff] %v6379_v27  ;;  %7683 = vst [vmem:[#allocation30_spill] sm:$0xff] %v6382_v28  ;;  %v6388_v30 = vld [vmem:[%s6322_s12 + $0xa8] sm:$0xff]  ;;  %v6391_v31 = vld [vmem:[%s6322_s12 + $0xb0] sm:$0xff] }
 0x1a3   : > { %7684 = vst [vmem:[#allocation31_spill] sm:$0xff] %v6385_v29  ;;  %7685 = vst [vmem:[#allocation32_spill] sm:$0xff] %v6388_v30  ;;  %v6394_v32 = vld [vmem:[%s6322_s12 + $0xb8] sm:$0xff]  ;;  %v6397_v33 = vld [vmem:[%s6322_s12 + $0xc0] sm:$0xff] }
 0x1a4   : > { %7686 = vst [vmem:[#allocation33_spill] sm:$0xff] %v6391_v31  ;;  %7687 = vst [vmem:[#allocation34_spill] sm:$0xff] %v6394_v32  ;;  %v6400_v34 = vld [vmem:[%s6322_s12 + $0xc8] sm:$0xff]  ;;  %v6403_v35 = vld [vmem:[%s6322_s12 + $0xd0] sm:$0xff] }
 0x1a5   : > { %7688 = vst [vmem:[#allocation35_spill] sm:$0xff] %v6397_v33  ;;  %7689 = vst [vmem:[#allocation36_spill] sm:$0xff] %v6400_v34  ;;  %v6406_v36 = vld [vmem:[%s6322_s12 + $0xd8] sm:$0xff]  ;;  %v6409_v37 = vld [vmem:[%s6322_s12 + $0xe0] sm:$0xff] }
 0x1a6   : > { %7690 = vst [vmem:[#allocation37_spill] sm:$0xff] %v6403_v35  ;;  %7691 = vst [vmem:[#allocation38_spill] sm:$0xff] %v6406_v36  ;;  %v6412_v38 = vld [vmem:[%s6322_s12 + $0xe8] sm:$0xff]  ;;  %v6415_v39 = vld [vmem:[%s6322_s12 + $0xf0] sm:$0xff] }
 0x1a7   : > { %7692 = vst [vmem:[#allocation39_spill] sm:$0xff] %v6409_v37  ;;  %7693 = vst [vmem:[#allocation40_spill] sm:$0xff] %v6412_v38  ;;  %v6418_v40 = vld [vmem:[%s6322_s12 + $0xf8] sm:$0xff]  ;;  %v6421_v41 = vld [vmem:[%s6322_s12 + $0x100] sm:$0xff] }
 0x1a8   : > { %7694 = vst [vmem:[#allocation41_spill] sm:$0xff] %v6415_v39  ;;  %7695 = vst [vmem:[#allocation42_spill] sm:$0xff] %v6418_v40  ;;  %v6424_v42 = vld [vmem:[%s6322_s12 + $0x108] sm:$0xff]  ;;  %v6427_v43 = vld [vmem:[%s6322_s12 + $0x110] sm:$0xff] }
 0x1a9   : > { %7696 = vst [vmem:[#allocation43_spill] sm:$0xff] %v6421_v41  ;;  %7697 = vst [vmem:[#allocation44_spill] sm:$0xff] %v6424_v42  ;;  %v6430_v44 = vld [vmem:[%s6322_s12 + $0x118] sm:$0xff]  ;;  %v6433_v45 = vld [vmem:[%s6322_s12 + $0x120] sm:$0xff] }
 0x1aa   : > { %7698 = vst [vmem:[#allocation45_spill] sm:$0xff] %v6427_v43  ;;  %7699 = vst [vmem:[#allocation46_spill] sm:$0xff] %v6430_v44  ;;  %v6436_v46 = vld [vmem:[%s6322_s12 + $0x128] sm:$0xff]  ;;  %v6439_v47 = vld [vmem:[%s6322_s12 + $0x130] sm:$0xff] }
 0x1ab   : > { %7700 = vst [vmem:[#allocation47_spill] sm:$0xff] %v6433_v45  ;;  %7701 = vst [vmem:[#allocation48_spill] sm:$0xff] %v6436_v46  ;;  %v6442_v48 = vld [vmem:[%s6322_s12 + $0x138] sm:$0xff]  ;;  %v6445_v49 = vld [vmem:[%s6322_s12 + $0x140] sm:$0xff] }
 0x1ac   : > { %7702 = vst [vmem:[#allocation49_spill] sm:$0xff] %v6439_v47  ;;  %7703 = vst [vmem:[#allocation50_spill] sm:$0xff] %v6442_v48  ;;  %v6448_v50 = vld [vmem:[%s6322_s12 + $0x148] sm:$0xff]  ;;  %v6451_v51 = vld [vmem:[%s6322_s12 + $0x150] sm:$0xff] }
 0x1ad   : > { %7704 = vst [vmem:[#allocation51_spill] sm:$0xff] %v6445_v49  ;;  %7705 = vst [vmem:[#allocation52_spill] sm:$0xff] %v6448_v50  ;;  %v6454_v52 = vld [vmem:[%s6322_s12 + $0x158] sm:$0xff]  ;;  %v6457_v53 = vld [vmem:[%s6322_s12 + $0x160] sm:$0xff] }
 0x1ae   : > { %7706 = vst [vmem:[#allocation53_spill] sm:$0xff] %v6451_v51  ;;  %7707 = vst [vmem:[#allocation54_spill] sm:$0xff] %v6454_v52  ;;  %v6460_v54 = vld [vmem:[%s6322_s12 + $0x168] sm:$0xff]  ;;  %v6463_v55 = vld [vmem:[%s6322_s12 + $0x170] sm:$0xff] }
 0x1af   : > { %7708 = vst [vmem:[#allocation55_spill] sm:$0xff] %v6457_v53  ;;  %7709 = vst [vmem:[#allocation56_spill] sm:$0xff] %v6460_v54  ;;  %v6466_v56 = vld [vmem:[%s6322_s12 + $0x178] sm:$0xff]  ;;  %v6469_v57 = vld [vmem:[%s6322_s12 + $0x180] sm:$0xff] }
 0x1b0   : > { %7710 = vst [vmem:[#allocation57_spill] sm:$0xff] %v6463_v55  ;;  %7711 = vst [vmem:[#allocation58_spill] sm:$0xff] %v6466_v56  ;;  %v6472_v58 = vld [vmem:[%s6322_s12 + $0x188] sm:$0xff]  ;;  %v6475_v59 = vld [vmem:[%s6322_s12 + $0x190] sm:$0xff] }
 0x1b1   : > { %7712 = vst [vmem:[#allocation59_spill] sm:$0xff] %v6469_v57  ;;  %7713 = vst [vmem:[#allocation60_spill] sm:$0xff] %v6472_v58  ;;  %v6478_v60 = vld [vmem:[%s6322_s12 + $0x198] sm:$0xff]  ;;  %v6481_v61 = vld [vmem:[%s6322_s12 + $0x1a0] sm:$0xff] }
 0x1b2   : > { %7714 = vst [vmem:[#allocation61_spill] sm:$0xff] %v6475_v59  ;;  %7715 = vst [vmem:[#allocation62_spill] sm:$0xff] %v6478_v60  ;;  %v6484_v62 = vld [vmem:[%s6322_s12 + $0x1a8] sm:$0xff]  ;;  %v6487_v63 = vld [vmem:[%s6322_s12 + $0x1b0] sm:$0xff] }
 0x1b3   : > { %7716 = vst [vmem:[#allocation63_spill] sm:$0xff] %v6481_v61  ;;  %7717 = vst [vmem:[#allocation64_spill] sm:$0xff] %v6484_v62  ;;  %v6490_v0 = vld [vmem:[%s6322_s12 + $0x1b8] sm:$0xff]  ;;  %v6493_v1 = vld [vmem:[%s6322_s12 + $0x1c0] sm:$0xff] }
 0x1b4   : > { %7718 = vst [vmem:[#allocation65_spill] sm:$0xff] %v6487_v63  ;;  %7719 = vst [vmem:[#allocation66_spill] sm:$0xff] %v6490_v0  ;;  %v6496_v2 = vld [vmem:[%s6322_s12 + $0x1c8] sm:$0xff]  ;;  %v6499_v3 = vld [vmem:[%s6322_s12 + $0x1d0] sm:$0xff]  ;;  %1377 = sbr.rel (%p4577_p7) target bundleno = 1067 (0x42b), region = 80 }
 0x1b5   : > { %7720 = vst [vmem:[#allocation67_spill] sm:$0xff] %v6493_v1  ;;  %7721 = vst [vmem:[#allocation68_spill] sm:$0xff] %v6496_v2  ;;  %v6502_v4 = vld [vmem:[%s6322_s12 + $0x1d8] sm:$0xff]  ;;  %v6505_v5 = vld [vmem:[%s6322_s12 + $0x1e0] sm:$0xff] }
 0x1b6   : > { %7722 = vst [vmem:[#allocation69_spill] sm:$0xff] %v6499_v3  ;;  %7723 = vst [vmem:[#allocation70_spill] sm:$0xff] %v6502_v4  ;;  %v6508_v6 = vld [vmem:[%s6322_s12 + $0x1e8] sm:$0xff]  ;;  %v6511_v7 = vld [vmem:[%s6322_s12 + $0x1f0] sm:$0xff] }
 0x1b7   : > { %7724 = vst [vmem:[#allocation71_spill] sm:$0xff] %v6505_v5  ;;  %7725 = vst [vmem:[#allocation72_spill] sm:$0xff] %v6508_v6  ;;  %v6514_v8 = vld [vmem:[%s6322_s12 + $0x1f8] sm:$0xff] }
 0x1b8   : > { %7726 = vst [vmem:[#allocation73_spill] sm:$0xff] %v6511_v7  ;;  %7727 = vst [vmem:[#allocation74_spill] sm:$0xff] %v6514_v8 }
 0x1b9   : > { %v5722_v62 = vld [vmem:[#allocation2 + $0x78] sm:$0xff]   ;;  %v4612_v0 = vcombine.high %v6421_v41, %v6427_v43  ;;  %v5724_v58 = vld [vmem:[#allocation2 + $0x70] sm:$0xff]   ;;  %v5726_v6 = vld [vmem:[#allocation2 + $0x68] sm:$0xff]   ;;  %v4580_v8 = vcombine.high %v6325_v9, %v6331_v11  ;;  %v4584_v50 = vcombine.high %v6337_v13, %v6343_v15 }
 0x1ba   : > { %v5723_v2 = vld [vmem:[#allocation2 + $0x38] sm:$0xff]   ;;  %5557 = vmatprep.subr.bf16.mxu1 %v5722_v62  ;;  %v5725_v4 = vld [vmem:[#allocation2 + $0x30] sm:$0xff]   ;;  %5202 = vmatprep.subr.bf16.mxu0 %v5722_v62  ;;  %v5727_v60 = vld [vmem:[#allocation2 + $0x28] sm:$0xff]  }
 0x1bb   : > { %2057 = vmatprep.mubr.bf16.mxu1 %v4612_v0  ;;  %5565 = vmatpush3.bf16.msra.mxu1 %v5723_v2  ;;  %v5728_v54 = vld [vmem:[#allocation2 + $0x60] sm:$0xff]   ;;  %v5730_v0 = vld [vmem:[#allocation2 + $0x58] sm:$0xff]  }
 0x1bc   : > { %5558 = vmatprep.subr.bf16.mxu1 %v5724_v58  ;;  %5203 = vmatpush3.bf16.msra.mxu0 %v5723_v2  ;;  %v5729_v56 = vld [vmem:[#allocation2 + $0x20] sm:$0xff]   ;;  %v5731_v62 = vld [vmem:[#allocation2 + $0x18] sm:$0xff]   ;;  %v5732_v2 = vld [vmem:[#allocation2 + $0x50] sm:$0xff]  }
 0x1bd   : > { %5204 = vmatprep.subr.bf16.mxu0 %v5724_v58  ;;  %1993 = vmatprep.mubr.bf16.mxu0 %v4580_v8  ;;  %v5733_v58 = vld [vmem:[#allocation2 + $0x10] sm:$0xff]   ;;  %v5734_v8 = vld [vmem:[#allocation2 + $0x48] sm:$0xff]  }
 0x1bf   : > { %5566 = vmatpush3.bf16.msra.mxu1 %v5725_v4 }
 0x1c0   : > { %5559 = vmatprep.subr.bf16.mxu1 %v5726_v6  ;;  %5205 = vmatpush3.bf16.msra.mxu0 %v5725_v4  ;;  %v5735_v4 = vld [vmem:[#allocation2 + $0x8] sm:$0xff]  }
 0x1c1   : > { %5206 = vmatprep.subr.bf16.mxu0 %v5726_v6  ;;  %v5736_v6 = vld [vmem:[#allocation2 + $0x40] sm:$0xff]  }
 0x1c3   : > { %5567 = vmatpush3.bf16.msra.mxu1 %v5727_v60 }
 0x1c4   : > { %5560 = vmatprep.subr.bf16.mxu1 %v5728_v54  ;;  %5207 = vmatpush3.bf16.msra.mxu0 %v5727_v60  ;;  %v5738_v60 = vld [vmem:[#allocation2 + $0xf8] sm:$0xff]  }
 0x1c5   : > { %5208 = vmatprep.subr.bf16.mxu0 %v5728_v54  ;;  %v5737_v54 = vld [vmem:[#allocation2] sm:$0xff]  }
 0x1c7   : > { %5568 = vmatpush3.bf16.msra.mxu1 %v5729_v56 }
 0x1c8   : > { %5561 = vmatprep.subr.bf16.mxu1 %v5730_v0  ;;  %5209 = vmatpush3.bf16.msra.mxu0 %v5729_v56  ;;  %v4611_v56 = vcombine.low %v6421_v41, %v6427_v43  ;;  %v5744_v41 = vld [vmem:[#allocation2 + $0xe0] sm:$0xff]   ;;  %v4583_v43 = vcombine.low %v6337_v13, %v6343_v15 }
 0x1c9   : > { %5210 = vmatprep.subr.bf16.mxu0 %v5730_v0  ;;  %v5739_v0 = vld [vmem:[#allocation2 + $0xb8] sm:$0xff]  }
 0x1cb   : > { %5569 = vmatpush3.bf16.msra.mxu1 %v5731_v62 }
 0x1cc   : > { %5562 = vmatprep.subr.bf16.mxu1 %v5732_v2  ;;  %5211 = vmatpush3.bf16.msra.mxu0 %v5731_v62  ;;  %v4616_v62 = vcombine.high %v6433_v45, %v6439_v47 }
 0x1cd   : > { %5212 = vmatprep.subr.bf16.mxu0 %v5732_v2  ;;  %v5740_v2 = vld [vmem:[#allocation2 + $0xf0] sm:$0xff]  }
 0x1cf   : > { %5570 = vmatpush3.bf16.msra.mxu1 %v5733_v58 }
 0x1d0   : > { %5563 = vmatprep.subr.bf16.mxu1 %v5734_v8  ;;  %5213 = vmatpush3.bf16.msra.mxu0 %v5733_v58  ;;  %v4579_v58 = vcombine.low %v6325_v9, %v6331_v11 }
 0x1d1   : > { %5214 = vmatprep.subr.bf16.mxu0 %v5734_v8  ;;  %v5741_v8 = vld [vmem:[#allocation2 + $0xb0] sm:$0xff]  }
 0x1d3   : > { %5571 = vmatpush3.bf16.msra.mxu1 %v5735_v4 }
 0x1d4   : > { %5564 = vmatprep.subr.bf16.mxu1 %v5736_v6  ;;  %5215 = vmatpush3.bf16.msra.mxu0 %v5735_v4  ;;  %v5742_v4 = vld [vmem:[#allocation2 + $0xe8] sm:$0xff]  }
 0x1d5   : > { %5216 = vmatprep.subr.bf16.mxu0 %v5736_v6  ;;  %v4615_v6 = vcombine.low %v6433_v45, %v6439_v47 }
 0x1d7   : > { %5572 = vmatpush3.bf16.msra.mxu1 %v5737_v54 }
 0x1d8   : > { %5314 = vmatprep.subr.bf16.mxu1 %v5738_v60  ;;  %5217 = vmatpush3.bf16.msra.mxu0 %v5737_v54  ;;  %v4620_v54 = vcombine.high %v6445_v49, %v6451_v51  ;;  %v5743_v60 = vld [vmem:[#allocation2 + $0xa8] sm:$0xff]  }
 0x1da   : > { %2058 = vmatmul.mubr.bf16.vlgmr.msra.gmra.mxu1 %v4611_v56  ;;  %v4588_v56 = vcombine.high %v6349_v17, %v6355_v19 }
 0x1db   : > { %5315 = vmatpush3.bf16.msra.mxu1 %v5739_v0  ;;  %2065 = vmatprep.mubr.bf16.mxu1 %v4616_v62  ;;  %v5746_v0 = vld [vmem:[#allocation2 + $0xd8] sm:$0xff]   ;;  %v4619_v62 = vcombine.low %v6445_v49, %v6451_v51 }
 0x1dc   : > { %5316 = vmatprep.subr.bf16.mxu1 %v5740_v2  ;;  %1994 = vmatmul.mubr.bf16.vlgmr.msra.gmra.mxu0 %v4579_v58  ;;  %v4624_v2 = vcombine.high %v6457_v53, %v6463_v55  ;;  %v5747_v58 = vld [vmem:[#allocation2 + $0x98] sm:$0xff]  }
 0x1dd   : > { %2001 = vmatprep.mubr.bf16.mxu0 %v4584_v50  ;;  %v5745_v50 = vld [vmem:[#allocation2 + $0xa0] sm:$0xff]  }
 0x1df   : > { %5317 = vmatpush3.bf16.msra.mxu1 %v5741_v8  ;;  %v5748_v8 = vld [vmem:[#allocation2 + $0xd0] sm:$0xff]  }
 0x1e0   : > { %5318 = vmatprep.subr.bf16.mxu1 %v5742_v4  ;;  %v4587_v4 = vcombine.low %v6349_v17, %v6355_v19 }
 0x1e2   : > { %2066 = vmatmul.mubr.bf16.gmra.mxu1 %v4615_v6  ;;  %v4592_v6 = vcombine.high %v6361_v21, %v6367_v23 }
 0x1e3   : > { %2073 = vmatprep.mubr.bf16.mxu1 %v4620_v54  ;;  %5319 = vmatpush3.bf16.msra.mxu1 %v5743_v60  ;;  %v4623_v54 = vcombine.low %v6457_v53, %v6463_v55  ;;  %v4628_v60 = vcombine.high %v6469_v57, %v6475_v59 }
 0x1e4   : > { %5320 = vmatprep.subr.bf16.mxu1 %v5744_v41  ;;  %2002 = vmatmul.mubr.bf16.gmra.mxu0 %v4583_v43  ;;  %v5749_v41 = vld [vmem:[#allocation2 + $0x90] sm:$0xff]   ;;  %v5750_v43 = vld [vmem:[#allocation2 + $0xc8] sm:$0xff]  }
 0x1e5   : > { %2009 = vmatprep.mubr.bf16.mxu0 %v4588_v56  ;;  %v5751_v56 = vld [vmem:[#allocation2 + $0x88] sm:$0xff]  }
 0x1e7   : > { %5321 = vmatpush3.bf16.msra.mxu1 %v5745_v50  ;;  %v5752_v50 = vld [vmem:[#allocation2 + $0xc0] sm:$0xff]  }
 0x1e8   : > { %5322 = vmatprep.subr.bf16.mxu1 %v5746_v0  ;;  %v4591_v0 = vcombine.low %v6361_v21, %v6367_v23 }
 0x1ea   : > { %2074 = vmatmul.mubr.bf16.gmra.mxu1 %v4619_v62  ;;  %v4596_v62 = vcombine.high %v6373_v25, %v6379_v27 }
 0x1eb   : > { %2081 = vmatprep.mubr.bf16.mxu1 %v4624_v2  ;;  %5323 = vmatpush3.bf16.msra.mxu1 %v5747_v58  ;;  %v5753_v2 = vld [vmem:[#allocation2 + $0x80] sm:$0xff]   ;;  %v4627_v58 = vcombine.low %v6469_v57, %v6475_v59 }
 0x1ec   : > { %5324 = vmatprep.subr.bf16.mxu1 %v5748_v8  ;;  %2010 = vmatmul.mubr.bf16.gmra.mxu0 %v4587_v4  ;;  %v4632_v8 = vcombine.high %v6481_v61, %v6487_v63  ;;  %v4595_v4 = vcombine.low %v6373_v25, %v6379_v27 }
 0x1ed   : > { %2017 = vmatprep.mubr.bf16.mxu0 %v4592_v6  ;;  %v4600_v6 = vcombine.high %v6385_v29, %v6391_v31 }
 0x1ef   : > { %5325 = vmatpush3.bf16.msra.mxu1 %v5749_v41  ;;  %v4631_v41 = vcombine.low %v6481_v61, %v6487_v63 }
 0x1f0   : > { %5326 = vmatprep.subr.bf16.mxu1 %v5750_v43  ;;  %v4636_v43 = vcombine.high %v6493_v1, %v6499_v3 }
 0x1f2   : > { %2082 = vmatmul.mubr.bf16.gmra.mxu1 %v4623_v54  ;;  %v4599_v54 = vcombine.low %v6385_v29, %v6391_v31 }
 0x1f3   : > { %2089 = vmatprep.mubr.bf16.mxu1 %v4628_v60  ;;  %5327 = vmatpush3.bf16.msra.mxu1 %v5751_v56  ;;  %v4604_v60 = vcombine.high %v6397_v33, %v6403_v35  ;;  %v4635_v56 = vcombine.low %v6493_v1, %v6499_v3 }
 0x1f4   : > { %5328 = vmatprep.subr.bf16.mxu1 %v5752_v50  ;;  %2018 = vmatmul.mubr.bf16.gmra.mxu0 %v4591_v0  ;;  %v4640_v50 = vcombine.high %v6505_v5, %v6511_v7  ;;  %v4603_v0 = vcombine.low %v6397_v33, %v6403_v35 }
 0x1f5   : > { %2025 = vmatprep.mubr.bf16.mxu0 %v4596_v62  ;;  %v4608_v62 = vcombine.high %v6409_v37, %v6415_v39 }
 0x1f7   : > { %5329 = vmatpush3.bf16.msra.mxu1 %v5753_v2  ;;  %v4639_v2 = vcombine.low %v6505_v5, %v6511_v7 }
 0x1fa   : > { %2090 = vmatmul.mubr.bf16.gmra.mxu1 %v4627_v58  ;;  %v4582_v58 = vcombine.high %v6328_v10, %v6334_v12 }
 0x1fb   : > { %2097 = vmatprep.mubr.bf16.mxu1 %v4632_v8  ;;  %v4607_v8 = vcombine.low %v6409_v37, %v6415_v39 }
 0x1fc   : > { %2026 = vmatmul.mubr.bf16.gmra.mxu0 %v4595_v4  ;;  %v4581_v4 = vcombine.low %v6328_v10, %v6334_v12 }
 0x1fd   : > { %2033 = vmatprep.mubr.bf16.mxu0 %v4600_v6  ;;  %v4586_v6 = vcombine.high %v6340_v14, %v6346_v16 }
 0x202   : > { %2098 = vmatmul.mubr.bf16.gmra.mxu1 %v4631_v41  ;;  %v4585_v41 = vcombine.low %v6340_v14, %v6346_v16 }
 0x203   : > { %2105 = vmatprep.mubr.bf16.mxu1 %v4636_v43  ;;  %v4590_v43 = vcombine.high %v6352_v18, %v6358_v20 }
 0x204   : > { %2034 = vmatmul.mubr.bf16.gmra.mxu0 %v4599_v54  ;;  %v4589_v54 = vcombine.low %v6352_v18, %v6358_v20 }
 0x205   : > { %2041 = vmatprep.mubr.bf16.mxu0 %v4604_v60  ;;  %v4594_v60 = vcombine.high %v6364_v22, %v6370_v24 }
 0x20a   : > { %2106 = vmatmul.mubr.bf16.gmra.mxu1 %v4635_v56  ;;  %v5754_v56 = vld [vmem:[#allocation14 + $0x70] ss:$8 sps:$4 sm:$0xff]  }
 0x20b   : > { %2113 = vmatprep.mubr.bf16.mxu1 %v4640_v50  ;;  %v5756_v50 = vld [vmem:[#allocation14 + $0x74] ss:$8 sps:$4 sm:$0xff]  }
 0x20c   : > { %2042 = vmatmul.mubr.bf16.gmra.mxu0 %v4603_v0  ;;  %2427 = vmatprep.subr.bf16.mxu0 %v5756_v50  ;;  %v4593_v0 = vcombine.low %v6364_v22, %v6370_v24  ;;  %v4605_v50 = vcombine.low %v6400_v34, %v6406_v36 }
 0x20d   : > { %2049 = vmatprep.mubr.bf16.mxu0 %v4608_v62  ;;  %2428 = vmatpush1.bf16.msra.mxu0 %v5754_v56  ;;  %v4598_v62 = vcombine.high %v6376_v26, %v6382_v28  ;;  %v5765_v56 = vld [vmem:[#allocation14 + $0x44] ss:$8 sps:$4 sm:$0xff]  }
 0x212   : > { %2114 = vmatmul.mubr.bf16.gmra.mxu1 %v4639_v2  ;;  %v5757_v2 = vld [vmem:[#allocation14 + $0x60] ss:$8 sps:$4 sm:$0xff]  }
 0x213   : > { %2154 = vmatprep.mubr.bf16.mxu1 %v4582_v58  ;;  %v5759_v58 = vld [vmem:[#allocation14 + $0x64] ss:$8 sps:$4 sm:$0xff]  }
 0x214   : > { %2050 = vmatmul.mubr.bf16.gmra.mxu0 %v4607_v8  ;;  %2429 = vmatprep.subr.bf16.mxu0 %v5759_v58  ;;  %v4597_v8 = vcombine.low %v6376_v26, %v6382_v28  ;;  %v4609_v58 = vcombine.low %v6412_v38, %v6418_v40 }
 0x215   : > { %2430 = vmatpush1.bf16.msra.mxu0 %v5757_v2  ;;  %v5768_v2 = vld [vmem:[#allocation14 + $0x34] ss:$8 sps:$4 sm:$0xff]  }
 0x21a   : > { %2155 = vmatmul.mubr.bf16.vlgmr.msra.gmra.mxu1 %v4581_v4  ;;  %v4602_v4 = vcombine.high %v6388_v30, %v6394_v32 }
 0x21b   : > { %2162 = vmatprep.mubr.bf16.mxu1 %v4586_v6  ;;  %v5760_v6 = vld [vmem:[#allocation14 + $0x50] ss:$8 sps:$4 sm:$0xff]  }
 0x222   : > { %2163 = vmatmul.mubr.bf16.gmra.mxu1 %v4585_v41  ;;  %v5762_v41 = vld [vmem:[#allocation14 + $0x54] ss:$8 sps:$4 sm:$0xff]  }
 0x223   : > { %2170 = vmatprep.mubr.bf16.mxu1 %v4590_v43  ;;  %2431 = vmatprep.subr.bf16.mxu0 %v5762_v41  ;;  %v4601_v43 = vcombine.low %v6388_v30, %v6394_v32  ;;  %v4613_v41 = vcombine.low %v6424_v42, %v6430_v44 }
 0x224   : > { %2432 = vmatpush1.bf16.msra.mxu0 %v5760_v6  ;;  %v5771_v6 = vld [vmem:[#allocation14 + $0x24] ss:$8 sps:$4 sm:$0xff]  }
 0x225   : > { %2433 = vmatprep.subr.bf16.mxu0 %v5765_v56  ;;  %v4617_v56 = vcombine.low %v6436_v46, %v6442_v48 }
 0x22a   : > { %2171 = vmatmul.mubr.bf16.gmra.mxu1 %v4589_v54  ;;  %v4606_v54 = vcombine.high %v6400_v34, %v6406_v36 }
 0x22b   : > { %2178 = vmatprep.mubr.bf16.mxu1 %v4594_v60  ;;  %v5763_v60 = vld [vmem:[#allocation14 + $0x40] ss:$8 sps:$4 sm:$0xff]  }
 0x22c   : > { %2434 = vmatpush1.bf16.msra.mxu0 %v5763_v60  ;;  %v5774_v60 = vld [vmem:[#allocation14 + $0x14] ss:$8 sps:$4 sm:$0xff]  }
 0x22d   : > { %2435 = vmatprep.subr.bf16.mxu0 %v5768_v2  ;;  %v5775_v2 = vld [vmem:[#allocation14] ss:$8 sps:$4 sm:$0xff]  }
 0x232   : > { %2179 = vmatmul.mubr.bf16.gmra.mxu1 %v4593_v0  ;;  %v4610_v0 = vcombine.high %v6412_v38, %v6418_v40 }
 0x233   : > { %2186 = vmatprep.mubr.bf16.mxu1 %v4598_v62  ;;  %v5766_v62 = vld [vmem:[#allocation14 + $0x30] ss:$8 sps:$4 sm:$0xff]  }
 0x234   : > { %2436 = vmatpush1.bf16.msra.mxu0 %v5766_v62  ;;  %v5777_v62 = vld [vmem:[#allocation14 + $0x4] ss:$8 sps:$4 sm:$0xff]  }
 0x235   : > { %2437 = vmatprep.subr.bf16.mxu0 %v5771_v6 }
 0x23a   : > { %2187 = vmatmul.mubr.bf16.gmra.mxu1 %v4597_v8  ;;  %v4614_v8 = vcombine.high %v6424_v42, %v6430_v44 }
 0x23b   : > { %2194 = vmatprep.mubr.bf16.mxu1 %v4602_v4  ;;  %v5769_v4 = vld [vmem:[#allocation14 + $0x20] ss:$8 sps:$4 sm:$0xff]  }
 0x23c   : > { %2438 = vmatpush1.bf16.msra.mxu0 %v5769_v4  ;;  %v7730_v4 = vld [vmem:[#allocation56_spill] sm:$0xff] }
 0x23d   : > { %2439 = vmatprep.subr.bf16.mxu0 %v5774_v60  ;;  %v7732_v60 = vld [vmem:[#allocation60_spill] sm:$0xff] }
 0x242   : > { %2195 = vmatmul.mubr.bf16.gmra.mxu1 %v4601_v43  ;;  %v4618_v43 = vcombine.high %v6436_v46, %v6442_v48 }
 0x243   : > { %2202 = vmatprep.mubr.bf16.mxu1 %v4606_v54  ;;  %v5772_v54 = vld [vmem:[#allocation14 + $0x10] ss:$8 sps:$4 sm:$0xff]  }
 0x244   : > { %2440 = vmatpush1.bf16.msra.mxu0 %v5772_v54  ;;  %v7731_v54 = vld [vmem:[#allocation62_spill] sm:$0xff] }
 0x245   : > { %2441 = vmatprep.subr.bf16.mxu0 %v5777_v62  ;;  %v7734_v62 = vld [vmem:[#allocation64_spill] sm:$0xff] }
 0x248   : > { %2442 = vmatpush1.bf16.msra.mxu0 %v5775_v2 }
 0x24a   : > { %2203 = vmatmul.mubr.bf16.gmra.mxu1 %v4605_v50  ;;  %v7728_v50 = vld [vmem:[#allocation52_spill] sm:$0xff] }
 0x24b   : > { %2210 = vmatprep.mubr.bf16.mxu1 %v4610_v0  ;;  %v4622_v0 = vcombine.high %v7728_v50, %v6454_v52 }
 0x252   : > { %2211 = vmatmul.mubr.bf16.gmra.mxu1 %v4609_v58  ;;  %v4621_v58 = vcombine.low %v7728_v50, %v6454_v52  ;;  %v4629_v50 = vcombine.low %v7732_v60, %v7731_v54 }
 0x253   : > { %2218 = vmatprep.mubr.bf16.mxu1 %v4614_v8  ;;  %v7729_v8 = vld [vmem:[#allocation58_spill] sm:$0xff] }
 0x254   : > { %v4626_v6 = vcombine.high %v7730_v4, %v7729_v8 }
 0x25a   : > { %2219 = vmatmul.mubr.bf16.gmra.mxu1 %v4613_v41  ;;  %v7589_v41 = vmov 0  }
 0x25b   : > { %2226 = vmatprep.mubr.bf16.mxu1 %v4618_v43  ;;  %2459 = vmatprep.mubr.bf16.mxu0 %v7589_v41  ;;  %v4625_v43 = vcombine.low %v7730_v4, %v7729_v8  ;;  %v7736_v41 = vld [vmem:[#allocation68_spill] sm:$0xff]  ;;  %v7737_v4 = vld [vmem:[#allocation74_spill] sm:$0xff] }
 0x262   : > { %2227 = vmatmul.mubr.bf16.gmra.mxu1 %v4617_v56  ;;  %v4630_v56 = vcombine.high %v7732_v60, %v7731_v54 }
 0x263   : > { %2234 = vmatprep.mubr.bf16.mxu1 %v4622_v0  ;;  %v7733_v0 = vld [vmem:[#allocation66_spill] sm:$0xff] }
 0x264   : > { %v4634_v2 = vcombine.high %v7734_v62, %v7733_v0 }
 0x26a   : > { %2235 = vmatmul.mubr.bf16.gmra.mxu1 %v4621_v58  ;;  %v4633_v58 = vcombine.low %v7734_v62, %v7733_v0 }
 0x26b   : > { %2242 = vmatprep.mubr.bf16.mxu1 %v4626_v6  ;;  %v7735_v6 = vld [vmem:[#allocation70_spill] sm:$0xff] }
 0x26c   : > { %v4638_v5 = vcombine.high %v7736_v41, %v7735_v6  ;;  %v4637_v8 = vcombine.low %v7736_v41, %v7735_v6 }
 0x272   : > { %2243 = vmatmul.mubr.bf16.gmra.mxu1 %v4625_v43  ;;  %v7738_v43 = vld [vmem:[#allocation72_spill] sm:$0xff] }
 0x273   : > { %2250 = vmatprep.mubr.bf16.mxu1 %v4630_v56  ;;  %v4642_v56 = vcombine.high %v7738_v43, %v7737_v4  ;;  %v4641_v54 = vcombine.low %v7738_v43, %v7737_v4 }
 0x27a   : > { %2251 = vmatmul.mubr.bf16.gmra.mxu1 %v4629_v50  ;;  %v6649_v50 = vld [vmem:[%s7553_s6] ss:$0 sm:$0xff] }
 0x27b   : > { %2258 = vmatprep.mubr.bf16.mxu1 %v4634_v2 }
 0x282   : > { %2259 = vmatmul.mubr.bf16.gmra.mxu1 %v4633_v58 }
 0x283   : > { %2266 = vmatprep.mubr.bf16.mxu1 %v4638_v5 }
 0x28a   : > { %2267 = vmatmul.mubr.bf16.gmra.mxu1 %v4637_v8 }
 0x28b   : > { %2274 = vmatprep.mubr.bf16.mxu1 %v4642_v56 }
 0x292   : > { %2275 = vmatmul.mubr.bf16.gmra.mxu1 %v4641_v54 }
 0x29a   : > { %v5266_v60 = vpop.f32.mrf.mxu1 }
 0x29c   : > { %v5267_v0 = vpop.f32.mrf.mxu1  ;;  %v6651_v5 = vpop.f32.mrf.mxu0 }
 0x29d   : > { %v5268_v62 = vadd.f32 %v5267_v0, %v5266_v60 }
 0x29e   : > { %v5269_v41 = vpop.f32.mrf.mxu1  ;;  %v6653_v2 = vpop.f32.mrf.mxu0 }
 0x29f   : > { %v6656_v58 = vadd.f32 %v5268_v62, %v6649_v50 }
 0x2a0   : > { %v5270_v6 = vpop.f32.mrf.mxu1  ;;  %v6658_v8 = vpop.f32.mrf.mxu0 }
 0x2a1   : > { %v5271_v4 = vadd.f32 %v5270_v6, %v5269_v41 }
 0x2a2   : > { %v5272_v43 = vpop.f32.mrf.mxu1  ;;  %v6660_v56 = vpop.f32.mrf.mxu0 }
 0x2a3   : > { %v6663_v54 = vadd.f32 %v5271_v4, %v6649_v50 }
 0x2a4   : > { %v5273_v7 = vpop.f32.mrf.mxu1  ;;  %v6665_v60 = vpop.f32.mrf.mxu0 }
 0x2a5   : > { %v5274_v1 = vadd.f32 %v5273_v7, %v5272_v43 }
 0x2a6   : > { %v5275_v3 = vpop.f32.mrf.mxu1  ;;  %v6670_v57 = vpop.f32.mrf.mxu0 }
 0x2a7   : > { %v6668_v0 = vadd.f32 %v5274_v1, %v6649_v50 }
 0x2a8   : > { %v5276_v62 = vpop.f32.mrf.mxu1  ;;  %v6675_v53 = vpop.f32.mrf.mxu0 }
 0x2a9   : > { %v5277_v61 = vadd.f32 %v5276_v62, %v5275_v3 }
 0x2aa   : > { %v5278_v63 = vpop.f32.mrf.mxu1  ;;  %v6680_v52 = vpop.f32.mrf.mxu0 }
 0x2ab   : > { %v6673_v41 = vadd.f32 %v5277_v61, %v6649_v50 }
 0x2ac   : > { %v5279_v6 = vpop.f32.mrf.mxu1  ;;  %v6685_v51 = vpop.f32.mrf.mxu0 }
 0x2ad   : > { %v5280_v59 = vadd.f32 %v5279_v6, %v5278_v63 }
 0x2ae   : > { %v5281_v4 = vpop.f32.mrf.mxu1  ;;  %v6690_v48 = vpop.f32.mrf.mxu0 }
 0x2af   : > { %v6678_v7 = vadd.f32 %v5280_v59, %v6649_v50 }
 0x2b0   : > { %v5282_v43 = vpop.f32.mrf.mxu1  ;;  %v6695_v47 = vpop.f32.mrf.mxu0 }
 0x2b1   : > { %v5283_v55 = vadd.f32 %v5282_v43, %v5281_v4 }
 0x2b2   : > { %v5284_v1 = vpop.f32.mrf.mxu1  ;;  %v6700_v44 = vpop.f32.mrf.mxu0 }
 0x2b3   : > { %v6683_v3 = vadd.f32 %v5283_v55, %v6649_v50 }
 0x2b4   : > { %v5285_v62 = vpop.f32.mrf.mxu1  ;;  %v6705_v40 = vpop.f32.mrf.mxu0 }
 0x2b5   : > { %v5286_v49 = vadd.f32 %v5285_v62, %v5284_v1 }
 0x2b6   : > { %v5287_v61 = vpop.f32.mrf.mxu1  ;;  %v6710_v39 = vpop.f32.mrf.mxu0 }
 0x2b7   : > { %v6688_v63 = vadd.f32 %v5286_v49, %v6649_v50 }
 0x2b8   : > { %v5288_v6 = vpop.f32.mrf.mxu1  ;;  %v6715_v36 = vpop.f32.mrf.mxu0 }
 0x2b9   : > { %v5289_v46 = vadd.f32 %v5288_v6, %v5287_v61 }
 0x2ba   : > { %v5290_v59 = vpop.f32.mrf.mxu1  ;;  %v6720_v35 = vpop.f32.mrf.mxu0 }
 0x2bb   : > { %v6693_v4 = vadd.f32 %v5289_v46, %v6649_v50 }
 0x2bc   : > { %v5291_v43 = vpop.f32.mrf.mxu1  ;;  %v6725_v32 = vpop.f32.mrf.mxu0 }
 0x2bd   : > { %v5292_v45 = vadd.f32 %v5291_v43, %v5290_v59 }
 0x2be   : > { %v5293_v55 = vpop.f32.mrf.mxu1  ;;  %v6730_v31 = vpop.f32.mrf.mxu0 }
 0x2bf   : > { %v6698_v1 = vadd.f32 %v5292_v45, %v6649_v50 }
 0x2c0   : > { %v5294_v62 = vpop.f32.mrf.mxu1  ;;  %v6739_v28 = vpop.f32.mrf.mxu0 }
 0x2c1   : > { %v5295_v42 = vadd.f32 %v5294_v62, %v5293_v55 }
 0x2c2   : > { %v5296_v49 = vpop.f32.mrf.mxu1 }
 0x2c3   : > { %v6703_v61 = vadd.f32 %v5295_v42, %v6649_v50 }
 0x2c4   : > { %v5297_v6 = vpop.f32.mrf.mxu1 }
 0x2c5   : > { %v5298_v38 = vadd.f32 %v5297_v6, %v5296_v49 }
 0x2c6   : > { %v5299_v46 = vpop.f32.mrf.mxu1 }
 0x2c7   : > { %v6708_v59 = vadd.f32 %v5298_v38, %v6649_v50 }
 0x2c8   : > { %v5300_v43 = vpop.f32.mrf.mxu1 }
 0x2c9   : > { %v5301_v37 = vadd.f32 %v5300_v43, %v5299_v46 }
 0x2ca   : > { %v5302_v45 = vpop.f32.mrf.mxu1 }
 0x2cb   : > { %v6713_v55 = vadd.f32 %v5301_v37, %v6649_v50 }
 0x2cc   : > { %v5303_v62 = vpop.f32.mrf.mxu1 }
 0x2cd   : > { %v5304_v34 = vadd.f32 %v5303_v62, %v5302_v45 }
 0x2ce   : > { %v5305_v42 = vpop.f32.mrf.mxu1 }
 0x2cf   : > { %v6718_v49 = vadd.f32 %v5304_v34, %v6649_v50 }
 0x2d0   : > { %v5306_v6 = vpop.f32.mrf.mxu1 }
 0x2d1   : > { %v5307_v33 = vadd.f32 %v5306_v6, %v5305_v42  ;;  %v5220_v42 = vadd.f32 %v6653_v2, %v6651_v5  ;;  %v6743_v5 = vpop.f32.mrf.mxu0 }
 0x2d2   : > { %v5308_v38 = vpop.f32.mrf.mxu1 }
 0x2d3   : > { %v6723_v46 = vadd.f32 %v5307_v33, %v6649_v50  ;;  %v6749_v21 = vpop.f32.mrf.mxu0 }
 0x2d4   : > { %v5309_v43 = vpop.f32.mrf.mxu1 }
 0x2d5   : > { %v5310_v30 = vadd.f32 %v5309_v43, %v5308_v38  ;;  %v5223_v38 = vadd.f32 %v6660_v56, %v6658_v8 }
 0x2d6   : > { %v5311_v37 = vpop.f32.mrf.mxu1 }
 0x2d7   : > { %v6728_v45 = vadd.f32 %v5310_v30, %v6649_v50  ;;  %v1996_v30 = vadd.f32 %v5220_v42, %v6649_v50 }
 0x2d8   : > { %v5312_v62 = vpop.f32.mrf.mxu1 }
 0x2d9   : > { %v5313_v29 = vadd.f32 %v5312_v62, %v5311_v37  ;;  %v1999_v62 = vadd.f32 %v5223_v38, %v6649_v50 }
 0x2da   : > { %v5330_v34 = vpop.f32.mrf.mxu1 }
 0x2db   : > { %v6735_v6 = vadd.f32 %v5313_v29, %v6649_v50  ;;  %v5226_v29 = vadd.f32 %v6670_v57, %v6665_v60  ;;  %v7739_v57 = vmov 0  }
 0x2dc   : > { %v5331_v33 = vpop.f32.mrf.mxu1 }
 0x2dd   : > { %v5332_v43 = vadd.f32 %v5331_v33, %v5330_v34  ;;  %v5229_v34 = vadd.f32 %v6680_v52, %v6675_v53  ;;  %v2004_v38 = vadd.f32 %v5226_v29, %v6649_v50  ;;  %v5232_v52 = vadd.f32 %v6690_v48, %v6685_v51 }
 0x2de   : > { %v5333_v26 = vpop.f32.mrf.mxu1  ;;  %v5238_v51 = vadd.f32 %v6710_v39, %v6705_v40 }
 0x2df   : > { %v2157_v25 = vadd.f32 %v5332_v43, %v1996_v30  ;;  %v2007_v30 = vadd.f32 %v5229_v34, %v6649_v50 }
 0x2e0   : > { %v5334_v37 = vpop.f32.mrf.mxu1 }
 0x2e1   : > { %v5335_v27 = vadd.f32 %v5334_v37, %v5333_v26  ;;  %v2283_v8 = vmax.f32 %v2157_v25, 0.0  ;;  %v5249_v25 = vpop.f32.mrf.mxu0 }
 0x2e2   : > { %v5336_v22 = vpop.f32.mrf.mxu1 }
 0x2e3   : > { %v2160_v2 = vadd.f32 %v5335_v27, %v1999_v62  ;;  %v5235_v62 = vadd.f32 %v6700_v44, %v6695_v47 }
 0x2e4   : > { %v5337_v24 = vpop.f32.mrf.mxu1 }
 0x2e5   : > { %v2284_v56 = vmax.f32 %v2160_v2, 0.0  ;;  %v5338_v33 = vadd.f32 %v5337_v24, %v5336_v22 }
 0x2e6   : > { %v5339_v42 = vpop.f32.mrf.mxu1 }
 0x2e7   : > { %v2315_v26 = vpack.c.bf16 %v2284_v56, %v2283_v8  ;;  %v2165_v37 = vadd.f32 %v5338_v33, %v2004_v38  ;;  %v5251_v8 = vpop.f32.mrf.mxu0  ;;  %v2012_v56 = vadd.f32 %v5232_v52, %v6649_v50 }
 0x2e8   : > { %v5340_v43 = vpop.f32.mrf.mxu1 }
 0x2e9   : > { %v5341_v23 = vadd.f32 %v5340_v43, %v5339_v42  ;;  %2460 = vmatmul.mubr.bf16.vlgmr.msra.gmra.mxu0 %v2315_v26  ;;  %v2285_v53 = vmax.f32 %v2165_v37, 0.0  ;;  %v2015_v42 = vadd.f32 %v5235_v62, %v6649_v50  ;;  %v5241_v37 = vadd.f32 %v6720_v35, %v6715_v36 }
 0x2ea   : > { %v5342_v27 = vpop.f32.mrf.mxu1  ;;  %2469 = vmatprep.mubr.bf16.mxu0 %v7739_v57 }
 0x2eb   : > { %v2168_v22 = vadd.f32 %v5341_v23, %v2007_v30  ;;  %v5252_v23 = vpop.f32.mrf.mxu0  ;;  %v2023_v62 = vadd.f32 %v5241_v37, %v6649_v50 }
 0x2ec   : > { %v5343_v24 = vpop.f32.mrf.mxu1 }
 0x2ed   : > { %v2286_v60 = vmax.f32 %v2168_v22, 0.0  ;;  %v5344_v29 = vadd.f32 %v5343_v24, %v5342_v27  ;;  %v5254_v22 = vpop.f32.mrf.mxu0  ;;  %v2020_v24 = vadd.f32 %v5238_v51, %v6649_v50 }
 0x2ee   : > { %v5345_v2 = vpop.f32.mrf.mxu1 }
 0x2ef   : > { %v2316_v34 = vpack.c.bf16 %v2286_v60, %v2285_v53  ;;  %v2173_v38 = vadd.f32 %v5344_v29, %v2012_v56  ;;  %v5255_v40 = vpop.f32.mrf.mxu0  ;;  %v5244_v56 = vadd.f32 %v6730_v31, %v6725_v32 }
 0x2f0   : > { %v5346_v33 = vpop.f32.mrf.mxu1 }
 0x2f1   : > { %v5347_v26 = vadd.f32 %v5346_v33, %v5345_v2  ;;  %2470 = vmatmul.mubr.bf16.gmra.mxu0 %v2316_v34  ;;  %v2287_v43 = vmax.f32 %v2173_v38, 0.0  ;;  %v2028_v51 = vadd.f32 %v5244_v56, %v6649_v50 }
 0x2f2   : > { %v5348_v48 = vpop.f32.mrf.mxu1  ;;  %2479 = vmatprep.mubr.bf16.mxu0 %v7739_v57 }
 0x2f3   : > { %v2176_v44 = vadd.f32 %v5347_v26, %v2015_v42  ;;  %v5247_v42 = vadd.f32 %v6743_v5, %v6739_v28 }
 0x2f4   : > { %v5349_v47 = vpop.f32.mrf.mxu1 }
 0x2f5   : > { %v2288_v30 = vmax.f32 %v2176_v44, 0.0  ;;  %v5350_v27 = vadd.f32 %v5349_v47, %v5348_v48  ;;  %v5257_v48 = vpop.f32.mrf.mxu0 }
 0x2f6   : > { %v5351_v52 = vpop.f32.mrf.mxu1 }
 0x2f7   : > { %v2317_v53 = vpack.c.bf16 %v2288_v30, %v2287_v43  ;;  %v2181_v29 = vadd.f32 %v5350_v27, %v2020_v24  ;;  %v2031_v43 = vadd.f32 %v5247_v42, %v6649_v50  ;;  %v5258_v32 = vpop.f32.mrf.mxu0  ;;  %v5250_v27 = vadd.f32 %v5249_v25, %v6749_v21 }
 0x2f8   : > { %v5352_v60 = vpop.f32.mrf.mxu1  ;;  %v5256_v21 = vadd.f32 %v5255_v40, %v5254_v22 }
 0x2f9   : > { %v5353_v2 = vadd.f32 %v5352_v60, %v5351_v52  ;;  %2480 = vmatmul.mubr.bf16.gmra.mxu0 %v2317_v53  ;;  %v2289_v34 = vmax.f32 %v2181_v29, 0.0  ;;  %v5253_v53 = vadd.f32 %v5252_v23, %v5251_v8  ;;  %v5260_v29 = vpop.f32.mrf.mxu0 }
 0x2fa   : > { %v5354_v39 = vpop.f32.mrf.mxu1  ;;  %2489 = vmatprep.mubr.bf16.mxu0 %v7739_v57 }
 0x2fb   : > { %v2184_v35 = vadd.f32 %v5353_v2, %v2023_v62  ;;  %v2036_v2 = vadd.f32 %v5250_v27, %v6649_v50  ;;  %v5261_v42 = vpop.f32.mrf.mxu0 }
 0x2fc   : > { %v5355_v36 = vpop.f32.mrf.mxu1  ;;  %v5262_v22 = vadd.f32 %v5261_v42, %v5260_v29 }
 0x2fd   : > { %v2290_v33 = vmax.f32 %v2184_v35, 0.0  ;;  %v5356_v38 = vadd.f32 %v5355_v36, %v5354_v39  ;;  %v2039_v35 = vadd.f32 %v5253_v53, %v6649_v50 }
 0x2fe   : > { %v5357_v26 = vpop.f32.mrf.mxu1 }
 0x2ff   : > { %v2318_v44 = vpack.c.bf16 %v2290_v33, %v2289_v34  ;;  %v2189_v30 = vadd.f32 %v5356_v38, %v2028_v51 }
 0x300   : > { %v5358_v47 = vpop.f32.mrf.mxu1 }
 0x301   : > { %v5359_v37 = vadd.f32 %v5358_v47, %v5357_v26  ;;  %2490 = vmatmul.mubr.bf16.gmra.mxu0 %v2318_v44  ;;  %v2291_v5 = vmax.f32 %v2189_v30, 0.0  ;;  %v5259_v26 = vadd.f32 %v5258_v32, %v5257_v48  ;;  %v5263_v47 = vpop.f32.mrf.mxu0 }
 0x302   : > { %v5360_v31 = vpop.f32.mrf.mxu1  ;;  %2499 = vmatprep.mubr.bf16.mxu0 %v7739_v57 }
 0x303   : > { %v2192_v52 = vadd.f32 %v5359_v37, %v2031_v43  ;;  %v2044_v43 = vadd.f32 %v5256_v21, %v6649_v50 }
 0x304   : > { %v5361_v28 = vpop.f32.mrf.mxu1 }
 0x305   : > { %v2292_v24 = vmax.f32 %v2192_v52, 0.0  ;;  %v5362_v60 = vadd.f32 %v5361_v28, %v5360_v31  ;;  %v2047_v31 = vadd.f32 %v5259_v26, %v6649_v50  ;;  %v5264_v28 = vpop.f32.mrf.mxu0 }
 0x306   : > { %v5363_v62 = vpop.f32.mrf.mxu1  ;;  %v5265_v53 = vadd.f32 %v5264_v28, %v5263_v47 }
 0x307   : > { %v2319_v39 = vpack.c.bf16 %v2292_v24, %v2291_v5  ;;  %v2197_v36 = vadd.f32 %v5362_v60, %v2036_v2  ;;  %v2052_v2 = vadd.f32 %v5262_v22, %v6649_v50 }
 0x308   : > { %v5364_v56 = vpop.f32.mrf.mxu1 }
 0x309   : > { %v5365_v34 = vadd.f32 %v5364_v56, %v5363_v62  ;;  %2500 = vmatmul.mubr.bf16.gmra.mxu0 %v2319_v39  ;;  %v2293_v8 = vmax.f32 %v2197_v36, 0.0 }
 0x30a   : > { %v5366_v33 = vpop.f32.mrf.mxu1  ;;  %2509 = vmatprep.mubr.bf16.mxu0 %v7739_v57 }
 0x30b   : > { %v2200_v25 = vadd.f32 %v5365_v34, %v2039_v35  ;;  %v2055_v35 = vadd.f32 %v5265_v53, %v6649_v50 }
 0x30c   : > { %v5367_v38 = vpop.f32.mrf.mxu1 }
 0x30d   : > { %v2294_v23 = vmax.f32 %v2200_v25, 0.0  ;;  %v5368_v51 = vadd.f32 %v5367_v38, %v5366_v33 }
 0x30e   : > { %v5369_v44 = vpop.f32.mrf.mxu1 }
 0x30f   : > { %v2320_v30 = vpack.c.bf16 %v2294_v23, %v2293_v8  ;;  %v2205_v27 = vadd.f32 %v5368_v51, %v2044_v43 }
 0x310   : > { %v5370_v37 = vpop.f32.mrf.mxu1 }
 0x311   : > { %v5371_v52 = vadd.f32 %v5370_v37, %v5369_v44  ;;  %2510 = vmatmul.mubr.bf16.gmra.mxu0 %v2320_v30  ;;  %v2295_v48 = vmax.f32 %v2205_v27, 0.0 }
 0x312   : > { %v5372_v5 = vpop.f32.mrf.mxu1  ;;  %2519 = vmatprep.mubr.bf16.mxu0 %v7739_v57 }
 0x313   : > { %v2208_v40 = vadd.f32 %v5371_v52, %v2047_v31 }
 0x314   : > { %v5373_v24 = vpop.f32.mrf.mxu1 }
 0x315   : > { %v2296_v32 = vmax.f32 %v2208_v40, 0.0  ;;  %v5374_v60 = vadd.f32 %v5373_v24, %v5372_v5 }
 0x316   : > { %v5375_v62 = vpop.f32.mrf.mxu1 }
 0x317   : > { %v2321_v39 = vpack.c.bf16 %v2296_v32, %v2295_v48  ;;  %v2213_v36 = vadd.f32 %v5374_v60, %v2052_v2 }
 0x318   : > { %v5376_v56 = vpop.f32.mrf.mxu1 }
 0x319   : > { %v5377_v34 = vadd.f32 %v5376_v56, %v5375_v62  ;;  %2520 = vmatmul.mubr.bf16.gmra.mxu0 %v2321_v39  ;;  %v2297_v21 = vmax.f32 %v2213_v36, 0.0 }
 0x31a   : > { %v5378_v33 = vpop.f32.mrf.mxu1  ;;  %2529 = vmatprep.mubr.bf16.mxu0 %v7739_v57 }
 0x31b   : > { %v2216_v29 = vadd.f32 %v5377_v34, %v2055_v35 }
 0x31c   : > { %v5379_v42 = vpop.f32.mrf.mxu1 }
 0x31d   : > { %v2298_v25 = vmax.f32 %v2216_v29, 0.0  ;;  %v5380_v38 = vadd.f32 %v5379_v42, %v5378_v33 }
 0x31e   : > { %v5381_v8 = vpop.f32.mrf.mxu1 }
 0x31f   : > { %v2322_v23 = vpack.c.bf16 %v2298_v25, %v2297_v21  ;;  %v2221_v51 = vadd.f32 %v5380_v38, %v6656_v58 }
 0x320   : > { %v5382_v26 = vpop.f32.mrf.mxu1 }
 0x321   : > { %v5383_v44 = vadd.f32 %v5382_v26, %v5381_v8  ;;  %2530 = vmatmul.mubr.bf16.gmra.mxu0 %v2322_v23  ;;  %v2299_v30 = vmax.f32 %v2221_v51, 0.0 }
 0x322   : > { %v5384_v47 = vpop.f32.mrf.mxu1  ;;  %2539 = vmatprep.mubr.bf16.mxu0 %v7739_v57 }
 0x323   : > { %v2224_v50 = vadd.f32 %v5383_v44, %v6663_v54 }
 0x324   : > { %v5385_v43 = vpop.f32.mrf.mxu1 }
 0x325   : > { %v2300_v37 = vmax.f32 %v2224_v50, 0.0  ;;  %v5386_v31 = vadd.f32 %v5385_v43, %v5384_v47 }
 0x326   : > { %v5387_v27 = vpop.f32.mrf.mxu1 }
 0x327   : > { %v2323_v52 = vpack.c.bf16 %v2300_v37, %v2299_v30  ;;  %v2229_v5 = vadd.f32 %v5386_v31, %v6668_v0 }
 0x328   : > { %v5388_v28 = vpop.f32.mrf.mxu1 }
 0x329   : > { %v5389_v22 = vadd.f32 %v5388_v28, %v5387_v27  ;;  %2540 = vmatmul.mubr.bf16.gmra.mxu0 %v2323_v52  ;;  %v2301_v48 = vmax.f32 %v2229_v5, 0.0 }
 0x32a   : > { %v5390_v40 = vpop.f32.mrf.mxu1  ;;  %2549 = vmatprep.mubr.bf16.mxu0 %v7739_v57 }
 0x32b   : > { %v2232_v58 = vadd.f32 %v5389_v22, %v6673_v41 }
 0x32c   : > { %v5391_v24 = vpop.f32.mrf.mxu1 }
 0x32d   : > { %v2302_v32 = vmax.f32 %v2232_v58, 0.0  ;;  %v5392_v54 = vadd.f32 %v5391_v24, %v5390_v40 }
 0x32e   : > { %v5393_v53 = vpop.f32.mrf.mxu1 }
 0x32f   : > { %v2324_v60 = vpack.c.bf16 %v2302_v32, %v2301_v48  ;;  %v2237_v2 = vadd.f32 %v5392_v54, %v6678_v7 }
 0x330   : > { %v5394_v62 = vpop.f32.mrf.mxu1 }
 0x331   : > { %v5395_v39 = vadd.f32 %v5394_v62, %v5393_v53  ;;  %2550 = vmatmul.mubr.bf16.gmra.mxu0 %v2324_v60  ;;  %v2303_v36 = vmax.f32 %v2237_v2, 0.0 }
 0x332   : > { %v5396_v56 = vpop.f32.mrf.mxu1  ;;  %2559 = vmatprep.mubr.bf16.mxu0 %v7739_v57 }
 0x333   : > { %v2240_v0 = vadd.f32 %v5395_v39, %v6683_v3 }
 0x334   : > { %v5397_v35 = vpop.f32.mrf.mxu1 }
 0x335   : > { %v2304_v34 = vmax.f32 %v2240_v0, 0.0  ;;  %v5398_v41 = vadd.f32 %v5397_v35, %v5396_v56 }
 0x336   : > { %v5399_v33 = vpop.f32.mrf.mxu1 }
 0x337   : > { %v2325_v29 = vpack.c.bf16 %v2304_v34, %v2303_v36  ;;  %v2245_v21 = vadd.f32 %v5398_v41, %v6688_v63 }
 0x338   : > { %v5400_v42 = vpop.f32.mrf.mxu1 }
 0x339   : > { %v5401_v25 = vadd.f32 %v5400_v42, %v5399_v33  ;;  %2560 = vmatmul.mubr.bf16.gmra.mxu0 %v2325_v29  ;;  %v2305_v23 = vmax.f32 %v2245_v21, 0.0 }
 0x33a   : > { %v5402_v38 = vpop.f32.mrf.mxu1  ;;  %2569 = vmatprep.mubr.bf16.mxu0 %v7739_v57 }
 0x33b   : > { %v2248_v7 = vadd.f32 %v5401_v25, %v6693_v4 }
 0x33c   : > { %v5403_v8 = vpop.f32.mrf.mxu1 }
 0x33d   : > { %v2306_v26 = vmax.f32 %v2248_v7, 0.0  ;;  %v5404_v3 = vadd.f32 %v5403_v8, %v5402_v38 }
 0x33e   : > { %v5405_v51 = vpop.f32.mrf.mxu1 }
 0x33f   : > { %v2326_v44 = vpack.c.bf16 %v2306_v26, %v2305_v23  ;;  %v2253_v50 = vadd.f32 %v5404_v3, %v6698_v1 }
 0x340   : > { %v5406_v47 = vpop.f32.mrf.mxu1 }
 0x341   : > { %v5407_v43 = vadd.f32 %v5406_v47, %v5405_v51  ;;  %2570 = vmatmul.mubr.bf16.gmra.mxu0 %v2326_v44  ;;  %v2307_v31 = vmax.f32 %v2253_v50, 0.0 }
 0x342   : > { %v5408_v30 = vpop.f32.mrf.mxu1  ;;  %2579 = vmatprep.mubr.bf16.mxu0 %v7739_v57 }
 0x343   : > { %v2256_v63 = vadd.f32 %v5407_v43, %v6703_v61 }
 0x344   : > { %v5409_v37 = vpop.f32.mrf.mxu1 }
 0x345   : > { %v2308_v27 = vmax.f32 %v2256_v63, 0.0  ;;  %v5410_v4 = vadd.f32 %v5409_v37, %v5408_v30 }
 0x346   : > { %v5411_v52 = vpop.f32.mrf.mxu1 }
 0x347   : > { %v2327_v28 = vpack.c.bf16 %v2308_v27, %v2307_v31  ;;  %v2261_v22 = vadd.f32 %v5410_v4, %v6708_v59 }
 0x348   : > { %v5412_v5 = vpop.f32.mrf.mxu1 }
 0x349   : > { %v5413_v40 = vadd.f32 %v5412_v5, %v5411_v52  ;;  %2580 = vmatmul.mubr.bf16.gmra.mxu0 %v2327_v28  ;;  %v2309_v48 = vmax.f32 %v2261_v22, 0.0 }
 0x34a   : > { %v5414_v58 = vpop.f32.mrf.mxu1  ;;  %2589 = vmatprep.mubr.bf16.mxu0 %v7739_v57 }
 0x34b   : > { %v2264_v1 = vadd.f32 %v5413_v40, %v6713_v55 }
 0x34c   : > { %v5415_v24 = vpop.f32.mrf.mxu1 }
 0x34d   : > { %v2310_v32 = vmax.f32 %v2264_v1, 0.0  ;;  %v5416_v61 = vadd.f32 %v5415_v24, %v5414_v58 }
 0x34e   : > { %v5417_v54 = vpop.f32.mrf.mxu1 }
 0x34f   : > { %v2328_v53 = vpack.c.bf16 %v2310_v32, %v2309_v48  ;;  %v2269_v62 = vadd.f32 %v5416_v61, %v6718_v49 }
 0x350   : > { %v5418_v60 = vpop.f32.mrf.mxu1 }
 0x351   : > { %v5419_v2 = vadd.f32 %v5418_v60, %v5417_v54  ;;  %2590 = vmatmul.mubr.bf16.gmra.mxu0 %v2328_v53  ;;  %v2311_v0 = vmax.f32 %v2269_v62, 0.0 }
 0x352   : > { %v5420_v39 = vpop.f32.mrf.mxu1  ;;  %2599 = vmatprep.mubr.bf16.mxu0 %v7739_v57 }
 0x353   : > { %v2272_v59 = vadd.f32 %v5419_v2, %v6723_v46 }
 0x354   : > { %v5421_v56 = vpop.f32.mrf.mxu1 }
 0x355   : > { %v2312_v35 = vmax.f32 %v2272_v59, 0.0  ;;  %v5422_v55 = vadd.f32 %v5421_v56, %v5420_v39 }
 0x356   : > { %v5423_v36 = vpop.f32.mrf.mxu1 }
 0x357   : > { %v2329_v34 = vpack.c.bf16 %v2312_v35, %v2311_v0  ;;  %v2277_v33 = vadd.f32 %v5422_v55, %v6728_v45 }
 0x358   : > { %v5424_v41 = vpop.f32.mrf.mxu1 }
 0x359   : > { %v5425_v29 = vadd.f32 %v5424_v41, %v5423_v36  ;;  %2600 = vmatmul.mubr.bf16.gmra.mxu0 %v2329_v34  ;;  %v2313_v42 = vmax.f32 %v2277_v33, 0.0 }
 0x35a   : > { %2609 = vmatprep.mubr.bf16.mxu0 %v7739_v57 }
 0x35b   : > { %v2280_v49 = vadd.f32 %v5425_v29, %v6735_v6 }
 0x35d   : > { %v2314_v21 = vmax.f32 %v2280_v49, 0.0 }
 0x35f   : > { %v2330_v25 = vpack.c.bf16 %v2314_v21, %v2313_v42 }
 0x361   : > { %2610 = vmatmul.mubr.bf16.gmra.mxu0 %v2330_v25 }
 0x3a9   : > { %v2461_v46 = vpop.f32.mrf.mxu0 }
 0x3ab   : > { %v2463_v38 = vpop.f32.mrf.mxu0 }
 0x3ac   : > { %v4938_v7 = vpack.c.bf16 %v2463_v38, %v2461_v46 }
 0x3ad   : > { %v2465_v8 = vpop.f32.mrf.mxu0 }
 0x3ae   : > { %2815 = vst [vmem:[%s6810_s19] sm:$0xff] %v4938_v7 }
 0x3af   : > { %v2467_v45 = vpop.f32.mrf.mxu0 }
 0x3b0   : > { %v4939_v57 = vpack.c.bf16 %v2467_v45, %v2465_v8 }
 0x3b1   : > { %v2471_v23 = vpop.f32.mrf.mxu0 }
 0x3b2   : > { %2816 = vst [vmem:[%s6810_s19 + $0x8] sm:$0xff] %v4939_v57 }
 0x3b3   : > { %v2473_v6 = vpop.f32.mrf.mxu0 }
 0x3b4   : > { %v4940_v26 = vpack.c.bf16 %v2473_v6, %v2471_v23 }
 0x3b5   : > { %v2475_v3 = vpop.f32.mrf.mxu0 }
 0x3b6   : > { %2817 = vst [vmem:[%s6810_s19 + $0x10] sm:$0xff] %v4940_v26 }
 0x3b7   : > { %v2477_v51 = vpop.f32.mrf.mxu0 }
 0x3b8   : > { %v4941_v44 = vpack.c.bf16 %v2477_v51, %v2475_v3 }
 0x3b9   : > { %v2481_v47 = vpop.f32.mrf.mxu0 }
 0x3ba   : > { %2818 = vst [vmem:[%s6810_s19 + $0x18] sm:$0xff] %v4941_v44 }
 0x3bb   : > { %v2483_v50 = vpop.f32.mrf.mxu0 }
 0x3bc   : > { %v4942_v43 = vpack.c.bf16 %v2483_v50, %v2481_v47 }
 0x3bd   : > { %v2485_v30 = vpop.f32.mrf.mxu0 }
 0x3be   : > { %2819 = vst [vmem:[%s6810_s19 + $0x20] sm:$0xff] %v4942_v43 }
 0x3bf   : > { %v2487_v63 = vpop.f32.mrf.mxu0 }
 0x3c0   : > { %v4943_v37 = vpack.c.bf16 %v2487_v63, %v2485_v30 }
 0x3c1   : > { %v2491_v31 = vpop.f32.mrf.mxu0 }
 0x3c2   : > { %2820 = vst [vmem:[%s6810_s19 + $0x28] sm:$0xff] %v4943_v37 }
 0x3c3   : > { %v2493_v27 = vpop.f32.mrf.mxu0 }
 0x3c4   : > { %v4944_v4 = vpack.c.bf16 %v2493_v27, %v2491_v31 }
 0x3c5   : > { %v2495_v52 = vpop.f32.mrf.mxu0 }
 0x3c6   : > { %2821 = vst [vmem:[%s6810_s19 + $0x30] sm:$0xff] %v4944_v4 }
 0x3c7   : > { %v2497_v28 = vpop.f32.mrf.mxu0 }
 0x3c8   : > { %v4945_v5 = vpack.c.bf16 %v2497_v28, %v2495_v52 }
 0x3c9   : > { %v2501_v22 = vpop.f32.mrf.mxu0 }
 0x3ca   : > { %2822 = vst [vmem:[%s6810_s19 + $0x38] sm:$0xff] %v4945_v5 }
 0x3cb   : > { %v2503_v40 = vpop.f32.mrf.mxu0 }
 0x3cc   : > { %v4946_v58 = vpack.c.bf16 %v2503_v40, %v2501_v22 }
 0x3cd   : > { %v2505_v1 = vpop.f32.mrf.mxu0 }
 0x3ce   : > { %2823 = vst [vmem:[%s6810_s19 + $0x40] sm:$0xff] %v4946_v58 }
 0x3cf   : > { %v2507_v24 = vpop.f32.mrf.mxu0 }
 0x3d0   : > { %v4947_v48 = vpack.c.bf16 %v2507_v24, %v2505_v1 }
 0x3d1   : > { %v2511_v32 = vpop.f32.mrf.mxu0 }
 0x3d2   : > { %2824 = vst [vmem:[%s6810_s19 + $0x48] sm:$0xff] %v4947_v48 }
 0x3d3   : > { %v2513_v61 = vpop.f32.mrf.mxu0 }
 0x3d4   : > { %v4948_v54 = vpack.c.bf16 %v2513_v61, %v2511_v32 }
 0x3d5   : > { %v2515_v53 = vpop.f32.mrf.mxu0 }
 0x3d6   : > { %2825 = vst [vmem:[%s6810_s19 + $0x50] sm:$0xff] %v4948_v54 }
 0x3d7   : > { %v2517_v60 = vpop.f32.mrf.mxu0 }
 0x3d8   : > { %v4949_v62 = vpack.c.bf16 %v2517_v60, %v2515_v53 }
 0x3d9   : > { %v2521_v2 = vpop.f32.mrf.mxu0 }
 0x3da   : > { %2826 = vst [vmem:[%s6810_s19 + $0x58] sm:$0xff] %v4949_v62 }
 0x3db   : > { %v2523_v39 = vpop.f32.mrf.mxu0 }
 0x3dc   : > { %v4950_v59 = vpack.c.bf16 %v2523_v39, %v2521_v2 }
 0x3dd   : > { %v2525_v56 = vpop.f32.mrf.mxu0 }
 0x3de   : > { %2827 = vst [vmem:[%s6810_s19 + $0x60] sm:$0xff] %v4950_v59 }
 0x3df   : > { %v2527_v0 = vpop.f32.mrf.mxu0 }
 0x3e0   : > { %v4951_v35 = vpack.c.bf16 %v2527_v0, %v2525_v56 }
 0x3e1   : > { %v2531_v55 = vpop.f32.mrf.mxu0 }
 0x3e2   : > { %2828 = vst [vmem:[%s6810_s19 + $0x68] sm:$0xff] %v4951_v35 }
 0x3e3   : > { %v2533_v36 = vpop.f32.mrf.mxu0 }
 0x3e4   : > { %v4952_v34 = vpack.c.bf16 %v2533_v36, %v2531_v55 }
 0x3e5   : > { %v2535_v41 = vpop.f32.mrf.mxu0 }
 0x3e6   : > { %2829 = vst [vmem:[%s6810_s19 + $0x70] sm:$0xff] %v4952_v34 }
 0x3e7   : > { %v2537_v33 = vpop.f32.mrf.mxu0 }
 0x3e8   : > { %v4953_v29 = vpack.c.bf16 %v2537_v33, %v2535_v41 }
 0x3e9   : > { %v2541_v49 = vpop.f32.mrf.mxu0 }
 0x3ea   : > { %2830 = vst [vmem:[%s6810_s19 + $0x78] sm:$0xff] %v4953_v29 }
 0x3eb   : > { %v2543_v42 = vpop.f32.mrf.mxu0 }
 0x3ec   : > { %v4954_v21 = vpack.c.bf16 %v2543_v42, %v2541_v49 }
 0x3ed   : > { %v2545_v25 = vpop.f32.mrf.mxu0 }
 0x3ee   : > { %2831 = vst [vmem:[%s6810_s19 + $0x80] sm:$0xff] %v4954_v21 }
 0x3ef   : > { %v2547_v46 = vpop.f32.mrf.mxu0 }
 0x3f0   : > { %v4955_v38 = vpack.c.bf16 %v2547_v46, %v2545_v25 }
 0x3f1   : > { %v2551_v7 = vpop.f32.mrf.mxu0 }
 0x3f2   : > { %2832 = vst [vmem:[%s6810_s19 + $0x88] sm:$0xff] %v4955_v38 }
 0x3f3   : > { %v2553_v8 = vpop.f32.mrf.mxu0 }
 0x3f4   : > { %v4956_v45 = vpack.c.bf16 %v2553_v8, %v2551_v7 }
 0x3f5   : > { %v2555_v57 = vpop.f32.mrf.mxu0 }
 0x3f6   : > { %2833 = vst [vmem:[%s6810_s19 + $0x90] sm:$0xff] %v4956_v45 }
 0x3f7   : > { %v2557_v23 = vpop.f32.mrf.mxu0 }
 0x3f8   : > { %v4957_v6 = vpack.c.bf16 %v2557_v23, %v2555_v57 }
 0x3f9   : > { %v2561_v26 = vpop.f32.mrf.mxu0 }
 0x3fa   : > { %2834 = vst [vmem:[%s6810_s19 + $0x98] sm:$0xff] %v4957_v6 }
 0x3fb   : > { %v2563_v3 = vpop.f32.mrf.mxu0 }
 0x3fc   : > { %v4958_v51 = vpack.c.bf16 %v2563_v3, %v2561_v26 }
 0x3fd   : > { %v2565_v44 = vpop.f32.mrf.mxu0 }
 0x3fe   : > { %2835 = vst [vmem:[%s6810_s19 + $0xa0] sm:$0xff] %v4958_v51 }
 0x3ff   : > { %v2567_v47 = vpop.f32.mrf.mxu0 }
 0x400   : > { %v4959_v50 = vpack.c.bf16 %v2567_v47, %v2565_v44 }
 0x401   : > { %v2571_v43 = vpop.f32.mrf.mxu0 }
 0x402   : > { %2836 = vst [vmem:[%s6810_s19 + $0xa8] sm:$0xff] %v4959_v50 }
 0x403   : > { %v2573_v30 = vpop.f32.mrf.mxu0 }
 0x404   : > { %v4960_v63 = vpack.c.bf16 %v2573_v30, %v2571_v43 }
 0x405   : > { %v2575_v37 = vpop.f32.mrf.mxu0 }
 0x406   : > { %2837 = vst [vmem:[%s6810_s19 + $0xb0] sm:$0xff] %v4960_v63 }
 0x407   : > { %v2577_v31 = vpop.f32.mrf.mxu0 }
 0x408   : > { %v4961_v27 = vpack.c.bf16 %v2577_v31, %v2575_v37 }
 0x409   : > { %v2581_v4 = vpop.f32.mrf.mxu0 }
 0x40a   : > { %2838 = vst [vmem:[%s6810_s19 + $0xb8] sm:$0xff] %v4961_v27 }
 0x40b   : > { %v2583_v52 = vpop.f32.mrf.mxu0 }
 0x40c   : > { %v4962_v28 = vpack.c.bf16 %v2583_v52, %v2581_v4 }
 0x40d   : > { %v2585_v5 = vpop.f32.mrf.mxu0 }
 0x40e   : > { %2839 = vst [vmem:[%s6810_s19 + $0xc0] sm:$0xff] %v4962_v28 }
 0x40f   : > { %v2587_v22 = vpop.f32.mrf.mxu0 }
 0x410   : > { %v4963_v40 = vpack.c.bf16 %v2587_v22, %v2585_v5 }
 0x411   : > { %v2591_v58 = vpop.f32.mrf.mxu0 }
 0x412   : > { %2840 = vst [vmem:[%s6810_s19 + $0xc8] sm:$0xff] %v4963_v40 }
 0x413   : > { %v2593_v1 = vpop.f32.mrf.mxu0 }
 0x414   : > { %v4964_v24 = vpack.c.bf16 %v2593_v1, %v2591_v58 }
 0x415   : > { %v2595_v48 = vpop.f32.mrf.mxu0 }
 0x416   : > { %2841 = vst [vmem:[%s6810_s19 + $0xd0] sm:$0xff] %v4964_v24 }
 0x417   : > { %v2597_v32 = vpop.f32.mrf.mxu0 }
 0x418   : > { %v4965_v61 = vpack.c.bf16 %v2597_v32, %v2595_v48 }
 0x419   : > { %v2601_v54 = vpop.f32.mrf.mxu0 }
 0x41a   : > { %2842 = vst [vmem:[%s6810_s19 + $0xd8] sm:$0xff] %v4965_v61 }
 0x41b   : > { %v2603_v53 = vpop.f32.mrf.mxu0 }
 0x41c   : > { %v4966_v60 = vpack.c.bf16 %v2603_v53, %v2601_v54 }
 0x41d   : > { %v2605_v62 = vpop.f32.mrf.mxu0 }
 0x41e   : > { %2843 = vst [vmem:[%s6810_s19 + $0xe0] sm:$0xff] %v4966_v60 }
 0x41f   : > { %v2607_v2 = vpop.f32.mrf.mxu0 }
 0x420   : > { %v4967_v39 = vpack.c.bf16 %v2607_v2, %v2605_v62 }
 0x421   : > { %v2611_v59 = vpop.f32.mrf.mxu0 }
 0x422   : > { %2844 = vst [vmem:[%s6810_s19 + $0xe8] sm:$0xff] %v4967_v39 }
 0x423   : > { %v2613_v56 = vpop.f32.mrf.mxu0 }
 0x424   : > { %v4968_v0 = vpack.c.bf16 %v2613_v56, %v2611_v59 }
 0x425   : > { %v2615_v35 = vpop.f32.mrf.mxu0 }
 0x426   : > { %2845 = vst [vmem:[%s6810_s19 + $0xf0] sm:$0xff] %v4968_v0 }
 0x427   : > { %v2617_v55 = vpop.f32.mrf.mxu0 }
 0x428   : > { %v4969_v36 = vpack.c.bf16 %v2617_v55, %v2615_v35 }
 0x42a   : > { %2846 = vst [vmem:[%s6810_s19 + $0xf8] sm:$0xff] %v4969_v36 }
 0x42b PF: > { %p2847_p6 = scmp.eq.s32.totalorder %s6096_s1, 1  ;;  %p4725_p9 = scmp.ne.s32.totalorder %s6096_s1, 1 }
 0x42d   : > { %2850 = sbr.rel (%p4725_p9) target bundleno = 1698 (0x6a2), region = 84 }
 0x432   : > { %v5778_v34 = vld [vmem:[#allocation3 + $0x74] ss:$8 sps:$4 sm:$0xff]   ;;  %v4727_v41 = vcombine.high %v6325_v9, %v6331_v11  ;;  %v4729_v33 = vcombine.high %v6328_v10, %v6334_v12  ;;  %v5782_v49 = vld [vmem:[#allocation3 + $0x70] ss:$8 sps:$4 sm:$0xff]   ;;  %v5784_v21 = vld [vmem:[#allocation3 + $0x64] ss:$8 sps:$4 sm:$0xff]  }
 0x433   : > { %v5780_v29 = vld [vmem:[#allocation3 + $0x174] ss:$8 sps:$4 sm:$0xff]   ;;  %3567 = vmatprep.subr.bf16.mxu0 %v5778_v34  ;;  %v5783_v42 = vld [vmem:[#allocation3 + $0x170] ss:$8 sps:$4 sm:$0xff]   ;;  %v5786_v25 = vld [vmem:[#allocation3 + $0x164] ss:$8 sps:$4 sm:$0xff]  }
 0x434   : > { %3599 = vmatprep.mubr.bf16.mxu0 %v4727_v41  ;;  %3760 = vmatprep.subr.bf16.mxu1 %v5780_v29  ;;  %v5788_v46 = vld [vmem:[#allocation3 + $0x60] ss:$8 sps:$4 sm:$0xff]   ;;  %v5790_v7 = vld [vmem:[#allocation3 + $0x54] ss:$8 sps:$4 sm:$0xff]   ;;  %v5794_v45 = vld [vmem:[#allocation3 + $0x50] ss:$8 sps:$4 sm:$0xff]  }
 0x435   : > { %3792 = vmatprep.mubr.bf16.mxu1 %v4729_v33  ;;  %3568 = vmatpush1.bf16.msra.mxu0 %v5782_v49  ;;  %v5789_v38 = vld [vmem:[#allocation3 + $0x160] ss:$8 sps:$4 sm:$0xff]   ;;  %v5792_v8 = vld [vmem:[#allocation3 + $0x154] ss:$8 sps:$4 sm:$0xff]   ;;  %v5795_v57 = vld [vmem:[#allocation3 + $0x150] ss:$8 sps:$4 sm:$0xff]  }
 0x436   : > { %3761 = vmatpush1.bf16.msra.mxu1 %v5783_v42  ;;  %3569 = vmatprep.subr.bf16.mxu0 %v5784_v21  ;;  %v5796_v23 = vld [vmem:[#allocation3 + $0x44] ss:$8 sps:$4 sm:$0xff]   ;;  %v5800_v26 = vld [vmem:[#allocation3 + $0x40] ss:$8 sps:$4 sm:$0xff]   ;;  %v5802_v51 = vld [vmem:[#allocation3 + $0x34] ss:$8 sps:$4 sm:$0xff]  }
 0x437   : > { %3762 = vmatprep.subr.bf16.mxu1 %v5786_v25  ;;  %v5798_v6 = vld [vmem:[#allocation3 + $0x144] ss:$8 sps:$4 sm:$0xff]   ;;  %v5801_v3 = vld [vmem:[#allocation3 + $0x140] ss:$8 sps:$4 sm:$0xff]   ;;  %v5804_v44 = vld [vmem:[#allocation3 + $0x134] ss:$8 sps:$4 sm:$0xff]  }
 0x438   : > { %v5806_v47 = vld [vmem:[#allocation3 + $0x30] ss:$8 sps:$4 sm:$0xff]   ;;  %v5808_v43 = vld [vmem:[#allocation3 + $0x24] ss:$8 sps:$4 sm:$0xff]   ;;  %v5812_v63 = vld [vmem:[#allocation3 + $0x20] ss:$8 sps:$4 sm:$0xff]  }
 0x439   : > { %3570 = vmatpush1.bf16.msra.mxu0 %v5788_v46  ;;  %v5807_v50 = vld [vmem:[#allocation3 + $0x130] ss:$8 sps:$4 sm:$0xff]   ;;  %v5810_v30 = vld [vmem:[#allocation3 + $0x124] ss:$8 sps:$4 sm:$0xff]   ;;  %v5813_v37 = vld [vmem:[#allocation3 + $0x120] ss:$8 sps:$4 sm:$0xff]  }
 0x43a   : > { %3763 = vmatpush1.bf16.msra.mxu1 %v5789_v38  ;;  %3571 = vmatprep.subr.bf16.mxu0 %v5790_v7  ;;  %v5814_v31 = vld [vmem:[#allocation3 + $0x14] ss:$8 sps:$4 sm:$0xff]   ;;  %v5818_v4 = vld [vmem:[#allocation3 + $0x10] ss:$8 sps:$4 sm:$0xff]   ;;  %v5820_v28 = vld [vmem:[#allocation3 + $0x4] ss:$8 sps:$4 sm:$0xff]  }
 0x43b   : > { %3764 = vmatprep.subr.bf16.mxu1 %v5792_v8  ;;  %v5816_v27 = vld [vmem:[#allocation3 + $0x114] ss:$8 sps:$4 sm:$0xff]   ;;  %v5819_v52 = vld [vmem:[#allocation3 + $0x110] ss:$8 sps:$4 sm:$0xff]   ;;  %v5822_v5 = vld [vmem:[#allocation3 + $0x104] ss:$8 sps:$4 sm:$0xff]  }
 0x43c   : > { %v5824_v22 = vld [vmem:[#allocation3] ss:$8 sps:$4 sm:$0xff]   ;;  %v5826_v58 = vld [vmem:[#allocation3 + $0xf4] ss:$8 sps:$4 sm:$0xff]   ;;  %v5830_v24 = vld [vmem:[#allocation3 + $0xf0] ss:$8 sps:$4 sm:$0xff]  }
 0x43d   : > { %3572 = vmatpush1.bf16.msra.mxu0 %v5794_v45  ;;  %v5825_v40 = vld [vmem:[#allocation3 + $0x100] ss:$8 sps:$4 sm:$0xff]   ;;  %v5828_v1 = vld [vmem:[#allocation3 + $0x1f4] ss:$8 sps:$4 sm:$0xff]   ;;  %v5831_v48 = vld [vmem:[#allocation3 + $0x1f0] ss:$8 sps:$4 sm:$0xff]  }
 0x43e   : > { %3765 = vmatpush1.bf16.msra.mxu1 %v5795_v57  ;;  %3573 = vmatprep.subr.bf16.mxu0 %v5796_v23  ;;  %v5832_v32 = vld [vmem:[#allocation3 + $0xe4] ss:$8 sps:$4 sm:$0xff]   ;;  %v5836_v54 = vld [vmem:[#allocation3 + $0xe0] ss:$8 sps:$4 sm:$0xff]   ;;  %v5838_v60 = vld [vmem:[#allocation3 + $0xd4] ss:$8 sps:$4 sm:$0xff]   ;;  %v4726_v23 = vcombine.low %v6325_v9, %v6331_v11  ;;  %v4732_v9 = vcombine.low %v6340_v14, %v6346_v16  ;;  %v4737_v11 = vcombine.high %v6352_v18, %v6358_v20 }
 0x43f   : > { %3766 = vmatprep.subr.bf16.mxu1 %v5798_v6  ;;  %v5834_v61 = vld [vmem:[#allocation3 + $0x1e4] ss:$8 sps:$4 sm:$0xff]   ;;  %v5837_v53 = vld [vmem:[#allocation3 + $0x1e0] ss:$8 sps:$4 sm:$0xff]   ;;  %v5840_v62 = vld [vmem:[#allocation3 + $0x1d4] ss:$8 sps:$4 sm:$0xff]   ;;  %v4728_v6 = vcombine.low %v6328_v10, %v6334_v12  ;;  %v4735_v10 = vcombine.high %v6349_v17, %v6355_v19  ;;  %v4734_v12 = vcombine.low %v6349_v17, %v6355_v19 }
 0x440   : > { %v5842_v2 = vld [vmem:[#allocation3 + $0xd0] ss:$8 sps:$4 sm:$0xff]   ;;  %v5844_v59 = vld [vmem:[#allocation3 + $0xc4] ss:$8 sps:$4 sm:$0xff]   ;;  %v5848_v0 = vld [vmem:[#allocation3 + $0xc0] ss:$8 sps:$4 sm:$0xff]  }
 0x441   : > { %3574 = vmatpush1.bf16.msra.mxu0 %v5800_v26  ;;  %v5843_v39 = vld [vmem:[#allocation3 + $0x1d0] ss:$8 sps:$4 sm:$0xff]   ;;  %v5846_v56 = vld [vmem:[#allocation3 + $0x1c4] ss:$8 sps:$4 sm:$0xff]   ;;  %v5849_v35 = vld [vmem:[#allocation3 + $0x1c0] ss:$8 sps:$4 sm:$0xff]   ;;  %v4731_v26 = vcombine.high %v6337_v13, %v6343_v15 }
 0x442   : > { %3767 = vmatpush1.bf16.msra.mxu1 %v5801_v3  ;;  %3575 = vmatprep.subr.bf16.mxu0 %v5802_v51  ;;  %v5850_v55 = vld [vmem:[#allocation3 + $0xb4] ss:$8 sps:$4 sm:$0xff]   ;;  %v5854_v34 = vld [vmem:[#allocation3 + $0xb0] ss:$8 sps:$4 sm:$0xff]   ;;  %v5856_v33 = vld [vmem:[#allocation3 + $0xa4] ss:$8 sps:$4 sm:$0xff]   ;;  %v4733_v3 = vcombine.high %v6340_v14, %v6346_v16  ;;  %v4730_v51 = vcombine.low %v6337_v13, %v6343_v15 }
 0x443   : > { %3768 = vmatprep.subr.bf16.mxu1 %v5804_v44  ;;  %v5852_v36 = vld [vmem:[#allocation3 + $0x1b4] ss:$8 sps:$4 sm:$0xff]   ;;  %v5855_v41 = vld [vmem:[#allocation3 + $0x1b0] ss:$8 sps:$4 sm:$0xff]   ;;  %v5858_v29 = vld [vmem:[#allocation3 + $0x1a4] ss:$8 sps:$4 sm:$0xff]   ;;  %v4736_v44 = vcombine.low %v6352_v18, %v6358_v20 }
 0x444   : > { %v5860_v49 = vld [vmem:[#allocation3 + $0xa0] ss:$8 sps:$4 sm:$0xff]   ;;  %v5862_v21 = vld [vmem:[#allocation3 + $0x94] ss:$8 sps:$4 sm:$0xff]   ;;  %v5866_v46 = vld [vmem:[#allocation3 + $0x90] ss:$8 sps:$4 sm:$0xff]  }
 0x445   : > { %3576 = vmatpush1.bf16.msra.mxu0 %v5806_v47  ;;  %v5861_v42 = vld [vmem:[#allocation3 + $0x1a0] ss:$8 sps:$4 sm:$0xff]   ;;  %v5864_v25 = vld [vmem:[#allocation3 + $0x194] ss:$8 sps:$4 sm:$0xff]   ;;  %v5867_v38 = vld [vmem:[#allocation3 + $0x190] ss:$8 sps:$4 sm:$0xff]  }
 0x446   : > { %3769 = vmatpush1.bf16.msra.mxu1 %v5807_v50  ;;  %3577 = vmatprep.subr.bf16.mxu0 %v5808_v43  ;;  %v5868_v7 = vld [vmem:[#allocation3 + $0x84] ss:$8 sps:$4 sm:$0xff]   ;;  %v5872_v45 = vld [vmem:[#allocation3 + $0x80] ss:$8 sps:$4 sm:$0xff]   ;;  %v7741_v15 = vld [vmem:[#allocation23_spill] sm:$0xff]  ;;  %s4026_s30 = sld [smem:[#allocation6]] }
 0x447   : > { %3770 = vmatprep.subr.bf16.mxu1 %v5810_v30  ;;  %v5870_v8 = vld [vmem:[#allocation3 + $0x184] ss:$8 sps:$4 sm:$0xff]   ;;  %v5873_v57 = vld [vmem:[#allocation3 + $0x180] ss:$8 sps:$4 sm:$0xff]   ;;  %v7742_v14 = vld [vmem:[#allocation26_spill] sm:$0xff]  ;;  %s4032_s20 = sld [smem:[#allocation7]] }
 0x448   : > { %v7740_v13 = vld [vmem:[#allocation25_spill] sm:$0xff]  ;;  %v7743_v16 = vld [vmem:[#allocation24_spill] sm:$0xff]  ;;  %v7745_v19 = vld [vmem:[#allocation27_spill] sm:$0xff]  ;;  %s7010_s24 = sld [smem:[#allocation6 + $0x1]] }
 0x449   : > { %3578 = vmatpush1.bf16.msra.mxu0 %v5812_v63  ;;  %v4739_v47 = vcombine.high %v7741_v15, %v7740_v13  ;;  %v4741_v50 = vcombine.high %v7743_v16, %v7742_v14  ;;  %v4738_v43 = vcombine.low %v7741_v15, %v7740_v13  ;;  %v4740_v30 = vcombine.low %v7743_v16, %v7742_v14  ;;  %v7744_v17 = vld [vmem:[#allocation29_spill] sm:$0xff]  ;;  %v7746_v18 = vld [vmem:[#allocation30_spill] sm:$0xff]  ;;  %v7747_v20 = vld [vmem:[#allocation28_spill] sm:$0xff]  ;;  %s7019_s25 = sld [smem:[#allocation7 + $0x1]] }
 0x44a   : > { %3771 = vmatpush1.bf16.msra.mxu1 %v5813_v37  ;;  %3579 = vmatprep.subr.bf16.mxu0 %v5814_v31  ;;  %v4743_v63 = vcombine.high %v7745_v19, %v7744_v17  ;;  %v4745_v37 = vcombine.high %v7747_v20, %v7746_v18  ;;  %v4742_v31 = vcombine.low %v7745_v19, %v7744_v17  ;;  %v7772_v13 = vld [vmem:[#allocation57_spill] sm:$0xff]  ;;  %v7773_v15 = vld [vmem:[#allocation55_spill] sm:$0xff]  ;;  %v7774_v14 = vld [vmem:[#allocation58_spill] sm:$0xff]  ;;  %s7029_s16 = sld [smem:[#allocation6 + $0x2]] }
 0x44b   : > { %3772 = vmatprep.subr.bf16.mxu1 %v5816_v27  ;;  %v4744_v27 = vcombine.low %v7747_v20, %v7746_v18  ;;  %v7775_v16 = vld [vmem:[#allocation56_spill] sm:$0xff]  ;;  %v7776_v17 = vld [vmem:[#allocation61_spill] sm:$0xff]  ;;  %v7777_v19 = vld [vmem:[#allocation59_spill] sm:$0xff]  ;;  %s7038_s18 = sld [smem:[#allocation7 + $0x2]] }
 0x44c   : > { %v7778_v18 = vld [vmem:[#allocation62_spill] sm:$0xff]  ;;  %v7779_v20 = vld [vmem:[#allocation60_spill] sm:$0xff]  ;;  %s7069_s28 = sld [smem:[#allocation7 + $0x3]] }
 0x44d   : > { %3580 = vmatpush1.bf16.msra.mxu0 %v5818_v4  ;;  %v7748_v4 = vld [vmem:[#allocation33_spill] sm:$0xff]  ;;  %s7091_s11 = sld [smem:[#allocation6 + $0x4]] }
 0x44e   : > { %3773 = vmatpush1.bf16.msra.mxu1 %v5819_v52  ;;  %3581 = vmatprep.subr.bf16.mxu0 %v5820_v28  ;;  %v7749_v52 = vld [vmem:[#allocation31_spill] sm:$0xff]  ;;  %s7104_s12 = sld [smem:[#allocation7 + $0x4]] }
 0x44f   : > { %3774 = vmatprep.subr.bf16.mxu1 %v5822_v5  ;;  %v4747_v28 = vcombine.high %v7749_v52, %v7748_v4  ;;  %v7750_v5 = vld [vmem:[#allocation34_spill] sm:$0xff]  ;;  %s7131_s14 = sld [smem:[#allocation6 + $0x5]] }
 0x450   : > { %s7144_s15 = sld [smem:[#allocation7 + $0x5]] }
 0x451   : > { %3582 = vmatpush1.bf16.msra.mxu0 %v5824_v22  ;;  %v7751_v22 = vld [vmem:[#allocation32_spill] sm:$0xff]  ;;  %s7171_s19 = sld [smem:[#allocation6 + $0x6]] }
 0x452   : > { %3775 = vmatpush1.bf16.msra.mxu1 %v5825_v40  ;;  %3583 = vmatprep.subr.bf16.mxu0 %v5826_v58  ;;  %v4749_v40 = vcombine.high %v7751_v22, %v7750_v5  ;;  %v4746_v58 = vcombine.low %v7749_v52, %v7748_v4  ;;  %v7780_v4 = vld [vmem:[#allocation65_spill] sm:$0xff]  ;;  %v7781_v52 = vld [vmem:[#allocation63_spill] sm:$0xff]  ;;  %s7184_s26 = sld [smem:[#allocation7 + $0x6]] }
 0x453   : > { %3776 = vmatprep.subr.bf16.mxu1 %v5828_v1  ;;  %v4748_v1 = vcombine.low %v7751_v22, %v7750_v5  ;;  %v7782_v5 = vld [vmem:[#allocation66_spill] sm:$0xff]  ;;  %v7783_v22 = vld [vmem:[#allocation64_spill] sm:$0xff]  ;;  %s7211_s17 = sld [smem:[#allocation6 + $0x7]] }
 0x455   : > { %3584 = vmatpush2.bf16.msra.mxu0 %v5830_v24  ;;  %v7752_v24 = vld [vmem:[#allocation37_spill] sm:$0xff] }
 0x456   : > { %3777 = vmatpush2.bf16.msra.mxu1 %v5831_v48  ;;  %3585 = vmatprep.subr.bf16.mxu0 %v5832_v32  ;;  %v7753_v48 = vld [vmem:[#allocation35_spill] sm:$0xff] }
 0x457   : > { %3778 = vmatprep.subr.bf16.mxu1 %v5834_v61  ;;  %v4751_v32 = vcombine.high %v7753_v48, %v7752_v24  ;;  %v7754_v61 = vld [vmem:[#allocation38_spill] sm:$0xff] }
 0x459   : > { %3586 = vmatpush2.bf16.msra.mxu0 %v5836_v54  ;;  %v7755_v54 = vld [vmem:[#allocation36_spill] sm:$0xff] }
 0x45a   : > { %3779 = vmatpush2.bf16.msra.mxu1 %v5837_v53  ;;  %3587 = vmatprep.subr.bf16.mxu0 %v5838_v60  ;;  %v4753_v53 = vcombine.high %v7755_v54, %v7754_v61  ;;  %v4750_v60 = vcombine.low %v7753_v48, %v7752_v24  ;;  %v7784_v24 = vld [vmem:[#allocation69_spill] sm:$0xff]  ;;  %v7785_v48 = vld [vmem:[#allocation67_spill] sm:$0xff] }
 0x45b   : > { %3780 = vmatprep.subr.bf16.mxu1 %v5840_v62  ;;  %v4752_v62 = vcombine.low %v7755_v54, %v7754_v61  ;;  %v7786_v61 = vld [vmem:[#allocation70_spill] sm:$0xff]  ;;  %v7787_v54 = vld [vmem:[#allocation68_spill] sm:$0xff] }
 0x45d   : > { %3588 = vmatpush2.bf16.msra.mxu0 %v5842_v2  ;;  %v7756_v2 = vld [vmem:[#allocation41_spill] sm:$0xff] }
 0x45e   : > { %3781 = vmatpush2.bf16.msra.mxu1 %v5843_v39  ;;  %3589 = vmatprep.subr.bf16.mxu0 %v5844_v59  ;;  %v7757_v39 = vld [vmem:[#allocation39_spill] sm:$0xff] }
 0x45f   : > { %3782 = vmatprep.subr.bf16.mxu1 %v5846_v56  ;;  %v4755_v59 = vcombine.high %v7757_v39, %v7756_v2  ;;  %v7758_v56 = vld [vmem:[#allocation42_spill] sm:$0xff] }
 0x461   : > { %3590 = vmatpush2.bf16.msra.mxu0 %v5848_v0  ;;  %v7759_v0 = vld [vmem:[#allocation40_spill] sm:$0xff] }
 0x462   : > { %3783 = vmatpush2.bf16.msra.mxu1 %v5849_v35  ;;  %3591 = vmatprep.subr.bf16.mxu0 %v5850_v55  ;;  %v4757_v35 = vcombine.high %v7759_v0, %v7758_v56  ;;  %v4754_v55 = vcombine.low %v7757_v39, %v7756_v2  ;;  %v7788_v2 = vld [vmem:[#allocation73_spill] sm:$0xff]  ;;  %v7789_v39 = vld [vmem:[#allocation71_spill] sm:$0xff] }
 0x463   : > { %3784 = vmatprep.subr.bf16.mxu1 %v5852_v36  ;;  %v4756_v36 = vcombine.low %v7759_v0, %v7758_v56  ;;  %v7790_v56 = vld [vmem:[#allocation74_spill] sm:$0xff]  ;;  %v7791_v0 = vld [vmem:[#allocation72_spill] sm:$0xff] }
 0x465   : > { %3592 = vmatpush2.bf16.msra.mxu0 %v5854_v34  ;;  %v7760_v34 = vld [vmem:[#allocation45_spill] sm:$0xff] }
 0x466   : > { %3785 = vmatpush2.bf16.msra.mxu1 %v5855_v41  ;;  %3593 = vmatprep.subr.bf16.mxu0 %v5856_v33  ;;  %v7761_v41 = vld [vmem:[#allocation43_spill] sm:$0xff] }
 0x467   : > { %3786 = vmatprep.subr.bf16.mxu1 %v5858_v29  ;;  %v4759_v33 = vcombine.high %v7761_v41, %v7760_v34  ;;  %v7762_v29 = vld [vmem:[#allocation46_spill] sm:$0xff] }
 0x469   : > { %3594 = vmatpush2.bf16.msra.mxu0 %v5860_v49  ;;  %v7763_v49 = vld [vmem:[#allocation44_spill] sm:$0xff] }
 0x46a   : > { %3787 = vmatpush2.bf16.msra.mxu1 %v5861_v42  ;;  %3595 = vmatprep.subr.bf16.mxu0 %v5862_v21  ;;  %v4761_v42 = vcombine.high %v7763_v49, %v7762_v29  ;;  %v4758_v21 = vcombine.low %v7761_v41, %v7760_v34  ;;  %v2917_v34 = vlaneseq }
 0x46b   : > { %3788 = vmatprep.subr.bf16.mxu1 %v5864_v25  ;;  %v4760_v25 = vcombine.low %v7763_v49, %v7762_v29  ;;  %v2915_v29 = vld [vmem:[%s7554_s7] sm:$0x3] }
 0x46c   : > { %v6974_v41 = vshrl.u32 %v2917_v34, 7 }
 0x46d   : > { %3596 = vmatpush2.bf16.msra.mxu0 %v5866_v46  ;;  %v7764_v46 = vld [vmem:[#allocation49_spill] sm:$0xff] }
 0x46e   : > { %3789 = vmatpush2.bf16.msra.mxu1 %v5867_v38  ;;  %3597 = vmatprep.subr.bf16.mxu0 %v5868_v7  ;;  %v7765_v38 = vld [vmem:[#allocation47_spill] sm:$0xff]  ;;  %v2923_v49 = vsub.s32 1, %v6974_v41  ;;  %vm4025_vm0 = vcmp.eq.s32.totalorder %v6974_v41, 0  ;;  %vm4040_vm4 = vcmp.eq.s32.totalorder %v6974_v41, 1 }
 0x46f   : > { %3790 = vmatprep.subr.bf16.mxu1 %v5870_v8  ;;  %v4763_v7 = vcombine.high %v7765_v38, %v7764_v46  ;;  %v7766_v8 = vld [vmem:[#allocation50_spill] sm:$0xff] }
 0x471   : > { %3598 = vmatpush2.bf16.msra.mxu0 %v5872_v45  ;;  %v7767_v45 = vld [vmem:[#allocation48_spill] sm:$0xff] }
 0x472   : > { %3791 = vmatpush2.bf16.msra.mxu1 %v5873_v57  ;;  %v4765_v57 = vcombine.high %v7767_v45, %v7766_v8 }
 0x474   : > { %3600 = vmatmul.mubr.bf16.vlgmr.msra.gmra.mxu0 %v4726_v23  ;;  %v4762_v23 = vcombine.low %v7765_v38, %v7764_v46 }
 0x475   : > { %3793 = vmatmul.mubr.bf16.vlgmr.msra.gmra.mxu1 %v4728_v6  ;;  %3609 = vmatprep.mubr.bf16.mxu0 %v4731_v26  ;;  %v4764_v6 = vcombine.low %v7767_v45, %v7766_v8  ;;  %v7768_v26 = vld [vmem:[#allocation53_spill] sm:$0xff] }
 0x476   : > { %3802 = vmatprep.mubr.bf16.mxu1 %v4733_v3  ;;  %v7769_v3 = vld [vmem:[#allocation51_spill] sm:$0xff] }
 0x47c   : > { %3610 = vmatmul.mubr.bf16.gmra.mxu0 %v4730_v51  ;;  %v4767_v51 = vcombine.high %v7769_v3, %v7768_v26 }
 0x47d   : > { %3803 = vmatmul.mubr.bf16.gmra.mxu1 %v4732_v9  ;;  %3619 = vmatprep.mubr.bf16.mxu0 %v4735_v10  ;;  %v7770_v9 = vld [vmem:[#allocation54_spill] sm:$0xff]  ;;  %v7771_v10 = vld [vmem:[#allocation52_spill] sm:$0xff] }
 0x47e   : > { %3812 = vmatprep.mubr.bf16.mxu1 %v4737_v11  ;;  %v4769_v11 = vcombine.high %v7771_v10, %v7770_v9 }
 0x484   : > { %3620 = vmatmul.mubr.bf16.gmra.mxu0 %v4734_v12  ;;  %v4766_v12 = vcombine.low %v7769_v3, %v7768_v26 }
 0x485   : > { %3813 = vmatmul.mubr.bf16.gmra.mxu1 %v4736_v44  ;;  %3629 = vmatprep.mubr.bf16.mxu0 %v4739_v47  ;;  %v4768_v44 = vcombine.low %v7771_v10, %v7770_v9  ;;  %v4771_v47 = vcombine.high %v7773_v15, %v7772_v13 }
 0x486   : > { %3822 = vmatprep.mubr.bf16.mxu1 %v4741_v50  ;;  %v4773_v50 = vcombine.high %v7775_v16, %v7774_v14 }
 0x48c   : > { %3630 = vmatmul.mubr.bf16.gmra.mxu0 %v4738_v43  ;;  %v4770_v43 = vcombine.low %v7773_v15, %v7772_v13 }
 0x48d   : > { %3823 = vmatmul.mubr.bf16.gmra.mxu1 %v4740_v30  ;;  %3639 = vmatprep.mubr.bf16.mxu0 %v4743_v63  ;;  %v4772_v30 = vcombine.low %v7775_v16, %v7774_v14  ;;  %v4775_v63 = vcombine.high %v7777_v19, %v7776_v17 }
 0x48e   : > { %3832 = vmatprep.mubr.bf16.mxu1 %v4745_v37  ;;  %v4777_v37 = vcombine.high %v7779_v20, %v7778_v18 }
 0x494   : > { %3640 = vmatmul.mubr.bf16.gmra.mxu0 %v4742_v31  ;;  %v4774_v31 = vcombine.low %v7777_v19, %v7776_v17 }
 0x495   : > { %3833 = vmatmul.mubr.bf16.gmra.mxu1 %v4744_v27  ;;  %3649 = vmatprep.mubr.bf16.mxu0 %v4747_v28  ;;  %v4776_v27 = vcombine.low %v7779_v20, %v7778_v18  ;;  %v4779_v28 = vcombine.high %v7781_v52, %v7780_v4 }
 0x496   : > { %3842 = vmatprep.mubr.bf16.mxu1 %v4749_v40  ;;  %v4781_v40 = vcombine.high %v7783_v22, %v7782_v5 }
 0x49c   : > { %3650 = vmatmul.mubr.bf16.gmra.mxu0 %v4746_v58  ;;  %v4778_v58 = vcombine.low %v7781_v52, %v7780_v4 }
 0x49d   : > { %3843 = vmatmul.mubr.bf16.gmra.mxu1 %v4748_v1  ;;  %3659 = vmatprep.mubr.bf16.mxu0 %v4751_v32  ;;  %v4780_v1 = vcombine.low %v7783_v22, %v7782_v5  ;;  %v4783_v32 = vcombine.high %v7785_v48, %v7784_v24 }
 0x49e   : > { %3852 = vmatprep.mubr.bf16.mxu1 %v4753_v53  ;;  %v4785_v53 = vcombine.high %v7787_v54, %v7786_v61 }
 0x4a4   : > { %3660 = vmatmul.mubr.bf16.gmra.mxu0 %v4750_v60  ;;  %v4782_v60 = vcombine.low %v7785_v48, %v7784_v24 }
 0x4a5   : > { %3853 = vmatmul.mubr.bf16.gmra.mxu1 %v4752_v62  ;;  %3669 = vmatprep.mubr.bf16.mxu0 %v4755_v59  ;;  %v4784_v62 = vcombine.low %v7787_v54, %v7786_v61  ;;  %v4787_v59 = vcombine.high %v7789_v39, %v7788_v2 }
 0x4a6   : > { %3862 = vmatprep.mubr.bf16.mxu1 %v4757_v35  ;;  %v4789_v35 = vcombine.high %v7791_v0, %v7790_v56 }
 0x4ac   : > { %3670 = vmatmul.mubr.bf16.gmra.mxu0 %v4754_v55  ;;  %v4786_v55 = vcombine.low %v7789_v39, %v7788_v2 }
 0x4ad   : > { %3863 = vmatmul.mubr.bf16.gmra.mxu1 %v4756_v36  ;;  %3679 = vmatprep.mubr.bf16.mxu0 %v4759_v33  ;;  %v4788_v36 = vcombine.low %v7791_v0, %v7790_v56  ;;  %v2919_v33 = vsub.s32 0, %v6974_v41 }
 0x4ae   : > { %3872 = vmatprep.mubr.bf16.mxu1 %v4761_v42 }
 0x4af   : > { %v6981_v42 = vrot.slane %v2915_v29, %v2919_v33 }
 0x4b4   : > { %3680 = vmatmul.mubr.bf16.gmra.mxu0 %v4758_v21  ;;  %v6983_v21 = vrot.slane %v2915_v29, %v2923_v49 }
 0x4b5   : > { %3873 = vmatmul.mubr.bf16.gmra.mxu1 %v4760_v25  ;;  %3689 = vmatprep.mubr.bf16.mxu0 %v4763_v7 }
 0x4b6   : > { %3882 = vmatprep.mubr.bf16.mxu1 %v4765_v57 }
 0x4bc   : > { %3690 = vmatmul.mubr.bf16.gmra.mxu0 %v4762_v23 }
 0x4bd   : > { %3883 = vmatmul.mubr.bf16.gmra.mxu1 %v4764_v6  ;;  %3699 = vmatprep.mubr.bf16.mxu0 %v4767_v51 }
 0x4be   : > { %3892 = vmatprep.mubr.bf16.mxu1 %v4769_v11 }
 0x4c4   : > { %3700 = vmatmul.mubr.bf16.gmra.mxu0 %v4766_v12 }
 0x4c5   : > { %3893 = vmatmul.mubr.bf16.gmra.mxu1 %v4768_v44  ;;  %3709 = vmatprep.mubr.bf16.mxu0 %v4771_v47 }
 0x4c6   : > { %3902 = vmatprep.mubr.bf16.mxu1 %v4773_v50 }
 0x4cc   : > { %3710 = vmatmul.mubr.bf16.gmra.mxu0 %v4770_v43 }
 0x4cd   : > { %3903 = vmatmul.mubr.bf16.gmra.mxu1 %v4772_v30  ;;  %3719 = vmatprep.mubr.bf16.mxu0 %v4775_v63 }
 0x4ce   : > { %3912 = vmatprep.mubr.bf16.mxu1 %v4777_v37 }
 0x4d4   : > { %3720 = vmatmul.mubr.bf16.gmra.mxu0 %v4774_v31 }
 0x4d5   : > { %3913 = vmatmul.mubr.bf16.gmra.mxu1 %v4776_v27  ;;  %3729 = vmatprep.mubr.bf16.mxu0 %v4779_v28 }
 0x4d6   : > { %3922 = vmatprep.mubr.bf16.mxu1 %v4781_v40 }
 0x4dc   : > { %3730 = vmatmul.mubr.bf16.gmra.mxu0 %v4778_v58 }
 0x4dd   : > { %3923 = vmatmul.mubr.bf16.gmra.mxu1 %v4780_v1  ;;  %3739 = vmatprep.mubr.bf16.mxu0 %v4783_v32 }
 0x4de   : > { %3932 = vmatprep.mubr.bf16.mxu1 %v4785_v53 }
 0x4e4   : > { %3740 = vmatmul.mubr.bf16.gmra.mxu0 %v4782_v60 }
 0x4e5   : > { %3933 = vmatmul.mubr.bf16.gmra.mxu1 %v4784_v62  ;;  %3749 = vmatprep.mubr.bf16.mxu0 %v4787_v59  ;;  %v4018_v59 = vand.u32 127, %v2917_v34  ;;  %v4027_v34 = vstv %s4026_s30  ;;  %s7224_s30 = sld [smem:[#allocation7 + $0x7]] }
 0x4e6   : > { %3942 = vmatprep.mubr.bf16.mxu1 %v4789_v35 }
 0x4ec   : > { %3750 = vmatmul.mubr.bf16.gmra.mxu0 %v4786_v55  ;;  %v4019_v55 = vadd.s32 128, %v4018_v59 }
 0x4ed   : > { %3943 = vmatmul.mubr.bf16.gmra.mxu1 %v4788_v36  ;;  %v4020_v36 = vstv %s6319_s27  ;;  %s7056_s27 = sld [smem:[#allocation6 + $0x3]] }
 0x4ee   : > { %v7025_v49 = vadd.s32 %v4020_v36, %v4018_v59 }
 0x4f0   : > { %vm4028_vm1 = vcmp.ge.s32.totalorder %v7025_v49, %v4027_v34 }
 0x4f1   : > { %vm4030_vm3 = vmand %vm4025_vm0, %vm4028_vm1 }
 0x534   : > { %v3601_v25 = vpop.f32.mrf.mxu0 }
 0x535   : > { %v3794_v46 = vpop.f32.mrf.mxu1  ;;  %v3602_v38 = vadd.f32 %v3601_v25, %v6981_v42  ;;  %v7027_v25 = vadd.s32 %v4020_v36, %v4019_v55 }
 0x536   : > { %v3603_v7 = vpop.f32.mrf.mxu0 }
 0x537   : > { %v3796_v8 = vpop.f32.mrf.mxu1  ;;  %v3795_v45 = vadd.f32 %v3794_v46, %v3602_v38  ;;  %v3604_v57 = vadd.f32 %v3603_v7, %v6983_v21  ;;  %vm4029_vm2 = vcmp.ge.s32.totalorder %v7027_v25, %v4027_v34  ;;  %v4033_v7 = vstv %s4032_s20 }
 0x538   : > { %v3605_v23 = vpop.f32.mrf.mxu0  ;;  %vm7045_vm5 = vmand %vm4025_vm0, %vm4029_vm2  ;;  %vm4034_vm6 = vcmp.lt.s32.totalorder %v7025_v49, %v4033_v7  ;;  %vm7051_vm7 = vcmp.lt.s32.totalorder %v7027_v25, %v4033_v7  ;;  %vm4055_vm0 = vcmp.eq.s32.totalorder %v6974_v41, 2  ;;  %v4138_v7 = vstv %s7224_s30 }
 0x539   : > { %v3798_v6 = vpop.f32.mrf.mxu1  ;;  %v3797_v26 = vadd.f32 %v3796_v8, %v3604_v57  ;;  %v3606_v3 = vadd.f32 %v3605_v23, %v6981_v42  ;;  %v3953_v13 = vmax.f32 %v3795_v45, 0.0  ;;  %vm4036_vm8 = vmand %vm4030_vm3, %vm4034_vm6  ;;  %v4102_v57 = vstv %s7131_s14 }
 0x53a   : > { %v3607_v51 = vpop.f32.mrf.mxu0  ;;  %vm4037_vm9 = vmand %vm7045_vm5, %vm7051_vm7  ;;  %vm4070_vm5 = vcmp.eq.s32.totalorder %v6974_v41, 3 }
 0x53b   : > { %v3800_v9 = vpop.f32.mrf.mxu1  ;;  %v3799_v10 = vadd.f32 %v3798_v6, %v3606_v3  ;;  %v3608_v11 = vadd.f32 %v3607_v51, %v6983_v21  ;;  %v3954_v16 = vmax.f32 %v3797_v26, 0.0  ;;  %v4042_v6 = vstv %s7010_s24 }
 0x53c   : > { %v3611_v12 = vpop.f32.mrf.mxu0  ;;  %v6125_v51 = vmov 0.0   ;;  %vm4043_vm10 = vcmp.ge.s32.totalorder %v7025_v49, %v4042_v6  ;;  %vm4044_vm11 = vcmp.ge.s32.totalorder %v7027_v25, %v4042_v6 }
 0x53d   : > { %v3804_v44 = vpop.f32.mrf.mxu1  ;;  %v3955_v15 = vmax.f32 %v3799_v10, 0.0  ;;  %v3801_v47 = vadd.f32 %v3800_v9, %v3608_v11  ;;  %v3612_v14 = vadd.f32 %v3611_v12, %v6981_v42  ;;  %v4038_v9 = vsel %vm4036_vm8, 1.0, %v6125_v51  ;;  %vm4045_vm12 = vmand %vm4040_vm4, %vm4043_vm10 }
 0x53e   : > { %v3613_v50 = vpop.f32.mrf.mxu0  ;;  %v4048_v10 = vstv %s7019_s25  ;;  %vm7079_vm13 = vmand %vm4040_vm4, %vm4044_vm11 }
 0x53f   : > { %v3806_v43 = vpop.f32.mrf.mxu1  ;;  %v6990_v30 = vpack.c.bf16 %v3955_v15, %v3953_v13  ;;  %v3956_v17 = vmax.f32 %v3801_v47, 0.0  ;;  %v3805_v19 = vadd.f32 %v3804_v44, %v3612_v14  ;;  %v3614_v63 = vadd.f32 %v3613_v50, %v6983_v21 }
 0x540   : > { %v3615_v18 = vpop.f32.mrf.mxu0  ;;  %vm4049_vm14 = vcmp.lt.s32.totalorder %v7025_v49, %v4048_v10  ;;  %vm7085_vm15 = vcmp.lt.s32.totalorder %v7027_v25, %v4048_v10  ;;  %v4057_v15 = vstv %s7029_s16  ;;  %v4063_v50 = vstv %s7038_s18 }
 0x541   : > { %v3808_v20 = vpop.f32.mrf.mxu1  ;;  %v6993_v37 = vpack.c.bf16 %v3956_v17, %v3954_v16  ;;  %v3807_v31 = vadd.f32 %v3806_v43, %v3614_v63  ;;  %v3616_v27 = vadd.f32 %v3615_v18, %v6981_v42  ;;  %v3957_v58 = vmax.f32 %v3805_v19, 0.0  ;;  %vm4051_vm1 = vmand %vm4045_vm12, %vm4049_vm14 }
 0x542   : > { %v3617_v4 = vpop.f32.mrf.mxu0  ;;  %vm4058_vm2 = vcmp.ge.s32.totalorder %v7025_v49, %v4057_v15  ;;  %vm4052_vm3 = vmand %vm7079_vm13, %vm7085_vm15  ;;  %v4053_v16 = vsel %vm4051_vm1, 1.0, %v4038_v9  ;;  %vm4059_vm4 = vcmp.ge.s32.totalorder %v7027_v25, %v4057_v15  ;;  %v4039_v43 = vsel %vm4037_vm9, 1.0, %v6125_v51 }
 0x543   : > { %v3810_v52 = vpop.f32.mrf.mxu1  ;;  %v3809_v28 = vadd.f32 %v3808_v20, %v3616_v27  ;;  %v3618_v5 = vadd.f32 %v3617_v4, %v6983_v21  ;;  %v3958_v54 = vmax.f32 %v3807_v31, 0.0  ;;  %vm4060_vm6 = vmand %vm4055_vm0, %vm4058_vm2  ;;  %vm4064_vm10 = vcmp.lt.s32.totalorder %v7025_v49, %v4063_v50 }
 0x544   : > { %v3621_v22 = vpop.f32.mrf.mxu0  ;;  %vm7119_vm8 = vmand %vm4055_vm0, %vm4059_vm4  ;;  %vm7125_vm11 = vcmp.lt.s32.totalorder %v7027_v25, %v4063_v50  ;;  %v4072_v20 = vstv %s7056_s27  ;;  %vm4085_vm13 = vcmp.eq.s32.totalorder %v6974_v41, 4  ;;  %v4108_v9 = vstv %s7144_s15 }
 0x545   : > { %v3814_v40 = vpop.f32.mrf.mxu1  ;;  %v3959_v1 = vmax.f32 %v3809_v28, 0.0  ;;  %v3811_v24 = vadd.f32 %v3810_v52, %v3618_v5  ;;  %v3622_v48 = vadd.f32 %v3621_v22, %v6981_v42  ;;  %vm4066_vm7 = vmand %vm4060_vm6, %vm4064_vm10  ;;  %vm4073_vm12 = vcmp.ge.s32.totalorder %v7025_v49, %v4072_v20 }
 0x546   : > { %v6998_v32 = vpop.f32.mrf.mxu0  ;;  %vm4067_vm9 = vmand %vm7119_vm8, %vm7125_vm11  ;;  %v4068_v4 = vsel %vm4066_vm7, 1.0, %v4053_v16  ;;  %vm4074_vm14 = vcmp.ge.s32.totalorder %v7027_v25, %v4072_v20  ;;  %v4078_v52 = vstv %s7069_s28  ;;  %v4054_v28 = vsel %vm4052_vm3, 1.0, %v4039_v43 }
 0x547   : > { %v7000_v61 = vpop.f32.mrf.mxu1  ;;  %v7002_v53 = vpack.c.bf16 %v3959_v1, %v3957_v58  ;;  %v3960_v60 = vmax.f32 %v3811_v24, 0.0  ;;  %v7004_v62 = vadd.f32 %v3814_v40, %v3622_v48  ;;  %vm4075_vm0 = vmand %vm4070_vm5, %vm4073_vm12  ;;  %vm4079_vm2 = vcmp.lt.s32.totalorder %v7025_v49, %v4078_v52 }
 0x548   : > { %v7006_v2 = vpop.f32.mrf.mxu0  ;;  %vm7159_vm1 = vmand %vm4070_vm5, %vm4074_vm14  ;;  %vm7165_vm4 = vcmp.lt.s32.totalorder %v7027_v25, %v4078_v52  ;;  %v4087_v1 = vstv %s7091_s11  ;;  %v4069_v59 = vsel %vm4067_vm9, 1.0, %v4054_v28  ;;  %vm4100_vm8 = vcmp.eq.s32.totalorder %v6974_v41, 5 }
 0x549   : > { %v7008_v39 = vpop.f32.mrf.mxu1  ;;  %v7012_v56 = vpack.c.bf16 %v3960_v60, %v3958_v54  ;;  %vm4081_vm15 = vmand %vm4075_vm0, %vm4079_vm2  ;;  %vm4088_vm3 = vcmp.ge.s32.totalorder %v7025_v49, %v4087_v1  ;;  %vm4089_vm10 = vcmp.ge.s32.totalorder %v7027_v25, %v4087_v1  ;;  %v4093_v60 = vstv %s7104_s12 }
 0x54a   : > { %v7014_v0 = vpop.f32.mrf.mxu0  ;;  %vm4082_vm6 = vmand %vm7159_vm1, %vm7165_vm4  ;;  %v4083_v54 = vsel %vm4081_vm15, 1.0, %v4068_v4  ;;  %vm4094_vm12 = vcmp.lt.s32.totalorder %v7025_v49, %v4093_v60  ;;  %vm7205_vm14 = vcmp.lt.s32.totalorder %v7027_v25, %v4093_v60  ;;  %vm4103_vm0 = vcmp.ge.s32.totalorder %v7025_v49, %v4102_v57 }
 0x54b   : > { %v7016_v35 = vpop.f32.mrf.mxu1  ;;  %vm4090_vm5 = vmand %vm4085_vm13, %vm4088_vm3  ;;  %vm4104_vm2 = vcmp.ge.s32.totalorder %v7027_v25, %v4102_v57  ;;  %v4084_v10 = vsel %vm4082_vm6, 1.0, %v4069_v59  ;;  %vm4109_vm3 = vcmp.lt.s32.totalorder %v7025_v49, %v4108_v9  ;;  %vm4115_vm1 = vcmp.eq.s32.totalorder %v6974_v41, 6 }
 0x54c   : > { %v7021_v33 = vpop.f32.mrf.mxu0  ;;  %vm7199_vm7 = vmand %vm4085_vm13, %vm4089_vm10  ;;  %vm7245_vm10 = vcmp.lt.s32.totalorder %v7027_v25, %v4108_v9  ;;  %v4117_v50 = vstv %s7171_s19  ;;  %v4123_v4 = vstv %s7184_s26  ;;  %v4132_v1 = vstv %s7211_s17 }
 0x54d   : > { %v7023_v29 = vpop.f32.mrf.mxu1  ;;  %vm4096_vm11 = vmand %vm4090_vm5, %vm4094_vm12  ;;  %vm4118_vm6 = vcmp.ge.s32.totalorder %v7025_v49, %v4117_v50  ;;  %vm4119_vm12 = vcmp.ge.s32.totalorder %v7027_v25, %v4117_v50  ;;  %v3628_v57 = vadd.f32 %v7014_v0, %v6983_v21 }
 0x54e   : > { %v7032_v46 = vpop.f32.mrf.mxu0  ;;  %vm4097_vm9 = vmand %vm7199_vm7, %vm7205_vm14  ;;  %v4098_v51 = vsel %vm4096_vm11, 1.0, %v4083_v54  ;;  %vm4124_vm7 = vcmp.lt.s32.totalorder %v7025_v49, %v4123_v4  ;;  %vm7273_vm14 = vcmp.lt.s32.totalorder %v7027_v25, %v4123_v4 }
 0x54f   : > { %v7034_v38 = vpop.f32.mrf.mxu1  ;;  %vm4105_vm13 = vmand %vm4100_vm8, %vm4103_vm0  ;;  %v4099_v18 = vsel %vm4097_vm9, 1.0, %v4084_v10  ;;  %vm4130_vm9 = vcmp.eq.s32.totalorder %v6974_v41, 7  ;;  %v7314_v41 = vadd.f32 %v6998_v32, %v6983_v21  ;;  %v7328_v4 = vadd.f32 %v7016_v35, %v3628_v57 }
 0x550   : > { %v7041_v8 = vpop.f32.mrf.mxu0  ;;  %vm7239_vm15 = vmand %vm4100_vm8, %vm4104_vm2  ;;  %v7332_v32 = vadd.f32 %v7032_v46, %v6983_v21 }
 0x551   : > { %v7043_v45 = vpop.f32.mrf.mxu1  ;;  %vm4111_vm4 = vmand %vm4105_vm13, %vm4109_vm3  ;;  %vm4133_vm13 = vcmp.ge.s32.totalorder %v7025_v49, %v4132_v1 }
 0x552   : > { %v7058_v26 = vpop.f32.mrf.mxu0  ;;  %vm4112_vm5 = vmand %vm7239_vm15, %vm7245_vm10  ;;  %v4113_v20 = vsel %vm4111_vm4, 1.0, %v4098_v51  ;;  %vm4134_vm15 = vcmp.ge.s32.totalorder %v7027_v25, %v4132_v1  ;;  %vm7304_vm4 = vcmp.lt.s32.totalorder %v7027_v25, %v4138_v7 }
 0x553   : > { %v7060_v3 = vpop.f32.mrf.mxu1  ;;  %vm4120_vm8 = vmand %vm4115_vm1, %vm4118_vm6  ;;  %v4114_v54 = vsel %vm4112_vm5, 1.0, %v4099_v18  ;;  %v3638_v9 = vadd.f32 %v7058_v26, %v6983_v21  ;;  %v7318_v26 = vadd.f32 %v7006_v2, %v6981_v42  ;;  %v7336_v2 = vadd.f32 %v7041_v8, %v6981_v42 }
 0x554   : > { %v7073_v11 = vpop.f32.mrf.mxu0  ;;  %vm7267_vm11 = vmand %vm4115_vm1, %vm4119_vm12  ;;  %vm4139_vm1 = vcmp.lt.s32.totalorder %v7025_v49, %v4138_v7 }
 0x555   : > { %v7075_v12 = vpop.f32.mrf.mxu1  ;;  %vm4126_vm0 = vmand %vm4120_vm8, %vm4124_vm7  ;;  %v7340_v58 = vadd.f32 %v7060_v3, %v3638_v9  ;;  %v7347_v46 = vadd.f32 %v7073_v11, %v6981_v42 }
 0x556   : > { %v7094_v47 = vpop.f32.mrf.mxu0  ;;  %vm4127_vm2 = vmand %vm7267_vm11, %vm7273_vm14  ;;  %v4128_v34 = vsel %vm4126_vm0, 1.0, %v4113_v20 }
 0x557   : > { %v7096_v14 = vpop.f32.mrf.mxu1  ;;  %vm7290_vm3 = vmand %vm4130_vm9, %vm4133_vm13  ;;  %v3644_v50 = vadd.f32 %v7094_v47, %v6983_v21  ;;  %v4129_v18 = vsel %vm4127_vm2, 1.0, %v4114_v54 }
 0x558   : > { %v7113_v17 = vpop.f32.mrf.mxu0  ;;  %vm7298_vm10 = vmand %vm4130_vm9, %vm4134_vm15 }
 0x559   : > { %v7115_v19 = vpop.f32.mrf.mxu1  ;;  %vm4141_vm6 = vmand %vm7290_vm3, %vm4139_vm1  ;;  %v7350_v8 = vadd.f32 %v7096_v14, %v3644_v50  ;;  %v3646_v11 = vadd.f32 %v7113_v17, %v6981_v42 }
 0x55a   : > { %v7133_v31 = vpop.f32.mrf.mxu0  ;;  %vm4142_vm5 = vmand %vm7298_vm10, %vm7304_vm4  ;;  %v7325_v47 = vsel %vm4141_vm6, 1.0, %v4128_v34 }
 0x55b   : > { %v7135_v27 = vpop.f32.mrf.mxu1  ;;  %7826 = vst [vmem:[#allocation75_spill] sm:$0xff] %v7325_v47  ;;  %v3648_v1 = vadd.f32 %v7133_v31, %v6983_v21  ;;  %v4144_v34 = vsel %vm4142_vm5, 1.0, %v4129_v18 }
 0x55c   : > { %v7153_v5 = vpop.f32.mrf.mxu0  ;;  %v4148_v16 = vpack.c.bf16 %v4144_v34, %v4144_v34 }
 0x55d   : > { %v7155_v22 = vpop.f32.mrf.mxu1 }
 0x55e   : > { %v7174_v24 = vpop.f32.mrf.mxu0  ;;  %4213 = vmatprep.mubr.bf16.mxu0 %v4148_v16 }
 0x55f   : > { %v7176_v48 = vpop.f32.mrf.mxu1  ;;  %v3654_v50 = vadd.f32 %v7174_v24, %v6983_v21 }
 0x560   : > { %v7193_v55 = vpop.f32.mrf.mxu0 }
 0x561   : > { %v7195_v36 = vpop.f32.mrf.mxu1  ;;  %v3656_v17 = vadd.f32 %v7193_v55, %v6981_v42  ;;  %v3652_v55 = vadd.f32 %v7153_v5, %v6981_v42  ;;  %v7381_v5 = vadd.f32 %v7115_v19, %v3646_v11 }
 0x562   : > { %v7213_v23 = vpop.f32.mrf.mxu0 }
 0x563   : > { %v7215_v6 = vpop.f32.mrf.mxu1  ;;  %v3658_v57 = vadd.f32 %v7213_v23, %v6983_v21  ;;  %v3849_v16 = vadd.f32 %v7195_v36, %v3656_v17 }
 0x564   : > { %v7233_v44 = vpop.f32.mrf.mxu0 }
 0x565   : > { %v7235_v13 = vpop.f32.mrf.mxu1  ;;  %v3662_v23 = vadd.f32 %v7233_v44, %v6981_v42  ;;  %v3975_v11 = vmax.f32 %v3849_v16, 0.0  ;;  %v3817_v16 = vadd.f32 %v7000_v61, %v7314_v41  ;;  %v3964_v61 = vmax.f32 %v7328_v4, 0.0 }
 0x566   : > { %v3663_v43 = vpop.f32.mrf.mxu0 }
 0x567   : > { %v7252_v63 = vpop.f32.mrf.mxu1  ;;  %v3664_v7 = vadd.f32 %v3663_v43, %v6983_v21  ;;  %v7361_v43 = vadd.f32 %v7135_v27, %v3648_v1  ;;  %v3851_v27 = vadd.f32 %v7215_v6, %v3658_v57  ;;  %v3962_v4 = vmax.f32 %v3817_v16, 0.0 }
 0x568   : > { %v3665_v52 = vpop.f32.mrf.mxu0 }
 0x569   : > { %v7265_v28 = vpop.f32.mrf.mxu1  ;;  %v3666_v31 = vadd.f32 %v3665_v52, %v6981_v42 }
 0x56a   : > { %v3667_v60 = vpop.f32.mrf.mxu0 }
 0x56b   : > { %v3860_v59 = vpop.f32.mrf.mxu1  ;;  %v3668_v49 = vadd.f32 %v3667_v60, %v6983_v21  ;;  %v3859_v1 = vadd.f32 %v7265_v28, %v3666_v31 }
 0x56c   : > { %v3671_v10 = vpop.f32.mrf.mxu0 }
 0x56d   : > { %v3864_v15 = vpop.f32.mrf.mxu1  ;;  %v3672_v54 = vadd.f32 %v3671_v10, %v6981_v42  ;;  %v3861_v51 = vadd.f32 %v3860_v59, %v3668_v49 }
 0x56e   : > { %v3673_v25 = vpop.f32.mrf.mxu0 }
 0x56f   : > { %v3866_v20 = vpop.f32.mrf.mxu1  ;;  %v3674_v40 = vadd.f32 %v3673_v25, %v6983_v21  ;;  %v3865_v52 = vadd.f32 %v3864_v15, %v3672_v54  ;;  %v3857_v25 = vadd.f32 %v7252_v63, %v3664_v7  ;;  %v3980_v24 = vmax.f32 %v3861_v51, 0.0 }
 0x570   : > { %v3675_v35 = vpop.f32.mrf.mxu0  ;;  %v3847_v63 = vadd.f32 %v7176_v48, %v3654_v50  ;;  %v3855_v7 = vadd.f32 %v7235_v13, %v3662_v23  ;;  %v3972_v23 = vmax.f32 %v7361_v43, 0.0 }
 0x571   : > { %v3868_v60 = vpop.f32.mrf.mxu1  ;;  %v3676_v3 = vadd.f32 %v3675_v35, %v6981_v42  ;;  %v3867_v0 = vadd.f32 %v3866_v20, %v3674_v40  ;;  %v3978_v28 = vmax.f32 %v3857_v25, 0.0 }
 0x572   : > { %v3677_v9 = vpop.f32.mrf.mxu0  ;;  %v3974_v25 = vmax.f32 %v3847_v63, 0.0  ;;  %v3835_v63 = vadd.f32 %v7075_v12, %v7347_v46 }
 0x573   : > { %v3870_v10 = vpop.f32.mrf.mxu1  ;;  %v3869_v18 = vadd.f32 %v3868_v60, %v3676_v3  ;;  %v3678_v14 = vadd.f32 %v3677_v9, %v6983_v21  ;;  %v3982_v15 = vmax.f32 %v3867_v0, 0.0  ;;  %v3981_v9 = vmax.f32 %v3865_v52, 0.0 }
 0x574   : > { %v3681_v59 = vpop.f32.mrf.mxu0  ;;  %v3976_v0 = vmax.f32 %v3851_v27, 0.0  ;;  %v4162_v48 = vpack.c.bf16 %v3980_v24, %v3978_v28  ;;  %v3845_v52 = vadd.f32 %v7155_v22, %v3652_v55  ;;  %v3827_v55 = vadd.f32 %v7034_v38, %v7332_v32 }
 0x575   : > { %v3874_v49 = vpop.f32.mrf.mxu1  ;;  %v3871_v20 = vadd.f32 %v3870_v10, %v3678_v14  ;;  %v3682_v40 = vadd.f32 %v3681_v59, %v6981_v42  ;;  %v3983_v35 = vmax.f32 %v3869_v18, 0.0  ;;  %v3979_v18 = vmax.f32 %v3859_v1, 0.0 }
 0x576   : > { %v3683_v60 = vpop.f32.mrf.mxu0  ;;  %v4160_v24 = vpack.c.bf16 %v3976_v0, %v3974_v25  ;;  %v3968_v38 = vmax.f32 %v7340_v58, 0.0  ;;  %v3971_v32 = vmax.f32 %v7381_v5, 0.0 }
 0x577   : > { %v3876_v44 = vpop.f32.mrf.mxu1  ;;  %v3984_v54 = vmax.f32 %v3871_v20, 0.0  ;;  %v3875_v34 = vadd.f32 %v3874_v49, %v3682_v40  ;;  %v3684_v3 = vadd.f32 %v3683_v60, %v6983_v21  ;;  %v4163_v14 = vpack.c.bf16 %v3983_v35, %v3981_v9 }
 0x578   : > { %v3685_v6 = vpop.f32.mrf.mxu0  ;;  %v3977_v20 = vmax.f32 %v3855_v7, 0.0  ;;  %v3973_v7 = vmax.f32 %v3845_v52, 0.0 }
 0x579   : > { %v3878_v57 = vpop.f32.mrf.mxu1  ;;  %v4164_v31 = vpack.c.bf16 %v3984_v54, %v3982_v15  ;;  %v3877_v51 = vadd.f32 %v3876_v44, %v3684_v3  ;;  %v3686_v10 = vadd.f32 %v3685_v6, %v6981_v42  ;;  %v3985_v40 = vmax.f32 %v3875_v34, 0.0 }
 0x57a   : > { %v3687_v59 = vpop.f32.mrf.mxu0  ;;  %v4161_v35 = vpack.c.bf16 %v3979_v18, %v3977_v20  ;;  %v3632_v34 = vadd.f32 %v7021_v33, %v6981_v42  ;;  %v3829_v33 = vadd.f32 %v7043_v45, %v7336_v2  ;;  %v4159_v12 = vpack.c.bf16 %v3975_v11, %v3973_v7 }
 0x57b   : > { %v3880_v49 = vpop.f32.mrf.mxu1  ;;  %v3879_v13 = vadd.f32 %v3878_v57, %v3686_v10  ;;  %v3688_v50 = vadd.f32 %v3687_v59, %v6983_v21  ;;  %4181 = vmatprep.subr.bf16.mxu0 %v4164_v31  ;;  %v3986_v60 = vmax.f32 %v3877_v51, 0.0  ;;  %v3970_v57 = vmax.f32 %v7350_v8, 0.0 }
 0x57c   : > { %v3691_v36 = vpop.f32.mrf.mxu0  ;;  %4182 = vmatpush1.bf16.msra.mxu0 %v4163_v14  ;;  %v3819_v14 = vadd.f32 %v7008_v39, %v7318_v26  ;;  %v3825_v59 = vadd.f32 %v7023_v29, %v3632_v34  ;;  %v3966_v45 = vmax.f32 %v3827_v55, 0.0  ;;  %v3969_v2 = vmax.f32 %v3835_v63, 0.0 }
 0x57d   : > { %v3884_v17 = vpop.f32.mrf.mxu1  ;;  %v3987_v27 = vmax.f32 %v3879_v13, 0.0  ;;  %v3881_v1 = vadd.f32 %v3880_v49, %v3688_v50  ;;  %v3692_v19 = vadd.f32 %v3691_v36, %v6981_v42  ;;  %4183 = vmatprep.subr.bf16.mxu0 %v4162_v48  ;;  %v4158_v8 = vpack.c.bf16 %v3972_v23, %v3970_v57 }
 0x57e   : > { %v3693_v44 = vpop.f32.mrf.mxu0  ;;  %v3967_v41 = vmax.f32 %v3829_v33, 0.0  ;;  %v4156_v23 = vpack.c.bf16 %v3968_v38, %v3966_v45  ;;  %v4157_v52 = vpack.c.bf16 %v3971_v32, %v3969_v2 }
 0x57f   : > { %v3886_v15 = vpop.f32.mrf.mxu1  ;;  %v7387_v43 = vpack.c.bf16 %v3987_v27, %v3985_v40  ;;  %v3988_v22 = vmax.f32 %v3881_v1, 0.0  ;;  %v3885_v54 = vadd.f32 %v3884_v17, %v3692_v19  ;;  %v3694_v3 = vadd.f32 %v3693_v44, %v6983_v21 }
 0x580   : > { %v3695_v9 = vpop.f32.mrf.mxu0  ;;  %4184 = vmatpush1.bf16.msra.mxu0 %v4161_v35  ;;  %v3965_v17 = vmax.f32 %v3825_v59, 0.0  ;;  %v3963_v19 = vmax.f32 %v3819_v14, 0.0  ;;  %v3961_v44 = vmax.f32 %v7004_v62, 0.0 }
 0x581   : > { %7827 = vst [vmem:[#allocation76_spill] sm:$0xff] %v7387_v43  ;;  %v3888_v6 = vpop.f32.mrf.mxu1  ;;  %v7397_v28 = vpack.c.bf16 %v3988_v22, %v3986_v60  ;;  %v3887_v31 = vadd.f32 %v3886_v15, %v3694_v3  ;;  %v3696_v51 = vadd.f32 %v3695_v9, %v6981_v42  ;;  %4185 = vmatprep.subr.bf16.mxu0 %v4160_v24  ;;  %v3989_v5 = vmax.f32 %v3885_v54, 0.0 }
 0x582   : > { %v3697_v46 = vpop.f32.mrf.mxu0  ;;  %v4155_v11 = vpack.c.bf16 %v3967_v41, %v3965_v17  ;;  %v4154_v60 = vpack.c.bf16 %v3964_v61, %v3962_v4  ;;  %v4153_v54 = vpack.c.bf16 %v3963_v19, %v3961_v44 }
 0x583   : > { %7828 = vst [vmem:[#allocation77_spill] sm:$0xff] %v7397_v28  ;;  %v3890_v10 = vpop.f32.mrf.mxu1  ;;  %v3889_v0 = vadd.f32 %v3888_v6, %v3696_v51  ;;  %v3698_v18 = vadd.f32 %v3697_v46, %v6983_v21  ;;  %v3990_v29 = vmax.f32 %v3887_v31, 0.0 }
 0x584   : > { %v3701_v58 = vpop.f32.mrf.mxu0  ;;  %4186 = vmatpush1.bf16.msra.mxu0 %v4159_v12 }
 0x585   : > { %v3894_v49 = vpop.f32.mrf.mxu1  ;;  %v3991_v48 = vmax.f32 %v3889_v0, 0.0  ;;  %v3891_v13 = vadd.f32 %v3890_v10, %v3698_v18  ;;  %v3702_v50 = vadd.f32 %v3701_v58, %v6981_v42  ;;  %4187 = vmatprep.subr.bf16.mxu0 %v4158_v8 }
 0x586   : > { %v7412_v25 = vpop.f32.mrf.mxu0 }
 0x587   : > { %v7414_v39 = vpop.f32.mrf.mxu1  ;;  %v7416_v26 = vpack.c.bf16 %v3991_v48, %v3989_v5  ;;  %v3992_v20 = vmax.f32 %v3891_v13, 0.0  ;;  %v7418_v36 = vadd.f32 %v3894_v49, %v3702_v50 }
 0x588   : > { %v7420_v40 = vpop.f32.mrf.mxu0  ;;  %4188 = vmatpush1.bf16.msra.mxu0 %v4157_v52 }
 0x589   : > { %7829 = vst [vmem:[#allocation78_spill] sm:$0xff] %v7416_v26  ;;  %v7422_v27 = vpop.f32.mrf.mxu1  ;;  %v7424_v1 = vpack.c.bf16 %v3992_v20, %v3990_v29  ;;  %4189 = vmatprep.subr.bf16.mxu0 %v4156_v23 }
 0x58a   : > { %v7426_v24 = vpop.f32.mrf.mxu0 }
 0x58b   : > { %v7428_v35 = vpop.f32.mrf.mxu1 }
 0x58c   : > { %v7431_v15 = vpop.f32.mrf.mxu0  ;;  %4190 = vmatpush1.bf16.msra.mxu0 %v4155_v11 }
 0x58d   : > { %v7433_v22 = vpop.f32.mrf.mxu1  ;;  %4191 = vmatprep.subr.bf16.mxu0 %v4154_v60 }
 0x58e   : > { %v7435_v3 = vpop.f32.mrf.mxu0 }
 0x58f   : > { %v7437_v34 = vpop.f32.mrf.mxu1 }
 0x590   : > { %v7439_v55 = vpop.f32.mrf.mxu0  ;;  %4192 = vmatpush1.bf16.msra.mxu0 %v4153_v54 }
 0x591   : > { %v7441_v63 = vpop.f32.mrf.mxu1  ;;  %4193 = vmatprep.subr.bf16.mxu0 %v7012_v56 }
 0x592   : > { %v7444_v7 = vpop.f32.mrf.mxu0 }
 0x593   : > { %v7446_v62 = vpop.f32.mrf.mxu1 }
 0x594   : > { %v7448_v9 = vpop.f32.mrf.mxu0  ;;  %4194 = vmatpush1.bf16.msra.mxu0 %v7002_v53 }
 0x595   : > { %v7450_v6 = vpop.f32.mrf.mxu1  ;;  %4195 = vmatprep.subr.bf16.mxu0 %v6993_v37 }
 0x596   : > { %v3723_v57 = vpop.f32.mrf.mxu0 }
 0x597   : > { %v7454_v31 = vpop.f32.mrf.mxu1 }
 0x598   : > { %v3725_v51 = vpop.f32.mrf.mxu0  ;;  %4196 = vmatpush1.bf16.msra.mxu0 %v6990_v30 }
 0x599   : > { %v7456_v33 = vpop.f32.mrf.mxu1 }
 0x59a   : > { %v3727_v56 = vpop.f32.mrf.mxu0 }
 0x59b   : > { %v3920_v38 = vpop.f32.mrf.mxu1 }
 0x59c   : > { %v3731_v32 = vpop.f32.mrf.mxu0 }
 0x59d   : > { %v7459_v12 = vpop.f32.mrf.mxu1 }
 0x59e   : > { %v3733_v46 = vpop.f32.mrf.mxu0 }
 0x59f   : > { %v3926_v10 = vpop.f32.mrf.mxu1  ;;  %v3734_v43 = vadd.f32 %v3733_v46, %v6983_v21 }
 0x5a0   : > { %v3735_v16 = vpop.f32.mrf.mxu0 }
 0x5a1   : > { %v3928_v8 = vpop.f32.mrf.mxu1 }
 0x5a2   : > { %v3737_v53 = vpop.f32.mrf.mxu0 }
 0x5a3   : > { %v3930_v0 = vpop.f32.mrf.mxu1  ;;  %v3738_v17 = vadd.f32 %v3737_v53, %v6983_v21  ;;  %v3736_v53 = vadd.f32 %v3735_v16, %v6981_v42 }
 0x5a4   : > { %v3741_v37 = vpop.f32.mrf.mxu0 }
 0x5a5   : > { %v3934_v18 = vpop.f32.mrf.mxu1  ;;  %v3931_v26 = vadd.f32 %v3930_v0, %v3738_v17  ;;  %v3718_v0 = vadd.f32 %v7444_v7, %v6983_v21  ;;  %v3716_v7 = vadd.f32 %v7439_v55, %v6981_v42  ;;  %v3704_v55 = vadd.f32 %v7412_v25, %v6983_v21 }
 0x5a6   : > { %v3743_v14 = vpop.f32.mrf.mxu0 }
 0x5a7   : > { %v3936_v59 = vpop.f32.mrf.mxu1  ;;  %v3744_v29 = vadd.f32 %v3743_v14, %v6983_v21  ;;  %v4008_v17 = vmax.f32 %v3931_v26, 0.0 }
 0x5a8   : > { %v3745_v45 = vpop.f32.mrf.mxu0 }
 0x5a9   : > { %v3938_v2 = vpop.f32.mrf.mxu1  ;;  %v3746_v4 = vadd.f32 %v3745_v45, %v6981_v42  ;;  %v3937_v47 = vadd.f32 %v3936_v59, %v3744_v29  ;;  %v3726_v29 = vadd.f32 %v3725_v51, %v6981_v42 }
 0x5aa   : > { %v3747_v58 = vpop.f32.mrf.mxu0 }
 0x5ab   : > { %v3940_v49 = vpop.f32.mrf.mxu1  ;;  %v3748_v50 = vadd.f32 %v3747_v58, %v6983_v21  ;;  %v3742_v58 = vadd.f32 %v3741_v37, %v6981_v42  ;;  %v3939_v28 = vadd.f32 %v3938_v2, %v3746_v4  ;;  %v4010_v46 = vmax.f32 %v3937_v47, 0.0 }
 0x5ac   : > { %v3751_v30 = vpop.f32.mrf.mxu0  ;;  %v3714_v47 = vadd.f32 %v7435_v3, %v6983_v21  ;;  %v3919_v26 = vadd.f32 %v7456_v33, %v3726_v29  ;;  %v3712_v3 = vadd.f32 %v7431_v15, %v6981_v42 }
 0x5ad   : > { %v3944_v5 = vpop.f32.mrf.mxu1  ;;  %v3752_v41 = vadd.f32 %v3751_v30, %v6981_v42  ;;  %v3941_v11 = vadd.f32 %v3940_v49, %v3748_v50 }
 0x5ae   : > { %v3753_v48 = vpop.f32.mrf.mxu0  ;;  %v3907_v33 = vadd.f32 %v7437_v34, %v3714_v47 }
 0x5af   : > { %v3946_v13 = vpop.f32.mrf.mxu1  ;;  %v3754_v61 = vadd.f32 %v3753_v48, %v6983_v21  ;;  %v3945_v48 = vadd.f32 %v3944_v5, %v3752_v41  ;;  %v4012_v49 = vmax.f32 %v3941_v11, 0.0  ;;  %v3724_v5 = vadd.f32 %v3723_v57, %v6983_v21 }
 0x5b0   : > { %v3755_v23 = vpop.f32.mrf.mxu0  ;;  %v3927_v41 = vadd.f32 %v3926_v10, %v3734_v43  ;;  %v3998_v25 = vmax.f32 %v3907_v33, 0.0 }
 0x5b1   : > { %v3948_v52 = vpop.f32.mrf.mxu1  ;;  %v3756_v20 = vadd.f32 %v3755_v23, %v6981_v42  ;;  %v3947_v60 = vadd.f32 %v3946_v13, %v3754_v61  ;;  %v3728_v23 = vadd.f32 %v3727_v56, %v6983_v21  ;;  %v3732_v61 = vadd.f32 %v3731_v32, %v6981_v42 }
 0x5b2   : > { %v3757_v19 = vpop.f32.mrf.mxu0  ;;  %v4013_v37 = vmax.f32 %v3945_v48, 0.0  ;;  %v3929_v56 = vadd.f32 %v3928_v8, %v3736_v53  ;;  %v4178_v4 = vpack.c.bf16 %v4012_v49, %v4010_v46  ;;  %v3722_v32 = vadd.f32 %v7448_v9, %v6981_v42  ;;  %v7831_v49 = vld [vmem:[#allocation77_spill] sm:$0xff] }
 0x5b3   : > { %v3949_v44 = vadd.f32 %v3948_v52, %v3756_v20  ;;  %v3758_v54 = vadd.f32 %v3757_v19, %v6983_v21  ;;  %v3950_v30 = vpop.f32.mrf.mxu1  ;;  %v4014_v13 = vmax.f32 %v3947_v60, 0.0  ;;  %v3935_v52 = vadd.f32 %v3934_v18, %v3742_v58 }
 0x5b4   : > { %v4011_v20 = vmax.f32 %v3939_v28, 0.0  ;;  %v3921_v2 = vadd.f32 %v3920_v38, %v3728_v23  ;;  %v3925_v57 = vadd.f32 %v7459_v12, %v3732_v61  ;;  %v3917_v28 = vadd.f32 %v7454_v31, %v3724_v5  ;;  %v7833_v61 = vld [vmem:[#allocation76_spill] sm:$0xff]  ;;  %v4146_v5 = vld [vmem:[#allocation4 + $0x8] sm:$0xff] }
 0x5b5   : > { %v3951_v14 = vadd.f32 %v3950_v30, %v3758_v54  ;;  %v4015_v45 = vmax.f32 %v3949_v44, 0.0  ;;  %v4009_v43 = vmax.f32 %v3935_v52, 0.0  ;;  %v4006_v51 = vmax.f32 %v3927_v41, 0.0  ;;  %v4145_v52 = vld [vmem:[#allocation4] sm:$0xff] }
 0x5b6   : > { %v4007_v38 = vmax.f32 %v3929_v56, 0.0  ;;  %v3708_v9 = vadd.f32 %v7426_v24, %v6983_v21  ;;  %v3911_v12 = vadd.f32 %v7446_v62, %v3718_v0  ;;  %v4004_v8 = vmax.f32 %v3921_v2, 0.0 }
 0x5b7   : > { %v4016_v50 = vmax.f32 %v3951_v14, 0.0  ;;  %v4179_v16 = vpack.c.bf16 %v4015_v45, %v4013_v37  ;;  %v4177_v10 = vpack.c.bf16 %v4011_v20, %v4009_v43  ;;  %v4176_v18 = vpack.c.bf16 %v4008_v17, %v4006_v51 }
 0x5b8   : > { %v3915_v31 = vadd.f32 %v7450_v6, %v3722_v32  ;;  %v4005_v19 = vmax.f32 %v3925_v57, 0.0  ;;  %v4002_v11 = vmax.f32 %v3917_v28, 0.0  ;;  %v3706_v24 = vadd.f32 %v7420_v40, %v6981_v42 }
 0x5b9   : > { %v4180_v59 = vpack.c.bf16 %v4016_v50, %v4014_v13  ;;  %v3909_v62 = vadd.f32 %v7441_v63, %v3716_v7  ;;  %v4003_v60 = vmax.f32 %v3919_v26, 0.0  ;;  %v3901_v15 = vadd.f32 %v7428_v35, %v3708_v9  ;;  %v7832_v13 = vld [vmem:[#allocation75_spill] sm:$0xff] }
 0x5ba   : > { %v4175_v44 = vpack.c.bf16 %v4007_v38, %v4005_v19  ;;  %v4000_v54 = vmax.f32 %v3911_v12, 0.0  ;;  %v4174_v6 = vpack.c.bf16 %v4004_v8, %v4002_v11  ;;  %v3905_v58 = vadd.f32 %v7433_v22, %v3712_v3 }
 0x5bb   : > { %4197 = vmatprep.subr.bf16.mxu0 %v4180_v59  ;;  %v4001_v48 = vmax.f32 %v3915_v31, 0.0  ;;  %v3897_v21 = vadd.f32 %v7414_v39, %v3704_v55  ;;  %v3899_v34 = vadd.f32 %v7422_v27, %v3706_v24  ;;  %v3999_v30 = vmax.f32 %v3909_v62, 0.0  ;;  %v7830_v27 = vld [vmem:[#allocation78_spill] sm:$0xff] }
 0x5bc   : > { %4198 = vmatpush2.bf16.msra.mxu0 %v4179_v16  ;;  %v3996_v40 = vmax.f32 %v3901_v15, 0.0  ;;  %v4172_v63 = vpack.c.bf16 %v4000_v54, %v3998_v25  ;;  %v3997_v14 = vmax.f32 %v3905_v58, 0.0  ;;  %v3993_v22 = vmax.f32 %v7418_v36, 0.0 }
 0x5bd   : > { %4199 = vmatprep.subr.bf16.mxu0 %v4178_v4  ;;  %v4173_v42 = vpack.c.bf16 %v4003_v60, %v4001_v48  ;;  %v3994_v23 = vmax.f32 %v3897_v21, 0.0  ;;  %v3995_v35 = vmax.f32 %v3899_v34, 0.0  ;;  %v4147_v50 = vpack.c.bf16 %v7832_v13, %v7832_v13 }
 0x5be   : > { %v4171_v53 = vpack.c.bf16 %v3999_v30, %v3997_v14 }
 0x5bf   : > { %v4170_v45 = vpack.c.bf16 %v3996_v40, %v3994_v23  ;;  %v4169_v39 = vpack.c.bf16 %v3995_v35, %v3993_v22 }
 0x5c0   : > { %4200 = vmatpush2.bf16.msra.mxu0 %v4177_v10 }
 0x5c1   : > { %4201 = vmatprep.subr.bf16.mxu0 %v4176_v18 }
 0x5c4   : > { %4202 = vmatpush2.bf16.msra.mxu0 %v4175_v44 }
 0x5c5   : > { %4203 = vmatprep.subr.bf16.mxu0 %v4174_v6 }
 0x5c8   : > { %4204 = vmatpush2.bf16.msra.mxu0 %v4173_v42 }
 0x5c9   : > { %4205 = vmatprep.subr.bf16.mxu0 %v4172_v63 }
 0x5cc   : > { %4206 = vmatpush2.bf16.msra.mxu0 %v4171_v53 }
 0x5cd   : > { %4207 = vmatprep.subr.bf16.mxu0 %v4170_v45 }
 0x5d0   : > { %4208 = vmatpush2.bf16.msra.mxu0 %v4169_v39 }
 0x5d1   : > { %4209 = vmatprep.subr.bf16.mxu0 %v7424_v1 }
 0x5d4   : > { %4210 = vmatpush2.bf16.msra.mxu0 %v7830_v27 }
 0x5d5   : > { %4211 = vmatprep.subr.bf16.mxu0 %v7831_v49 }
 0x5d8   : > { %4212 = vmatpush2.bf16.msra.mxu0 %v7833_v61 }
 0x5db   : > { %4214 = vmatmul.mubr.bf16.vlgmr.msra.gmra.mxu0 %v4147_v50 }
 0x69b   : > { %v4215_v37 = vpop.f32.mrf.mxu0 }
 0x69c   : > { %v4222_v36 = vadd.f32 %v4215_v37, %v4145_v52 }
 0x69d   : > { %v4217_v41 = vpop.f32.mrf.mxu0 }
 0x69e   : > { %4224 = vst [vmem:[#allocation4] sm:$0xff] %v4222_v36  ;;  %v4223_v46 = vadd.f32 %v4217_v41, %v4146_v5 }
 0x69f   : > { %v4219_v59 = vpop.f32.mrf.mxu0 }
 0x6a0   : > { %4225 = vst [vmem:[#allocation4 + $0x8] sm:$0xff] %v4223_v46 }
 0x6a1   : > { %v4220_v1 = vpop.f32.mrf.mxu0 }
 0x6a2 PF: > { %p4226_p12 = scmp.eq.s32.totalorder %s6092_s0, 1 }
 0x6a4   : > { %p4227_p3 = pnand %p4226_p12, %p2847_p6 }
 0x6a6   : > { %4230 = sbr.rel (%p4227_p3) target bundleno = 2253 (0x8cd), region = 88 }
 0x6ab   : > { %v4264_v29 = vld [vmem:[#allocation16 + $0xf8] sm:$0xff]  ;;  %v4263_v20 = vld [vmem:[#allocation16 + $0xf0] sm:$0xff]  ;;  %v4262_v0 = vld [vmem:[#allocation16 + $0xe8] sm:$0xff]  ;;  %v4342_v6 = vlaneseq }
 0x6ac   : > { %v4248_v56 = vld [vmem:[#allocation16 + $0x78] sm:$0xff]  ;;  %5426 = vmatprep.subr.mxu0 %v4264_v29  ;;  %v4247_v16 = vld [vmem:[#allocation16 + $0x70] sm:$0xff]  ;;  %v4246_v2 = vld [vmem:[#allocation16 + $0x68] sm:$0xff] }
 0x6ad   : > { %5427 = vmatpush3.msra.mxu0 %v4248_v56  ;;  %v4261_v17 = vld [vmem:[#allocation16 + $0xe0] sm:$0xff]  ;;  %v4260_v32 = vld [vmem:[#allocation16 + $0xd8] sm:$0xff]  ;;  %v4259_v43 = vld [vmem:[#allocation16 + $0xd0] sm:$0xff]  ;;  %v4343_v48 = vand.u32 127, %v4342_v6 }
 0x6ae   : > { %5428 = vmatprep.subr.mxu0 %v4263_v20  ;;  %v4245_v4 = vld [vmem:[#allocation16 + $0x60] sm:$0xff]  ;;  %v4244_v57 = vld [vmem:[#allocation16 + $0x58] sm:$0xff]  ;;  %v4243_v47 = vld [vmem:[#allocation16 + $0x50] sm:$0xff] }
 0x6af   : > { %5429 = vmatpush3.msra.mxu0 %v4247_v16  ;;  %v4258_v28 = vld [vmem:[#allocation16 + $0xc8] sm:$0xff]  ;;  %v4232_v51 = vld [vmem:[#allocation4 + $0x8] sm:$0xff]  ;;  %v4257_v26 = vld [vmem:[#allocation16 + $0xc0] sm:$0xff]  ;;  %vm4344_vm12 = vcmp.lt.s32.totalorder %v4343_v48, 10 }
 0x6b0   : > { %5430 = vmatprep.subr.mxu0 %v4262_v0  ;;  %v4242_v7 = vld [vmem:[#allocation16 + $0x48] sm:$0xff]  ;;  %4336 = vmatprep.mubr.f32.mxu0 %v4232_v51  ;;  %v4241_v38 = vld [vmem:[#allocation16 + $0x40] sm:$0xff]  ;;  %v4256_v10 = vld [vmem:[#allocation16 + $0xb8] sm:$0xff] }
 0x6b1   : > { %5431 = vmatpush3.msra.mxu0 %v4246_v2  ;;  %v4240_v9 = vld [vmem:[#allocation16 + $0x38] sm:$0xff]  ;;  %v4255_v12 = vld [vmem:[#allocation16 + $0xb0] sm:$0xff]  ;;  %v4254_v18 = vld [vmem:[#allocation16 + $0xa8] sm:$0xff] }
 0x6b2   : > { %5432 = vmatprep.subr.mxu0 %v4261_v17  ;;  %v4239_v8 = vld [vmem:[#allocation16 + $0x30] sm:$0xff]  ;;  %v4238_v3 = vld [vmem:[#allocation16 + $0x28] sm:$0xff]  ;;  %v4253_v31 = vld [vmem:[#allocation16 + $0xa0] sm:$0xff] }
 0x6b3   : > { %5433 = vmatpush3.msra.mxu0 %v4245_v4  ;;  %v4237_v19 = vld [vmem:[#allocation16 + $0x20] sm:$0xff]  ;;  %v4252_v55 = vld [vmem:[#allocation16 + $0x98] sm:$0xff]  ;;  %v4251_v11 = vld [vmem:[#allocation16 + $0x90] sm:$0xff] }
 0x6b4   : > { %5434 = vmatprep.subr.mxu0 %v4260_v32  ;;  %v4236_v33 = vld [vmem:[#allocation16 + $0x18] sm:$0xff]  ;;  %v4235_v24 = vld [vmem:[#allocation16 + $0x10] sm:$0xff]  ;;  %v4250_v62 = vld [vmem:[#allocation16 + $0x88] sm:$0xff] }
 0x6b5   : > { %5435 = vmatpush3.msra.mxu0 %v4244_v57  ;;  %v4234_v60 = vld [vmem:[#allocation16 + $0x8] sm:$0xff]  ;;  %v4249_v44 = vld [vmem:[#allocation16 + $0x80] sm:$0xff]  ;;  %v4231_v54 = vld [vmem:[#allocation4] sm:$0xff] }
 0x6b6   : > { %5436 = vmatprep.subr.mxu0 %v4259_v43  ;;  %v4233_v15 = vld [vmem:[#allocation16] sm:$0xff]  ;;  %v4868_v25 = vld [vmem:[%s7556_s9] ss:$0 sm:$0xff] }
 0x6b7   : > { %5437 = vmatpush3.msra.mxu0 %v4243_v47 }
 0x6b8   : > { %5438 = vmatprep.subr.mxu0 %v4258_v28 }
 0x6b9   : > { %5439 = vmatpush3.msra.mxu0 %v4242_v7 }
 0x6ba   : > { %5440 = vmatprep.subr.mxu0 %v4257_v26 }
 0x6bb   : > { %5441 = vmatpush3.msra.mxu0 %v4241_v38 }
 0x6bc   : > { %5442 = vmatprep.subr.mxu0 %v4256_v10 }
 0x6bd   : > { %5443 = vmatpush3.msra.mxu0 %v4240_v9 }
 0x6be   : > { %5444 = vmatprep.subr.mxu0 %v4255_v12 }
 0x6bf   : > { %5445 = vmatpush3.msra.mxu0 %v4239_v8 }
 0x6c0   : > { %5446 = vmatprep.subr.mxu0 %v4254_v18 }
 0x6c1   : > { %5447 = vmatpush3.msra.mxu0 %v4238_v3 }
 0x6c2   : > { %5448 = vmatprep.subr.mxu0 %v4253_v31 }
 0x6c3   : > { %5449 = vmatpush3.msra.mxu0 %v4237_v19 }
 0x6c4   : > { %5450 = vmatprep.subr.mxu0 %v4252_v55 }
 0x6c5   : > { %5451 = vmatpush3.msra.mxu0 %v4236_v33 }
 0x6c6   : > { %5452 = vmatprep.subr.mxu0 %v4251_v11 }
 0x6c7   : > { %5453 = vmatpush3.msra.mxu0 %v4235_v24 }
 0x6c8   : > { %5454 = vmatprep.subr.mxu0 %v4250_v62 }
 0x6c9   : > { %5455 = vmatpush3.msra.mxu0 %v4234_v60 }
 0x6ca   : > { %5456 = vmatprep.subr.mxu0 %v4249_v44 }
 0x6cb   : > { %5457 = vmatpush3.msra.mxu0 %v4233_v15 }
 0x6cc   : > { %4337 = vmatmul.mubr.f32.vlgmr.msra.gmra.mxu0 %v4231_v54 }
 0x78c   : > { %v5458_v58 = vpop.f32.mrf.mxu0 }
 0x78e   : > { %v5459_v21 = vpop.f32.mrf.mxu0 }
 0x78f   : > { %v5460_v34 = vadd.f32 %v5459_v21, %v5458_v58 }
 0x791   : > { %v4339_v30 = vadd.f32 %v5460_v34, %v4868_v25 }
 0x793   : > { %v4345_v42 = vsel %vm4344_vm12, %v4339_v30, -1e+30 }
 0x794   : > { %4346 = vmax.xlane.f32.xlu0 %v4345_v42 }
 0x81d   : > { %v4347_v40 = vpop.xlane.xlu0 %4346 }
 0x81e   : > { %v4348_v63 = vsub.f32 %v4345_v42, %v4347_v40 }
 0x820   : > { %v4349_v14 = vmul.f32 1.442695, %v4348_v63 }
 0x822   : > { %5874 = vpow2.f32 %v4349_v14 }
 0x82f   : > { %v5875_v23 = vpop.eup %5874 }
 0x830   : > { %4351 = vadd.xlane.f32.xlu0 %v5875_v23 }
 0x8b9   : > { %v4352_v35 = vpop.xlane.xlu0 %4351 }
 0x8ba   : > { %5876 = vlog2.f32 %v4352_v35 }
 0x8c7   : > { %v5877_v53 = vpop.eup %5876 }
 0x8c8   : > { %v4354_v45 = vmul.f32 0.6931472, %v5877_v53 }
 0x8ca   : > { %v4355_v22 = vsub.f32 %v4348_v63, %v4354_v45 }
 0x8cc   : > { %4356 = vst [vmem:[#allocation17] sm:$0xff] %v4355_v22 }
 0x8cd PF: > { %s7834_s20 = sadd.s32 4294967295, %s6108_s23   ;;  %s6126_s25 = smov [#allocation17]  }
 0x8ce   : > { %p7518_p13 = scmp.eq.s32.totalorder %s7834_s20, 3  ;;  %s4364_s16 = sshll.u32 %s6126_s25, 4  ;;  %s4365_s16 = int_to_ptr.vmem [resolvable:$true] %s4364_s16 }
 0x8cf   : > { %s6028_s18 = scalar_lea.vmem %s4365_s16, 128  ;;  %p6035_p5 = scmp.lt.s32.totalorder %s4365_s16, %s4365_s16 }
 0x8d0   : > { %p6029_p0 = scmp.ne.s32.totalorder %s4365_s16, %s6028_s18  ;;  %p6036_p4 = scmp.lt.s32.totalorder %s6028_s18, %s6028_s18 }
 0x8d2   : > { %p6030_p1 = pnand %p6029_p0, %p7518_p13  ;;  %p6037_p8 = por %p6036_p4, %p6035_p5 }
 0x8d4   : > { %p6031_p2 = pneg %p6030_p1 }
 0x8d6   : > { %p6038_p10 = pnand %p6037_p8, %p6031_p2 }
 0x8d8   : > { %6041 = shalt.err (!%p6038_p10)
}
 0x8d9   : > { %5594 = dma.vmem_to_hbm [thread:$0]  (%p7518_p13), %s4365_s16, 128, %s7557_s10, [#allocation10]  }
 0x8da   : > { %6087 = dma.done.wait (%p7518_p13), [#allocation10], 128  }
 0x8db   : > { %6089 = vsyncadd (%p7518_p13), [#allocation10], 4294967168 }
 0x8dc PF: > { %s32_s23 = sadd.s32 1, %s6108_s23   ;;  %s7836_s0 = smov %s6100_s21 }
 0x8dd   : > { %p29_p11 = scmp.ge.s32.totalorder %s32_s23, 6   ;;  %s7837_s1 = smov %s6104_s22 }
 0x8de   : > { %s7838_s21 = smov %s7841_s29  ;;  %s7839_s22 = smov %s7845_s13 }
 0x8df   :  { %31 = sbr.rel (!%p29_p11) target bundleno = 22 (0x16), region = 115 }
 0x8e4   :  { %4377 = vsyncpa [#allocation9], 1 }
 0x8e5   :  { %4379 = vsyncpa [#allocation9 + $0x1], 1 }
 0x8e6   :  { %4380 = vsyncpa [#allocation12], 1 }
 0x8e7   :  { %4381 = vsyncpa [#allocation15], 1 }
 0x8e8   :  { %4382 = vsyncpa [#allocation10], 1 }
 0x8e9   :  { %4384 = vsyncpa [#allocation10 + $0x1], 1 }

</bundles_post_ra>
